<compile_context>
chip_gen: v6e
topology: v6e:2x2x1
jax: 0.10.0
libtpu: 0.0.40
codegen_flags: <defaults>
</compile_context>

<pallas_src>
import functools

import numpy as np

import jax
import jax.numpy as jnp
from jax.experimental import pallas as pl
from jax.experimental.pallas import tpu as pltpu

KSIZE = 5  # conv kernel size for both layers (stride 1, padding 2)


def _round_up(x, m):
    return (x + m - 1) // m * m


# --------------------------------- kernels --------------------------------- #

def _conv_body(x_ref, t_ref, b_ref, *, tb, rows):
    """Fused conv5x5 + bias + ReLU + 2x2 maxpool on a q-major stacked block.

    x_ref : (1, (rows + nkp - 1) * tb, K)  bf16  paired-padded rows, row = q*tb + image
    t_ref : (nkp, K, 4*half)               bf16  parity-concatenated Toeplitz slabs
    b_ref : (1, 2*half)                    f32   per-output-column bias
    returns (rows*tb, half) f32 pooled activations, rows ordered (pool_row, image).
    """
    nkp = t_ref.shape[0]
    half = t_ref.shape[-1] // 4
    m = rows * tb
    acc = jnp.dot(x_ref[0, 0:m, :], t_ref[0], preferred_element_type=jnp.float32)
    for kp in range(1, nkp):                       # contiguous whole-stack kp windows
        acc = acc + jnp.dot(x_ref[0, kp * tb:kp * tb + m, :], t_ref[kp],
                            preferred_element_type=jnp.float32)
    z = jnp.maximum(acc[:, :2 * half], acc[:, 2 * half:])   # pool over conv-row parity
    z = jnp.maximum(z + b_ref[...], 0.0)                     # bias + ReLU (same bias/parity)
    return jnp.maximum(z[:, :half], z[:, half:])             # pool over column pairs


def _conv_relu_pool_kernel(x_ref, t_ref, b_ref, o_ref, *, tb, rows):
    o_ref[0] = _conv_body(x_ref, t_ref, b_ref, tb=tb, rows=rows).astype(o_ref.dtype)


def _conv_relu_pool_fc_kernel(x_ref, t_ref, b_ref, w_ref, fb_ref, o_ref, *, tb, rows):
    act = _conv_body(x_ref, t_ref, b_ref, tb=tb, rows=rows).astype(jnp.bfloat16)
    # q-major ordering: pool-row r of all tb images is the contiguous slab act[r*tb:(r+1)*tb].
    logits = jnp.dot(act[0:tb, :], w_ref[0], preferred_element_type=jnp.float32)
    for r in range(1, rows):
        logits = logits + jnp.dot(act[r * tb:(r + 1) * tb, :], w_ref[r],
                                  preferred_element_type=jnp.float32)
    o_ref[0] = logits + fb_ref[...]


# ------------------------------ layer wrappers ------------------------------ #

def conv_relu_pool(xq, t, brow, *, tb, rows):
    nb, min_rows, k = xq.shape
    half = t.shape[-1] // 4
    m = rows * tb
    return pl.pallas_call(
        functools.partial(_conv_relu_pool_kernel, tb=tb, rows=rows),
        out_shape=jax.ShapeDtypeStruct((nb, m, half), jnp.bfloat16),
        grid=(nb,),
        in_specs=[
            pl.BlockSpec((1, min_rows, k), lambda b: (b, 0, 0)),
            pl.BlockSpec(t.shape, lambda b: (0, 0, 0)),      # weights VMEM-resident
            pl.BlockSpec(brow.shape, lambda b: (0, 0)),      # bias resident
        ],
        out_specs=pl.BlockSpec((1, m, half), lambda b: (b, 0, 0)),
        compiler_params=pltpu.CompilerParams(dimension_semantics=("parallel",)),
    )(xq, t, brow)


def conv_relu_pool_fc(xq, t, brow, fcw, fcb, *, tb, rows):
    nb, min_rows, k = xq.shape
    nout = fcw.shape[-1]
    return pl.pallas_call(
        functools.partial(_conv_relu_pool_fc_kernel, tb=tb, rows=rows),
        out_shape=jax.ShapeDtypeStruct((nb, tb, nout), jnp.float32),
        grid=(nb,),
        in_specs=[
            pl.BlockSpec((1, min_rows, k), lambda b: (b, 0, 0)),
            pl.BlockSpec(t.shape, lambda b: (0, 0, 0)),
            pl.BlockSpec(brow.shape, lambda b: (0, 0)),
            pl.BlockSpec(fcw.shape, lambda b: (0, 0, 0)),    # FC weight resident (~0.9 MiB)
            pl.BlockSpec(fcb.shape, lambda b: (0, 0)),
        ],
        out_specs=pl.BlockSpec((1, tb, nout), lambda b: (b, 0, 0)),
        compiler_params=pltpu.CompilerParams(dimension_semantics=("parallel",)),
    )(xq, t, brow, fcw, fcb)


def cnn_forward(x_nchw, params, *, tb=32):
    # Mirrors CNN.forward: conv1 -> conv2 -> flatten -> linear (FC fused into conv2 kernel).
    B = x_nchw.shape[0]
    tb = max(1, min(tb, B))
    b_pad = _round_up(B, tb)
    nb = b_pad // tb

    x = jnp.transpose(x_nchw, (0, 2, 3, 1))                       # NCHW -> NHWC (C=1)
    if b_pad != B:
        x = jnp.pad(x, ((0, b_pad - B), (0, 0), (0, 0), (0, 0)))

    # conv1 input: pad spatially, pair rows, q-major stack, fold the 3 kp windows into K=192
    xp = jnp.pad(x, ((0, 0), (2, 2), (2, 2), (0, 0)))             # (Bp, 32, 32, 1)
    xq = xp.reshape(nb, tb, 16, 64).transpose(0, 2, 1, 3)         # (nb, 16, tb, 64) q-major
    x1 = jnp.concatenate([xq[:, 0:14], xq[:, 1:15], xq[:, 2:16]], axis=-1)
    x1 = x1.reshape(nb, 14 * tb, 3 * 64).astype(jnp.bfloat16)     # (nb, 14*tb, 192)

    a1 = conv_relu_pool(x1, params["t1"], params["b1"], tb=tb, rows=14)
    # a1: (nb, 14*tb, 256) bf16; row = pool_row*tb + image; cols = w*16 + c (first 224 valid)

    # glue to conv2's q-major paired/padded layout (one pad + one tiny transpose, stays bf16)
    y = a1.reshape(nb, 14, tb, 256)[:, :, :, :224].reshape(nb, 14, tb, 14, 16)
    y = jnp.pad(y, ((0, 0), (2, 2), (0, 0), (2, 2), (0, 0)))      # (nb, 18, tb, 18, 16)
    y = y.reshape(nb, 9, 2, tb, 18, 16).transpose(0, 1, 3, 2, 4, 5)
    x2 = y.reshape(nb, 9 * tb, 2 * 18 * 16)                       # (nb, 9*tb, 576) bf16

    # conv2 + ReLU + pool with the Linear fused into the kernel epilogue
    logits = conv_relu_pool_fc(x2, params["t2"], params["b2"],
                               params["fc_w"], params["fc_b"], tb=tb, rows=7)
    return logits.reshape(b_pad, -1)[:B, :10]


# -------------------- weight preprocessing (done once at init) -------------------- #

def _build_fused_conv_params(w_oihw, bias, H, W, fold_kp=False):
    """Block-Toeplitz weights, both pooling-row parities concatenated along N.

    Column layout: n = parity*2*half + wgrp*half + s*O + o  <->  conv row h = 2r+parity,
    conv column w = 2s+wgrp, channel o.  Pooling is then element-wise max over the
    parity halves and the wgrp halves.  If fold_kp, the 3 kp slabs are stacked along K
    (matches an LHS of [xpair[r] | xpair[r+1] | xpair[r+2]]).
    """
    w = np.asarray(w_oihw, np.float32)                  # (O, C, K, K)
    b = np.asarray(bias, np.float32)                    # (O,)
    O, C, Kh, Kw = w.shape
    assert Kh == KSIZE and Kw == KSIZE
    Wp = W + KSIZE - 1
    K = 2 * Wp * C
    half = _round_up((W // 2) * O, 128)                 # lane-dense output slab width
    T = np.zeros((3, K, 4 * half), np.float32)
    brow = np.zeros((1, 2 * half), np.float32)
    for kp in range(3):                                 # paired input row r + kp
        for parity in range(2):                         # conv row h = 2r + parity
            for sub in range(2):                        # padded input row 2(r+kp) + sub
                ki = 2 * kp + sub - parity
                if not 0 <= ki < KSIZE:
                    continue
                for wgrp in range(2):                   # conv column w = 2s + wgrp
                    for s in range(W // 2):
                        wcol = 2 * s + wgrp
                        col = parity * 2 * half + wgrp * half + s * O
                        for kj in range(KSIZE):
                            j = wcol + kj               # padded-input column
                            row = sub * Wp * C + j * C
                            T[kp, row:row + C, col:col + O] = w[:, :, ki, kj].T
    for wgrp in range(2):
        for s in range(W // 2):
            col = wgrp * half + s * O
            brow[0, col:col + O] = b
    if fold_kp:
        T = T.reshape(1, 3 * K, 4 * half)               # kp folded into the contraction dim
    return jnp.asarray(T, jnp.bfloat16), jnp.asarray(brow, jnp.float32)


def _prepare_fc_params(fc_w, fc_b, rows=7, cols=7, ch=32, half=256, n_pad=128):
    # PyTorch flattens (C, H, W); conv2's slab columns are (w, c) per pool-row h.
    # Re-permute once into (h, w*ch + c, n) with zero rows for the lane-pad columns.
    w = np.asarray(fc_w, np.float32).reshape(-1, ch, rows, cols)   # (10, c, h, w)
    n_out = w.shape[0]
    w = np.transpose(w, (2, 3, 1, 0)).reshape(rows, cols * ch, n_out)
    wp = np.zeros((rows, half, n_pad), np.float32)
    wp[:, :cols * ch, :n_out] = w
    bp = np.zeros((1, n_pad), np.float32)
    bp[0, :n_out] = np.asarray(fc_b, np.float32)
    return jnp.asarray(wp, jnp.bfloat16), jnp.asarray(bp, jnp.float32)


def init_raw_params(key):
    k1, k2, k3, k4, k5, k6 = jax.random.split(key, 6)
    return {
        "conv1_w": 0.1 * jax.random.normal(k1, (16, 1, 5, 5), jnp.float32),
        "conv1_b": 0.1 * jax.random.normal(k2, (16,), jnp.float32),
        "conv2_w": 0.1 * jax.random.normal(k3, (32, 16, 5, 5), jnp.float32),
        "conv2_b": 0.1 * jax.random.normal(k4, (32,), jnp.float32),
        "fc_w": 0.05 * jax.random.normal(k5, (10, 32 * 7 * 7), jnp.float32),
        "fc_b": 0.05 * jax.random.normal(k6, (10,), jnp.float32),
    }


def prepare_params(raw):
    t1, b1 = _build_fused_conv_params(raw["conv1_w"], raw["conv1_b"], 28, 28, fold_kp=True)
    t2, b2 = _build_fused_conv_params(raw["conv2_w"], raw["conv2_b"], 14, 14, fold_kp=False)
    fcw, fcb = _prepare_fc_params(raw["fc_w"], raw["fc_b"])
    return {"t1": t1, "b1": b1, "t2": t2, "b2": b2, "fc_w": fcw, "fc_b": fcb}


# ------------------------- pure-JAX reference (f32) ------------------------- #

def reference_forward(x_nchw, raw):
    dn = ("NCHW", "OIHW", "NCHW")
    y = jax.lax.conv_general_dilated(x_nchw, raw["conv1_w"], (1, 1), ((2, 2), (2, 2)),
                                     dimension_numbers=dn)
    y = jnp.maximum(y + raw["conv1_b"][None, :, None, None], 0.0)
    y = jax.lax.reduce_window(y, -jnp.inf, jax.lax.max, (1, 1, 2, 2), (1, 1, 2, 2), "VALID")
    y = jax.lax.conv_general_dilated(y, raw["conv2_w"], (1, 1), ((2, 2), (2, 2)),
                                     dimension_numbers=dn)
    y = jnp.maximum(y + raw["conv2_b"][None, :, None, None], 0.0)
    y = jax.lax.reduce_window(y, -jnp.inf, jax.lax.max, (1, 1, 2, 2), (1, 1, 2, 2), "VALID")
    flat = y.reshape(y.shape[0], -1)
    return flat @ raw["fc_w"].T + raw["fc_b"]


if __name__ == "__main__":
    key = jax.random.PRNGKey(0)
    kx, kparam = jax.random.split(key)
    raw = init_raw_params(kparam)
    params = prepare_params(raw)
    x = jax.random.normal(kx, (2, 1, 28, 28), jnp.float32)   # MNIST-shaped input, batch=2

    logits = jax.jit(cnn_forward)(x, params)
    logits = jax.block_until_ready(logits)
    assert logits.shape == (2, 10), logits.shape

    ref = reference_forward(x, raw)
    err = float(jnp.max(jnp.abs(logits - ref)))
    # Conv and FC matmul operands run in bf16 on the MXU (f32 accumulate) and the conv2
    # activations are stored in bf16, so allow a bf16-sized tolerance vs the f32 reference.
    assert err < 2e-1, f"mismatch vs reference: max abs err = {err}"

    print("KERNEL_OK")
</pallas_src>

<mosaic_0001>
module attributes {stable_mosaic.version = 11 : i64} {
  func.func @_conv_relu_pool_kernel(%arg0: i32, %arg1: memref<1x28x192xbf16, #tpu.memory_space<vmem>>, %arg2: memref<1x192x1024xbf16, #tpu.memory_space<vmem>>, %arg3: memref<1x512xf32, #tpu.memory_space<vmem>>, %arg4: memref<1x28x256xbf16, #tpu.memory_space<vmem>>) attributes {dimension_semantics = [#tpu.dimension_semantics<parallel>], iteration_bounds = array<i64: 1>, scalar_prefetch = 0 : i64, scratch_operands = 0 : i64, tpu.core_type = #tpu.core_type<tc>, window_params = [{transform_indices = @transform_0, window_bounds = array<i64: 1, 28, 192>}, {pipeline_mode = #tpu.pipeline_mode<synchronous>, transform_indices = @transform_1, window_bounds = array<i64: 1, 192, 1024>}, {pipeline_mode = #tpu.pipeline_mode<synchronous>, transform_indices = @transform_2, window_bounds = array<i64: 1, 512>}, {transform_indices = @transform_3, window_bounds = array<i64: 1, 28, 256>}]} {
    %c0 = arith.constant 0 : index
    %c0_0 = arith.constant 0 : index
    %c0_1 = arith.constant 0 : index
    %0 = vector.load %arg1[%c0, %c0_0, %c0_1] : memref<1x28x192xbf16, #tpu.memory_space<vmem>>, vector<1x28x192xbf16>
    %1 = vector.shape_cast %0 : vector<1x28x192xbf16> to vector<28x192xbf16>
    %c0_2 = arith.constant 0 : index
    %c0_3 = arith.constant 0 : index
    %c0_4 = arith.constant 0 : index
    %2 = vector.load %arg2[%c0_2, %c0_3, %c0_4] : memref<1x192x1024xbf16, #tpu.memory_space<vmem>>, vector<1x192x1024xbf16>
    %3 = vector.shape_cast %2 : vector<1x192x1024xbf16> to vector<192x1024xbf16>
    %cst = arith.constant dense<0.000000e+00> : vector<28x1024xf32>
    %4 = tpu.matmul %1, %3, %cst {dimension_numbers = #tpu.dot_dimension_numbers<[1], [0], [0], [1], [0, 0, 1, 1], [], []>} : vector<28x192xbf16>, vector<192x1024xbf16>, vector<28x1024xf32> -> vector<28x1024xf32>
    %5 = vector.extract_strided_slice %4 {offsets = [0, 0], sizes = [28, 512], strides = [1, 1]} : vector<28x1024xf32> to vector<28x512xf32>
    %6 = vector.extract_strided_slice %4 {offsets = [0, 512], sizes = [28, 512], strides = [1, 1]} : vector<28x1024xf32> to vector<28x512xf32>
    %7 = arith.maximumf %5, %6 : vector<28x512xf32>
    %c0_5 = arith.constant 0 : index
    %c0_6 = arith.constant 0 : index
    %8 = vector.load %arg3[%c0_5, %c0_6] : memref<1x512xf32, #tpu.memory_space<vmem>>, vector<1x512xf32>
    %9 = vector.broadcast %8 : vector<1x512xf32> to vector<28x512xf32>
    %10 = arith.addf %7, %9 : vector<28x512xf32>
    %cst_7 = arith.constant 0.000000e+00 : f32
    %11 = vector.broadcast %cst_7 : f32 to vector<28x512xf32>
    %12 = arith.maximumf %10, %11 : vector<28x512xf32>
    %13 = vector.extract_strided_slice %12 {offsets = [0, 0], sizes = [28, 256], strides = [1, 1]} : vector<28x512xf32> to vector<28x256xf32>
    %14 = vector.extract_strided_slice %12 {offsets = [0, 256], sizes = [28, 256], strides = [1, 1]} : vector<28x512xf32> to vector<28x256xf32>
    %15 = arith.maximumf %13, %14 : vector<28x256xf32>
    %16 = arith.truncf %15 : vector<28x256xf32> to vector<28x256xbf16>
    %c0_8 = arith.constant 0 : index
    %c0_9 = arith.constant 0 : index
    %c0_10 = arith.constant 0 : index
    %17 = vector.load %arg4[%c0_8, %c0_9, %c0_10] : memref<1x28x256xbf16, #tpu.memory_space<vmem>>, vector<1x28x256xbf16>
    %18 = vector.shape_cast %17 : vector<1x28x256xbf16> to vector<28x256xbf16>
    %19 = vector.shape_cast %16 : vector<28x256xbf16> to vector<1x28x256xbf16>
    tpu.vector_store %arg4[%c0_8, %c0_9, %c0_10], %19 {strides = array<i32>} : memref<1x28x256xbf16, #tpu.memory_space<vmem>>, vector<1x28x256xbf16>,
    return
  }
  func.func @transform_0(%arg0: i32) -> (i32, i32, i32) {
    %c0_i32 = arith.constant 0 : i32
    %c0_i32_0 = arith.constant 0 : i32
    %c0_i32_1 = arith.constant 0 : i32
    return %arg0, %c0_i32, %c0_i32_0 : i32, i32, i32
  }
  func.func @transform_1(%arg0: i32) -> (i32, i32, i32) {
    %c0_i32 = arith.constant 0 : i32
    %c0_i32_0 = arith.constant 0 : i32
    %c0_i32_1 = arith.constant 0 : i32
    %c0_i32_2 = arith.constant 0 : i32
    return %c0_i32, %c0_i32_0, %c0_i32_1 : i32, i32, i32
  }
  func.func @transform_2(%arg0: i32) -> (i32, i32) {
    %c0_i32 = arith.constant 0 : i32
    %c0_i32_0 = arith.constant 0 : i32
    %c0_i32_1 = arith.constant 0 : i32
    return %c0_i32, %c0_i32_0 : i32, i32
  }
  func.func @transform_3(%arg0: i32) -> (i32, i32, i32) {
    %c0_i32 = arith.constant 0 : i32
    %c0_i32_0 = arith.constant 0 : i32
    %c0_i32_1 = arith.constant 0 : i32
    return %arg0, %c0_i32, %c0_i32_0 : i32, i32, i32
  }
}

module attributes {stable_mosaic.version = 11 : i64} {
  func.func @_conv_relu_pool_fc_kernel(%arg0: i32, %arg1: memref<1x18x576xbf16, #tpu.memory_space<vmem>>, %arg2: memref<3x576x1024xbf16, #tpu.memory_space<vmem>>, %arg3: memref<1x512xf32, #tpu.memory_space<vmem>>, %arg4: memref<7x256x128xbf16, #tpu.memory_space<vmem>>, %arg5: memref<1x128xf32, #tpu.memory_space<vmem>>, %arg6: memref<1x2x128xf32, #tpu.memory_space<vmem>>) attributes {dimension_semantics = [#tpu.dimension_semantics<parallel>], iteration_bounds = array<i64: 1>, scalar_prefetch = 0 : i64, scratch_operands = 0 : i64, tpu.core_type = #tpu.core_type<tc>, window_params = [{transform_indices = @transform_0, window_bounds = array<i64: 1, 18, 576>}, {pipeline_mode = #tpu.pipeline_mode<synchronous>, transform_indices = @transform_1, window_bounds = array<i64: 3, 576, 1024>}, {pipeline_mode = #tpu.pipeline_mode<synchronous>, transform_indices = @transform_2, window_bounds = array<i64: 1, 512>}, {pipeline_mode = #tpu.pipeline_mode<synchronous>, transform_indices = @transform_3, window_bounds = array<i64: 7, 256, 128>}, {pipeline_mode = #tpu.pipeline_mode<synchronous>, transform_indices = @transform_4, window_bounds = array<i64: 1, 128>}, {transform_indices = @transform_5, window_bounds = array<i64: 1, 2, 128>}]} {
    %c0 = arith.constant 0 : index
    %c0_0 = arith.constant 0 : index
    %c0_1 = arith.constant 0 : index
    %0 = vector.load %arg1[%c0, %c0_0, %c0_1] : memref<1x18x576xbf16, #tpu.memory_space<vmem>>, vector<1x14x576xbf16>
    %1 = vector.shape_cast %0 : vector<1x14x576xbf16> to vector<14x576xbf16>
    %c0_2 = arith.constant 0 : index
    %c0_3 = arith.constant 0 : index
    %c0_4 = arith.constant 0 : index
    %2 = vector.load %arg2[%c0_2, %c0_3, %c0_4] : memref<3x576x1024xbf16, #tpu.memory_space<vmem>>, vector<1x576x1024xbf16>
    %3 = vector.shape_cast %2 : vector<1x576x1024xbf16> to vector<576x1024xbf16>
    %cst = arith.constant dense<0.000000e+00> : vector<14x1024xf32>
    %4 = tpu.matmul %1, %3, %cst {dimension_numbers = #tpu.dot_dimension_numbers<[1], [0], [0], [1], [0, 0, 1, 1], [], []>} : vector<14x576xbf16>, vector<576x1024xbf16>, vector<14x1024xf32> -> vector<14x1024xf32>
    %c0_5 = arith.constant 0 : index
    %c2 = arith.constant 2 : index
    %c0_6 = arith.constant 0 : index
    %5 = vector.load %arg1[%c0_5, %c2, %c0_6] : memref<1x18x576xbf16, #tpu.memory_space<vmem>>, vector<1x14x576xbf16>
    %6 = vector.shape_cast %5 : vector<1x14x576xbf16> to vector<14x576xbf16>
    %c1 = arith.constant 1 : index
    %c0_7 = arith.constant 0 : index
    %c0_8 = arith.constant 0 : index
    %7 = vector.load %arg2[%c1, %c0_7, %c0_8] : memref<3x576x1024xbf16, #tpu.memory_space<vmem>>, vector<1x576x1024xbf16>
    %8 = vector.shape_cast %7 : vector<1x576x1024xbf16> to vector<576x1024xbf16>
    %cst_9 = arith.constant dense<0.000000e+00> : vector<14x1024xf32>
    %9 = tpu.matmul %6, %8, %cst_9 {dimension_numbers = #tpu.dot_dimension_numbers<[1], [0], [0], [1], [0, 0, 1, 1], [], []>} : vector<14x576xbf16>, vector<576x1024xbf16>, vector<14x1024xf32> -> vector<14x1024xf32>
    %10 = arith.addf %4, %9 : vector<14x1024xf32>
    %c0_10 = arith.constant 0 : index
    %c4 = arith.constant 4 : index
    %c0_11 = arith.constant 0 : index
    %11 = vector.load %arg1[%c0_10, %c4, %c0_11] : memref<1x18x576xbf16, #tpu.memory_space<vmem>>, vector<1x14x576xbf16>
    %12 = vector.shape_cast %11 : vector<1x14x576xbf16> to vector<14x576xbf16>
    %c2_12 = arith.constant 2 : index
    %c0_13 = arith.constant 0 : index
    %c0_14 = arith.constant 0 : index
    %13 = vector.load %arg2[%c2_12, %c0_13, %c0_14] : memref<3x576x1024xbf16, #tpu.memory_space<vmem>>, vector<1x576x1024xbf16>
    %14 = vector.shape_cast %13 : vector<1x576x1024xbf16> to vector<576x1024xbf16>
    %cst_15 = arith.constant dense<0.000000e+00> : vector<14x1024xf32>
    %15 = tpu.matmul %12, %14, %cst_15 {dimension_numbers = #tpu.dot_dimension_numbers<[1], [0], [0], [1], [0, 0, 1, 1], [], []>} : vector<14x576xbf16>, vector<576x1024xbf16>, vector<14x1024xf32> -> vector<14x1024xf32>
    %16 = arith.addf %10, %15 : vector<14x1024xf32>
    %17 = vector.extract_strided_slice %16 {offsets = [0, 0], sizes = [14, 512], strides = [1, 1]} : vector<14x1024xf32> to vector<14x512xf32>
    %18 = vector.extract_strided_slice %16 {offsets = [0, 512], sizes = [14, 512], strides = [1, 1]} : vector<14x1024xf32> to vector<14x512xf32>
    %19 = arith.maximumf %17, %18 : vector<14x512xf32>
    %c0_16 = arith.constant 0 : index
    %c0_17 = arith.constant 0 : index
    %20 = vector.load %arg3[%c0_16, %c0_17] : memref<1x512xf32, #tpu.memory_space<vmem>>, vector<1x512xf32>
    %21 = vector.broadcast %20 : vector<1x512xf32> to vector<14x512xf32>
    %22 = arith.addf %19, %21 : vector<14x512xf32>
    %cst_18 = arith.constant 0.000000e+00 : f32
    %23 = vector.broadcast %cst_18 : f32 to vector<14x512xf32>
    %24 = arith.maximumf %22, %23 : vector<14x512xf32>
    %25 = vector.extract_strided_slice %24 {offsets = [0, 0], sizes = [14, 256], strides = [1, 1]} : vector<14x512xf32> to vector<14x256xf32>
    %26 = vector.extract_strided_slice %24 {offsets = [0, 256], sizes = [14, 256], strides = [1, 1]} : vector<14x512xf32> to vector<14x256xf32>
    %27 = arith.maximumf %25, %26 : vector<14x256xf32>
    %28 = arith.truncf %27 : vector<14x256xf32> to vector<14x256xbf16>
    %29 = vector.extract_strided_slice %28 {offsets = [0, 0], sizes = [2, 256], strides = [1, 1]} : vector<14x256xbf16> to vector<2x256xbf16>
    %c0_19 = arith.constant 0 : index
    %c0_20 = arith.constant 0 : index
    %c0_21 = arith.constant 0 : index
    %30 = vector.load %arg4[%c0_19, %c0_20, %c0_21] : memref<7x256x128xbf16, #tpu.memory_space<vmem>>, vector<1x256x128xbf16>
    %31 = vector.shape_cast %30 : vector<1x256x128xbf16> to vector<256x128xbf16>
    %cst_22 = arith.constant dense<0.000000e+00> : vector<2x128xf32>
    %32 = tpu.matmul %29, %31, %cst_22 {dimension_numbers = #tpu.dot_dimension_numbers<[1], [0], [0], [1], [0, 0, 1, 1], [], []>} : vector<2x256xbf16>, vector<256x128xbf16>, vector<2x128xf32> -> vector<2x128xf32>
    %33 = vector.extract_strided_slice %28 {offsets = [2, 0], sizes = [2, 256], strides = [1, 1]} : vector<14x256xbf16> to vector<2x256xbf16>
    %c1_23 = arith.constant 1 : index
    %c0_24 = arith.constant 0 : index
    %c0_25 = arith.constant 0 : index
    %34 = vector.load %arg4[%c1_23, %c0_24, %c0_25] : memref<7x256x128xbf16, #tpu.memory_space<vmem>>, vector<1x256x128xbf16>
    %35 = vector.shape_cast %34 : vector<1x256x128xbf16> to vector<256x128xbf16>
    %cst_26 = arith.constant dense<0.000000e+00> : vector<2x128xf32>
    %36 = tpu.matmul %33, %35, %cst_26 {dimension_numbers = #tpu.dot_dimension_numbers<[1], [0], [0], [1], [0, 0, 1, 1], [], []>} : vector<2x256xbf16>, vector<256x128xbf16>, vector<2x128xf32> -> vector<2x128xf32>
    %37 = arith.addf %32, %36 : vector<2x128xf32>
    %38 = vector.extract_strided_slice %28 {offsets = [4, 0], sizes = [2, 256], strides = [1, 1]} : vector<14x256xbf16> to vector<2x256xbf16>
    %c2_27 = arith.constant 2 : index
    %c0_28 = arith.constant 0 : index
    %c0_29 = arith.constant 0 : index
    %39 = vector.load %arg4[%c2_27, %c0_28, %c0_29] : memref<7x256x128xbf16, #tpu.memory_space<vmem>>, vector<1x256x128xbf16>
    %40 = vector.shape_cast %39 : vector<1x256x128xbf16> to vector<256x128xbf16>
    %cst_30 = arith.constant dense<0.000000e+00> : vector<2x128xf32>
    %41 = tpu.matmul %38, %40, %cst_30 {dimension_numbers = #tpu.dot_dimension_numbers<[1], [0], [0], [1], [0, 0, 1, 1], [], []>} : vector<2x256xbf16>, vector<256x128xbf16>, vector<2x128xf32> -> vector<2x128xf32>
    %42 = arith.addf %37, %41 : vector<2x128xf32>
    %43 = vector.extract_strided_slice %28 {offsets = [6, 0], sizes = [2, 256], strides = [1, 1]} : vector<14x256xbf16> to vector<2x256xbf16>
    %c3 = arith.constant 3 : index
    %c0_31 = arith.constant 0 : index
    %c0_32 = arith.constant 0 : index
    %44 = vector.load %arg4[%c3, %c0_31, %c0_32] : memref<7x256x128xbf16, #tpu.memory_space<vmem>>, vector<1x256x128xbf16>
    %45 = vector.shape_cast %44 : vector<1x256x128xbf16> to vector<256x128xbf16>
    %cst_33 = arith.constant dense<0.000000e+00> : vector<2x128xf32>
    %46 = tpu.matmul %43, %45, %cst_33 {dimension_numbers = #tpu.dot_dimension_numbers<[1], [0], [0], [1], [0, 0, 1, 1], [], []>} : vector<2x256xbf16>, vector<256x128xbf16>, vector<2x128xf32> -> vector<2x128xf32>
    %47 = arith.addf %42, %46 : vector<2x128xf32>
    %48 = vector.extract_strided_slice %28 {offsets = [8, 0], sizes = [2, 256], strides = [1, 1]} : vector<14x256xbf16> to vector<2x256xbf16>
    %c4_34 = arith.constant 4 : index
    %c0_35 = arith.constant 0 : index
    %c0_36 = arith.constant 0 : index
    %49 = vector.load %arg4[%c4_34, %c0_35, %c0_36] : memref<7x256x128xbf16, #tpu.memory_space<vmem>>, vector<1x256x128xbf16>
    %50 = vector.shape_cast %49 : vector<1x256x128xbf16> to vector<256x128xbf16>
    %cst_37 = arith.constant dense<0.000000e+00> : vector<2x128xf32>
    %51 = tpu.matmul %48, %50, %cst_37 {dimension_numbers = #tpu.dot_dimension_numbers<[1], [0], [0], [1], [0, 0, 1, 1], [], []>} : vector<2x256xbf16>, vector<256x128xbf16>, vector<2x128xf32> -> vector<2x128xf32>
    %52 = arith.addf %47, %51 : vector<2x128xf32>
    %53 = vector.extract_strided_slice %28 {offsets = [10, 0], sizes = [2, 256], strides = [1, 1]} : vector<14x256xbf16> to vector<2x256xbf16>
    %c5 = arith.constant 5 : index
    %c0_38 = arith.constant 0 : index
    %c0_39 = arith.constant 0 : index
    %54 = vector.load %arg4[%c5, %c0_38, %c0_39] : memref<7x256x128xbf16, #tpu.memory_space<vmem>>, vector<1x256x128xbf16>
    %55 = vector.shape_cast %54 : vector<1x256x128xbf16> to vector<256x128xbf16>
    %cst_40 = arith.constant dense<0.000000e+00> : vector<2x128xf32>
    %56 = tpu.matmul %53, %55, %cst_40 {dimension_numbers = #tpu.dot_dimension_numbers<[1], [0], [0], [1], [0, 0, 1, 1], [], []>} : vector<2x256xbf16>, vector<256x128xbf16>, vector<2x128xf32> -> vector<2x128xf32>
    %57 = arith.addf %52, %56 : vector<2x128xf32>
    %58 = vector.extract_strided_slice %28 {offsets = [12, 0], sizes = [2, 256], strides = [1, 1]} : vector<14x256xbf16> to vector<2x256xbf16>
    %c6 = arith.constant 6 : index
    %c0_41 = arith.constant 0 : index
    %c0_42 = arith.constant 0 : index
    %59 = vector.load %arg4[%c6, %c0_41, %c0_42] : memref<7x256x128xbf16, #tpu.memory_space<vmem>>, vector<1x256x128xbf16>
    %60 = vector.shape_cast %59 : vector<1x256x128xbf16> to vector<256x128xbf16>
    %cst_43 = arith.constant dense<0.000000e+00> : vector<2x128xf32>
    %61 = tpu.matmul %58, %60, %cst_43 {dimension_numbers = #tpu.dot_dimension_numbers<[1], [0], [0], [1], [0, 0, 1, 1], [], []>} : vector<2x256xbf16>, vector<256x128xbf16>, vector<2x128xf32> -> vector<2x128xf32>
    %62 = arith.addf %57, %61 : vector<2x128xf32>
    %c0_44 = arith.constant 0 : index
    %c0_45 = arith.constant 0 : index
    %63 = vector.load %arg5[%c0_44, %c0_45] : memref<1x128xf32, #tpu.memory_space<vmem>>, vector<1x128xf32>
    %64 = vector.broadcast %63 : vector<1x128xf32> to vector<2x128xf32>
    %65 = arith.addf %62, %64 : vector<2x128xf32>
    %c0_46 = arith.constant 0 : index
    %c0_47 = arith.constant 0 : index
    %c0_48 = arith.constant 0 : index
    %66 = vector.load %arg6[%c0_46, %c0_47, %c0_48] : memref<1x2x128xf32, #tpu.memory_space<vmem>>, vector<1x2x128xf32>
    %67 = vector.shape_cast %66 : vector<1x2x128xf32> to vector<2x128xf32>
    %68 = vector.shape_cast %65 : vector<2x128xf32> to vector<1x2x128xf32>
    tpu.vector_store %arg6[%c0_46, %c0_47, %c0_48], %68 {strides = array<i32>} : memref<1x2x128xf32, #tpu.memory_space<vmem>>, vector<1x2x128xf32>,
    return
  }
  func.func @transform_0(%arg0: i32) -> (i32, i32, i32) {
    %c0_i32 = arith.constant 0 : i32
    %c0_i32_0 = arith.constant 0 : i32
    %c0_i32_1 = arith.constant 0 : i32
    return %arg0, %c0_i32, %c0_i32_0 : i32, i32, i32
  }
  func.func @transform_1(%arg0: i32) -> (i32, i32, i32) {
    %c0_i32 = arith.constant 0 : i32
    %c0_i32_0 = arith.constant 0 : i32
    %c0_i32_1 = arith.constant 0 : i32
    %c0_i32_2 = arith.constant 0 : i32
    return %c0_i32, %c0_i32_0, %c0_i32_1 : i32, i32, i32
  }
  func.func @transform_2(%arg0: i32) -> (i32, i32) {
    %c0_i32 = arith.constant 0 : i32
    %c0_i32_0 = arith.constant 0 : i32
    %c0_i32_1 = arith.constant 0 : i32
    return %c0_i32, %c0_i32_0 : i32, i32
  }
  func.func @transform_3(%arg0: i32) -> (i32, i32, i32) {
    %c0_i32 = arith.constant 0 : i32
    %c0_i32_0 = arith.constant 0 : i32
    %c0_i32_1 = arith.constant 0 : i32
    %c0_i32_2 = arith.constant 0 : i32
    return %c0_i32, %c0_i32_0, %c0_i32_1 : i32, i32, i32
  }
  func.func @transform_4(%arg0: i32) -> (i32, i32) {
    %c0_i32 = arith.constant 0 : i32
    %c0_i32_0 = arith.constant 0 : i32
    %c0_i32_1 = arith.constant 0 : i32
    return %c0_i32, %c0_i32_0 : i32, i32
  }
  func.func @transform_5(%arg0: i32) -> (i32, i32, i32) {
    %c0_i32 = arith.constant 0 : i32
    %c0_i32_0 = arith.constant 0 : i32
    %c0_i32_1 = arith.constant 0 : i32
    return %arg0, %c0_i32, %c0_i32_0 : i32, i32, i32
  }
}

</mosaic_0001>

<bundles_post_ra>
// kernel: cnn_forward.2
= control target key start
LH: loop header
LB: loop body
LE: loop exit
PB: predicated region body
PF: predicated region fallthrough
CT: control target
= control target key end

     0   :  { %8 = vsyncpa [#allocation3], 0  ;;  %s1262_s0 = inlined_call_operand.vmem [shape: bf16[1,28,192], index: 0, kind: input, shape index: {}]   ;;  %s1263_s1 = inlined_call_operand.hbm [shape: bf16[1,192,1024], index: 1, kind: input, shape index: {}]   ;;  %s1264_s2 = inlined_call_operand.hbm [shape: f32[1,512], index: 2, kind: input, shape index: {}]   ;;  %s1265_s3 = inlined_call_operand.vmem [shape: bf16[1,28,256], index: 3, kind: output, shape index: {}]  }
   0x1   :  { %9 = vsyncpa [#allocation5], 0  ;;  %s1140_s12 = smov [#allocation2]  }
   0x2   :  { %s17_s13 = sshll.u32 %s1140_s12, 4  ;;  %s18_s13 = int_to_ptr.vmem [resolvable:$true] %s17_s13 }
   0x3   :  { %s1104_s14 = scalar_lea.vmem %s18_s13, 12288  ;;  %p1109_p1 = scmp.lt.s32.totalorder %s18_s13, %s18_s13 }
   0x4   :  { %p1105_p0 = scmp.ne.s32.totalorder %s18_s13, %s1104_s14  ;;  %p1110_p2 = scmp.lt.s32.totalorder %s1104_s14, %s1104_s14 }
   0x6   :  { %p1111_p3 = por %p1110_p2, %p1109_p1 }
   0x8   :  { %p1112_p4 = pnand %p1111_p3, %p1105_p0 }
   0xa   :  { %1115 = shalt.err (!%p1112_p4)
}
   0xb   :  { %s1141_s15 = smov 512   ;;  %s1142_s16 = smov 32  }
   0xc   :  { %23 = dma.hbm_to_vmem [thread:$0]  %s1263_s1, 12288, %s18_s13, [#allocation3], %s1141_s15, %s1141_s15, %s1142_s16  }
   0xd   :  { %s1143_s19 = smov [#allocation4]  }
   0xe   :  { %s30_s20 = sshll.u32 %s1143_s19, 4  ;;  %s31_s20 = int_to_ptr.vmem [resolvable:$true] %s30_s20 }
   0xf   :  { %s1124_s21 = scalar_lea.vmem %s31_s20, 64  ;;  %p1129_p6 = scmp.lt.s32.totalorder %s31_s20, %s31_s20 }
  0x10   :  { %p1125_p5 = scmp.ne.s32.totalorder %s31_s20, %s1124_s21  ;;  %p1130_p7 = scmp.lt.s32.totalorder %s1124_s21, %s1124_s21 }
  0x12   :  { %p1131_p8 = por %p1130_p7, %p1129_p6 }
  0x14   :  { %p1132_p9 = pnand %p1131_p8, %p1125_p5 }
  0x16   :  { %1135 = shalt.err (!%p1132_p9)
}
  0x17   :  { %33 = dma.hbm_to_vmem [thread:$0]  %s1264_s2, 64, %s31_s20, [#allocation5]  }
  0x18   :  { %1136 = dma.done.wait [#allocation3], 12288  }
  0x19   :  { %1137 = vsyncadd [#allocation3], 4294955008 }
  0x1a   :  { %1138 = dma.done.wait [#allocation5], 64  }
  0x1b   :  { %1139 = vsyncadd [#allocation5], 4294967232  ;;  %v101_v0 = vld [vmem:[#allocation2 + $0x1c0] sm:$0xff]  ;;  %v102_v2 = vld [vmem:[#allocation2 + $0x1c8] sm:$0xff]  ;;  %vm639_vm0 = vcmask 523264  }
  0x1c   :  { %v105_v1 = vld [vmem:[#allocation2 + $0x1e0] sm:$0xff]  ;;  %v106_v4 = vld [vmem:[#allocation2 + $0x1e8] sm:$0xff] }
  0x1d   :  { %v1031_v3 = vcombine.high %v101_v0, %v105_v1  ;;  %v1030_v5 = vcombine.low %v101_v0, %v105_v1  ;;  %v93_v6 = vld [vmem:[#allocation2 + $0x180] sm:$0xff]  ;;  %v1033_v8 = vcombine.high %v102_v2, %v106_v4  ;;  %v1032_v9 = vcombine.low %v102_v2, %v106_v4  ;;  %v94_v11 = vld [vmem:[#allocation2 + $0x188] sm:$0xff] }
  0x1e   :  { %v97_v7 = vld [vmem:[#allocation2 + $0x1a0] sm:$0xff]  ;;  %v98_v12 = vld [vmem:[#allocation2 + $0x1a8] sm:$0xff] }
  0x1f   :  { %v1023_v10 = vcombine.high %v93_v6, %v97_v7  ;;  %v85_v13 = vld [vmem:[#allocation2 + $0x140] sm:$0xff]  ;;  %646 = vmatprep.subr.bf16.mxu0 %v1031_v3  ;;  %v1025_v14 = vcombine.high %v94_v11, %v98_v12  ;;  %v86_v16 = vld [vmem:[#allocation2 + $0x148] sm:$0xff]  ;;  %699 = vmatprep.subr.bf16.mxu1 %v1033_v8  ;;  %v1022_v18 = vcombine.low %v93_v6, %v97_v7 }
  0x20   :  { %v89_v15 = vld [vmem:[#allocation2 + $0x160] sm:$0xff]  ;;  %v90_v17 = vld [vmem:[#allocation2 + $0x168] sm:$0xff]  ;;  %647 = vmatpush1.bf16.msra.mxu0 %v1030_v5  ;;  %700 = vmatpush1.bf16.msra.mxu1 %v1032_v9  ;;  %v1024_v19 = vcombine.low %v94_v11, %v98_v12 }
  0x21   :  { %648 = vmatprep.subr.bf16.mxu0 %v1023_v10  ;;  %v1015_v20 = vcombine.high %v85_v13, %v89_v15  ;;  %701 = vmatprep.subr.bf16.mxu1 %v1025_v14  ;;  %v1017_v21 = vcombine.high %v86_v16, %v90_v17  ;;  %v77_v22 = vld [vmem:[#allocation2 + $0x100] sm:$0xff]  ;;  %v78_v24 = vld [vmem:[#allocation2 + $0x108] sm:$0xff]  ;;  %v1014_v26 = vcombine.low %v85_v13, %v89_v15 }
  0x22   :  { %v81_v23 = vld [vmem:[#allocation2 + $0x120] sm:$0xff]  ;;  %v82_v25 = vld [vmem:[#allocation2 + $0x128] sm:$0xff]  ;;  %v1016_v27 = vcombine.low %v86_v16, %v90_v17 }
  0x23   :  { %v1007_v28 = vcombine.high %v77_v22, %v81_v23  ;;  %v1009_v29 = vcombine.high %v78_v24, %v82_v25  ;;  %v69_v30 = vld [vmem:[#allocation2 + $0xc0] sm:$0xff]  ;;  %v70_v32 = vld [vmem:[#allocation2 + $0xc8] sm:$0xff]  ;;  %v1006_v34 = vcombine.low %v77_v22, %v81_v23  ;;  %v1008_v35 = vcombine.low %v78_v24, %v82_v25 }
  0x24   :  { %649 = vmatpush1.bf16.msra.mxu0 %v1022_v18  ;;  %702 = vmatpush1.bf16.msra.mxu1 %v1024_v19  ;;  %v73_v31 = vld [vmem:[#allocation2 + $0xe0] sm:$0xff]  ;;  %v74_v33 = vld [vmem:[#allocation2 + $0xe8] sm:$0xff] }
  0x25   :  { %650 = vmatprep.subr.bf16.mxu0 %v1015_v20  ;;  %703 = vmatprep.subr.bf16.mxu1 %v1017_v21  ;;  %v999_v36 = vcombine.high %v69_v30, %v73_v31  ;;  %v1001_v37 = vcombine.high %v70_v32, %v74_v33  ;;  %v61_v38 = vld [vmem:[#allocation2 + $0x80] sm:$0xff]  ;;  %v62_v40 = vld [vmem:[#allocation2 + $0x88] sm:$0xff]  ;;  %v998_v42 = vcombine.low %v69_v30, %v73_v31  ;;  %v103_v31 = vld [vmem:[#allocation2 + $0x1d0] sm:$0xff] }
  0x26   :  { %v65_v39 = vld [vmem:[#allocation2 + $0xa0] sm:$0xff]  ;;  %v66_v41 = vld [vmem:[#allocation2 + $0xa8] sm:$0xff]  ;;  %v1000_v44 = vcombine.low %v70_v32, %v74_v33  ;;  %v107_v32 = vld [vmem:[#allocation2 + $0x1f0] sm:$0xff] }
  0x27   :  { %v1173_v43 = vld [vmem:[%s1262_s0 + $0x4] ss:$8 sps:$4 sm:$0xff]   ;;  %v991_v45 = vcombine.high %v61_v38, %v65_v39  ;;  %v993_v46 = vcombine.high %v62_v40, %v66_v41  ;;  %v990_v51 = vcombine.low %v61_v38, %v65_v39  ;;  %v992_v52 = vcombine.low %v62_v40, %v66_v41  ;;  %v104_v33 = vld [vmem:[#allocation2 + $0x1d8] sm:$0xff]  ;;  %v95_v39 = vld [vmem:[#allocation2 + $0x190] sm:$0xff] }
  0x28   :  { %651 = vmatpush1.bf16.msra.mxu0 %v1014_v26  ;;  %704 = vmatpush1.bf16.msra.mxu1 %v1016_v27  ;;  %v53_v47 = vld [vmem:[#allocation2 + $0x40] sm:$0xff]  ;;  %v54_v49 = vld [vmem:[#allocation2 + $0x48] sm:$0xff]  ;;  %v99_v40 = vld [vmem:[#allocation2 + $0x1b0] sm:$0xff] }
  0x29   :  { %652 = vmatprep.subr.bf16.mxu0 %v1007_v28  ;;  %705 = vmatprep.subr.bf16.mxu1 %v1009_v29  ;;  %v57_v48 = vld [vmem:[#allocation2 + $0x60] sm:$0xff]  ;;  %v58_v50 = vld [vmem:[#allocation2 + $0x68] sm:$0xff] }
  0x2a   :  { %1070 = vmatprep.mubr.msk.bf16.mxu0 %vm639_vm0, %v1173_v43  ;;  %1072 = vmatprep.mubr.msk.bf16.mxu1 %vm639_vm0, %v1173_v43  ;;  %v983_v53 = vcombine.high %v53_v47, %v57_v48  ;;  %v985_v54 = vcombine.high %v54_v49, %v58_v50  ;;  %v45_v55 = vld [vmem:[#allocation2] sm:$0xff]  ;;  %v46_v57 = vld [vmem:[#allocation2 + $0x8] sm:$0xff]  ;;  %v982_v59 = vcombine.low %v53_v47, %v57_v48 }
  0x2b   :  { %v49_v56 = vld [vmem:[#allocation2 + $0x20] sm:$0xff]  ;;  %v50_v58 = vld [vmem:[#allocation2 + $0x28] sm:$0xff]  ;;  %v984_v60 = vcombine.low %v54_v49, %v58_v50  ;;  %v1027_v47 = vcombine.high %v95_v39, %v99_v40  ;;  %v87_v49 = vld [vmem:[#allocation2 + $0x150] sm:$0xff] }
  0x2c   :  { %653 = vmatpush1.bf16.msra.mxu0 %v1006_v34  ;;  %706 = vmatpush1.bf16.msra.mxu1 %v1008_v35  ;;  %v975_v61 = vcombine.high %v45_v55, %v49_v56  ;;  %v977_v62 = vcombine.high %v46_v57, %v50_v58  ;;  %v133_v63 = vld [vmem:[#allocation2 + $0x2c0] sm:$0xff]  ;;  %v134_v1 = vld [vmem:[#allocation2 + $0x2c8] sm:$0xff]  ;;  %v974_v3 = vcombine.low %v45_v55, %v49_v56  ;;  %v108_v34 = vld [vmem:[#allocation2 + $0x1f8] sm:$0xff] }
  0x2d   :  { %654 = vmatprep.subr.bf16.mxu0 %v999_v36  ;;  %707 = vmatprep.subr.bf16.mxu1 %v1001_v37  ;;  %v137_v0 = vld [vmem:[#allocation2 + $0x2e0] sm:$0xff]  ;;  %v138_v2 = vld [vmem:[#allocation2 + $0x2e8] sm:$0xff]  ;;  %v976_v4 = vcombine.low %v46_v57, %v50_v58  ;;  %v1035_v37 = vcombine.high %v103_v31, %v107_v32  ;;  %v1037_v38 = vcombine.high %v104_v33, %v108_v34  ;;  %v91_v50 = vld [vmem:[#allocation2 + $0x170] sm:$0xff] }
  0x2e   :  { %v1063_v5 = vcombine.high %v133_v63, %v137_v0  ;;  %v1065_v6 = vcombine.high %v134_v1, %v138_v2  ;;  %v125_v7 = vld [vmem:[#allocation2 + $0x280] sm:$0xff]  ;;  %v126_v9 = vld [vmem:[#allocation2 + $0x288] sm:$0xff]  ;;  %v1062_v11 = vcombine.low %v133_v63, %v137_v0  ;;  %v1064_v12 = vcombine.low %v134_v1, %v138_v2  ;;  %v79_v58 = vld [vmem:[#allocation2 + $0x110] sm:$0xff] }
  0x2f   :  { %v129_v8 = vld [vmem:[#allocation2 + $0x2a0] sm:$0xff]  ;;  %v130_v10 = vld [vmem:[#allocation2 + $0x2a8] sm:$0xff]  ;;  %v1019_v56 = vcombine.high %v87_v49, %v91_v50  ;;  %v1018_v63 = vcombine.low %v87_v49, %v91_v50 }
  0x30   :  { %655 = vmatpush1.bf16.msra.mxu0 %v998_v42  ;;  %708 = vmatpush1.bf16.msra.mxu1 %v1000_v44  ;;  %v1055_v13 = vcombine.high %v125_v7, %v129_v8  ;;  %v1057_v14 = vcombine.high %v126_v9, %v130_v10  ;;  %v117_v15 = vld [vmem:[#allocation2 + $0x240] sm:$0xff]  ;;  %v118_v17 = vld [vmem:[#allocation2 + $0x248] sm:$0xff]  ;;  %v1054_v19 = vcombine.low %v125_v7, %v129_v8  ;;  %v96_v42 = vld [vmem:[#allocation2 + $0x198] sm:$0xff] }
  0x31   :  { %656 = vmatprep.subr.bf16.mxu0 %v991_v45  ;;  %709 = vmatprep.subr.bf16.mxu1 %v993_v46  ;;  %v121_v16 = vld [vmem:[#allocation2 + $0x260] sm:$0xff]  ;;  %v122_v18 = vld [vmem:[#allocation2 + $0x268] sm:$0xff]  ;;  %v1056_v20 = vcombine.low %v126_v9, %v130_v10  ;;  %v100_v44 = vld [vmem:[#allocation2 + $0x1b8] sm:$0xff]  ;;  %v1034_v45 = vcombine.low %v103_v31, %v107_v32  ;;  %v1036_v46 = vcombine.low %v104_v33, %v108_v34 }
  0x32   :  { %v1047_v21 = vcombine.high %v117_v15, %v121_v16  ;;  %v1049_v22 = vcombine.high %v118_v17, %v122_v18  ;;  %v109_v23 = vld [vmem:[#allocation2 + $0x200] sm:$0xff]  ;;  %v110_v25 = vld [vmem:[#allocation2 + $0x208] sm:$0xff]  ;;  %v1046_v27 = vcombine.low %v117_v15, %v121_v16  ;;  %v1048_v28 = vcombine.low %v118_v17, %v122_v18  ;;  %v135_v34 = vld [vmem:[#allocation2 + $0x2d0] sm:$0xff] }
  0x33   :  { %v113_v24 = vld [vmem:[#allocation2 + $0x220] sm:$0xff]  ;;  %v114_v26 = vld [vmem:[#allocation2 + $0x228] sm:$0xff]  ;;  %v1029_v48 = vcombine.high %v96_v42, %v100_v44  ;;  %v1028_v55 = vcombine.low %v96_v42, %v100_v44  ;;  %v127_v44 = vld [vmem:[#allocation2 + $0x290] sm:$0xff] }
  0x34   :  { %657 = vmatpush1.bf16.msra.mxu0 %v990_v51  ;;  %710 = vmatpush1.bf16.msra.mxu1 %v992_v52  ;;  %v1039_v29 = vcombine.high %v109_v23, %v113_v24  ;;  %v1041_v30 = vcombine.high %v110_v25, %v114_v26  ;;  %v1038_v35 = vcombine.low %v109_v23, %v113_v24  ;;  %v1182_v41 = vld [vmem:[%s1262_s0] ss:$8 sps:$4 sm:$0xff]   ;;  %v1187_v51 = vld [vmem:[%s1262_s0 + $0x14] ss:$8 sps:$4 sm:$0x3f]  }
  0x35   :  { %658 = vmatprep.subr.bf16.mxu0 %v983_v53  ;;  %711 = vmatprep.subr.bf16.mxu1 %v985_v54  ;;  %v1040_v36 = vcombine.low %v110_v25, %v114_v26  ;;  %v88_v52 = vld [vmem:[#allocation2 + $0x158] sm:$0xff]  ;;  %v1026_v54 = vcombine.low %v95_v39, %v99_v40  ;;  %v47_v26 = vld [vmem:[#allocation2 + $0x10] sm:$0xff] }
  0x36   :  { %v92_v53 = vld [vmem:[#allocation2 + $0x178] sm:$0xff] }
  0x37   :  { %v1021_v57 = vcombine.high %v88_v52, %v92_v53  ;;  %v1020_v0 = vcombine.low %v88_v52, %v92_v53  ;;  %v119_v53 = vld [vmem:[#allocation2 + $0x250] sm:$0xff] }
  0x38   :  { %659 = vmatpush1.bf16.msra.mxu0 %v982_v59  ;;  %712 = vmatpush1.bf16.msra.mxu1 %v984_v60  ;;  %v83_v59 = vld [vmem:[#allocation2 + $0x130] sm:$0xff]  ;;  %v80_v60 = vld [vmem:[#allocation2 + $0x118] sm:$0xff] }
  0x39   :  { %660 = vmatprep.subr.bf16.mxu0 %v975_v61  ;;  %713 = vmatprep.subr.bf16.mxu1 %v977_v62  ;;  %v84_v61 = vld [vmem:[#allocation2 + $0x138] sm:$0xff]  ;;  %v1011_v1 = vcombine.high %v79_v58, %v83_v59  ;;  %v1010_v7 = vcombine.low %v79_v58, %v83_v59 }
  0x3a   :  { %v1198_v62 = vld [vmem:[%s1262_s0 + $0x10] ss:$8 sps:$4 sm:$0x3f]   ;;  %v1013_v2 = vcombine.high %v80_v60, %v84_v61  ;;  %v1012_v8 = vcombine.low %v80_v60, %v84_v61 }
  0x3b   :  { %v111_v61 = vld [vmem:[#allocation2 + $0x210] sm:$0xff] }
  0x3c   :  { %661 = vmatpush1.bf16.msra.mxu0 %v974_v3  ;;  %714 = vmatpush1.bf16.msra.mxu1 %v976_v4  ;;  %v71_v3 = vld [vmem:[#allocation2 + $0xd0] sm:$0xff] }
  0x3d   :  { %670 = vmatprep.subr.bf16.mxu0 %v1063_v5  ;;  %723 = vmatprep.subr.bf16.mxu1 %v1065_v6  ;;  %v75_v4 = vld [vmem:[#allocation2 + $0xf0] sm:$0xff]  ;;  %v72_v5 = vld [vmem:[#allocation2 + $0xd8] sm:$0xff] }
  0x3e   :  { %v76_v6 = vld [vmem:[#allocation2 + $0xf8] sm:$0xff]  ;;  %v1003_v9 = vcombine.high %v71_v3, %v75_v4  ;;  %v1002_v15 = vcombine.low %v71_v3, %v75_v4 }
  0x3f   :  { %v1005_v10 = vcombine.high %v72_v5, %v76_v6  ;;  %v1004_v16 = vcombine.low %v72_v5, %v76_v6 }
  0x40   :  { %671 = vmatpush2.bf16.msra.mxu0 %v1062_v11  ;;  %724 = vmatpush2.bf16.msra.mxu1 %v1064_v12  ;;  %v63_v11 = vld [vmem:[#allocation2 + $0x90] sm:$0xff] }
  0x41   :  { %672 = vmatprep.subr.bf16.mxu0 %v1055_v13  ;;  %725 = vmatprep.subr.bf16.mxu1 %v1057_v14  ;;  %v67_v12 = vld [vmem:[#allocation2 + $0xb0] sm:$0xff]  ;;  %v64_v13 = vld [vmem:[#allocation2 + $0x98] sm:$0xff] }
  0x42   :  { %v68_v14 = vld [vmem:[#allocation2 + $0xb8] sm:$0xff]  ;;  %v995_v17 = vcombine.high %v63_v11, %v67_v12  ;;  %v994_v23 = vcombine.low %v63_v11, %v67_v12 }
  0x43   :  { %v997_v18 = vcombine.high %v64_v13, %v68_v14  ;;  %v996_v24 = vcombine.low %v64_v13, %v68_v14 }
  0x44   :  { %673 = vmatpush2.bf16.msra.mxu0 %v1054_v19  ;;  %726 = vmatpush2.bf16.msra.mxu1 %v1056_v20  ;;  %v55_v19 = vld [vmem:[#allocation2 + $0x50] sm:$0xff] }
  0x45   :  { %674 = vmatprep.subr.bf16.mxu0 %v1047_v21  ;;  %727 = vmatprep.subr.bf16.mxu1 %v1049_v22  ;;  %v59_v20 = vld [vmem:[#allocation2 + $0x70] sm:$0xff]  ;;  %v56_v21 = vld [vmem:[#allocation2 + $0x58] sm:$0xff] }
  0x46   :  { %v60_v22 = vld [vmem:[#allocation2 + $0x78] sm:$0xff]  ;;  %v987_v25 = vcombine.high %v55_v19, %v59_v20 }
  0x47   :  { %v988_v31 = vcombine.low %v56_v21, %v60_v22 }
  0x48   :  { %675 = vmatpush2.bf16.msra.mxu0 %v1046_v27  ;;  %728 = vmatpush2.bf16.msra.mxu1 %v1048_v28  ;;  %v51_v27 = vld [vmem:[#allocation2 + $0x30] sm:$0xff]  ;;  %v48_v28 = vld [vmem:[#allocation2 + $0x18] sm:$0xff] }
  0x49   :  { %676 = vmatprep.subr.bf16.mxu0 %v1039_v29  ;;  %729 = vmatprep.subr.bf16.mxu1 %v1041_v30  ;;  %v52_v29 = vld [vmem:[#allocation2 + $0x38] sm:$0xff]  ;;  %v986_v30 = vcombine.low %v55_v19, %v59_v20  ;;  %v979_v32 = vcombine.high %v47_v26, %v51_v27 }
  0x4a   :  { %v981_v33 = vcombine.high %v48_v28, %v52_v29  ;;  %v980_v39 = vcombine.low %v48_v28, %v52_v29 }
  0x4c   :  { %677 = vmatpush2.bf16.msra.mxu0 %v1038_v35  ;;  %730 = vmatpush2.bf16.msra.mxu1 %v1040_v36  ;;  %v139_v35 = vld [vmem:[#allocation2 + $0x2f0] sm:$0xff]  ;;  %v136_v36 = vld [vmem:[#allocation2 + $0x2d8] sm:$0xff] }
  0x4d   :  { %752 = vmatprep.subr.bf16.mxu0 %v1035_v37  ;;  %805 = vmatprep.subr.bf16.mxu1 %v1037_v38  ;;  %v140_v37 = vld [vmem:[#allocation2 + $0x2f8] sm:$0xff]  ;;  %v978_v38 = vcombine.low %v47_v26, %v51_v27  ;;  %v1067_v40 = vcombine.high %v135_v34, %v139_v35 }
  0x4e   :  { %v1069_v42 = vcombine.high %v136_v36, %v140_v37  ;;  %v1068_v49 = vcombine.low %v136_v36, %v140_v37 }
  0x4f   :  { %679 = vmatmul.mubr.bf16.vlgmr.msra.gmra.mxu0 %v1182_v41  ;;  %732 = vmatmul.mubr.bf16.vlgmr.msra.gmra.mxu1 %v1182_v41 }
  0x50   :  { %753 = vmatpush1.bf16.msra.mxu0 %v1034_v45  ;;  %806 = vmatpush1.bf16.msra.mxu1 %v1036_v46  ;;  %v131_v45 = vld [vmem:[#allocation2 + $0x2b0] sm:$0xff]  ;;  %v128_v46 = vld [vmem:[#allocation2 + $0x298] sm:$0xff] }
  0x51   :  { %754 = vmatprep.subr.bf16.mxu0 %v1027_v47  ;;  %807 = vmatprep.subr.bf16.mxu1 %v1029_v48  ;;  %v132_v47 = vld [vmem:[#allocation2 + $0x2b8] sm:$0xff]  ;;  %v1066_v48 = vcombine.low %v135_v34, %v139_v35  ;;  %v1059_v50 = vcombine.high %v127_v44, %v131_v45 }
  0x52   :  { %1071 = vmatprep.mubr.msk.bf16.mxu0 %vm639_vm0, %v1187_v51  ;;  %1073 = vmatprep.mubr.msk.bf16.mxu1 %vm639_vm0, %v1187_v51  ;;  %v1061_v52 = vcombine.high %v128_v46, %v132_v47  ;;  %v1060_v58 = vcombine.low %v128_v46, %v132_v47 }
  0x54   :  { %755 = vmatpush1.bf16.msra.mxu0 %v1026_v54  ;;  %808 = vmatpush1.bf16.msra.mxu1 %v1028_v55  ;;  %v123_v54 = vld [vmem:[#allocation2 + $0x270] sm:$0xff]  ;;  %v120_v55 = vld [vmem:[#allocation2 + $0x258] sm:$0xff] }
  0x55   :  { %756 = vmatprep.subr.bf16.mxu0 %v1019_v56  ;;  %809 = vmatprep.subr.bf16.mxu1 %v1021_v57  ;;  %v124_v56 = vld [vmem:[#allocation2 + $0x278] sm:$0xff]  ;;  %v1058_v57 = vcombine.low %v127_v44, %v131_v45  ;;  %v1051_v59 = vcombine.high %v119_v53, %v123_v54 }
  0x56   :  { %v1053_v60 = vcombine.high %v120_v55, %v124_v56  ;;  %v1052_v3 = vcombine.low %v120_v55, %v124_v56 }
  0x57   :  { %689 = vmatmul.mubr.bf16.gmra.mxu0 %v1198_v62  ;;  %742 = vmatmul.mubr.bf16.gmra.mxu1 %v1198_v62 }
  0x58   :  { %757 = vmatpush1.bf16.msra.mxu0 %v1018_v63  ;;  %810 = vmatpush1.bf16.msra.mxu1 %v1020_v0  ;;  %v115_v63 = vld [vmem:[#allocation2 + $0x230] sm:$0xff]  ;;  %v112_v0 = vld [vmem:[#allocation2 + $0x218] sm:$0xff] }
  0x59   :  { %758 = vmatprep.subr.bf16.mxu0 %v1011_v1  ;;  %811 = vmatprep.subr.bf16.mxu1 %v1013_v2  ;;  %v116_v1 = vld [vmem:[#allocation2 + $0x238] sm:$0xff]  ;;  %v1050_v2 = vcombine.low %v119_v53, %v123_v54  ;;  %v1043_v4 = vcombine.high %v111_v61, %v115_v63  ;;  %v1042_v6 = vcombine.low %v111_v61, %v115_v63 }
  0x5a   :  { %1074 = vmatprep.mubr.msk.bf16.mxu0 %vm639_vm0, %v1173_v43  ;;  %1076 = vmatprep.mubr.msk.bf16.mxu1 %vm639_vm0, %v1173_v43  ;;  %v989_v43 = vcombine.high %v56_v21, %v60_v22  ;;  %v1045_v5 = vcombine.high %v112_v0, %v116_v1  ;;  %v874_v22 = vld [vmem:[#allocation4] sm:$0xf] }
  0x5c   :  { %759 = vmatpush1.bf16.msra.mxu0 %v1010_v7  ;;  %812 = vmatpush1.bf16.msra.mxu1 %v1012_v8  ;;  %v1044_v7 = vcombine.low %v112_v0, %v116_v1 }
  0x5d   :  { %760 = vmatprep.subr.bf16.mxu0 %v1003_v9  ;;  %813 = vmatprep.subr.bf16.mxu1 %v1005_v10 }
  0x60   :  { %761 = vmatpush1.bf16.msra.mxu0 %v1002_v15  ;;  %814 = vmatpush1.bf16.msra.mxu1 %v1004_v16 }
  0x61   :  { %762 = vmatprep.subr.bf16.mxu0 %v995_v17  ;;  %815 = vmatprep.subr.bf16.mxu1 %v997_v18  ;;  %v876_v17 = vlaneseq }
  0x64   :  { %763 = vmatpush1.bf16.msra.mxu0 %v994_v23  ;;  %816 = vmatpush1.bf16.msra.mxu1 %v996_v24 }
  0x65   :  { %764 = vmatprep.subr.bf16.mxu0 %v987_v25  ;;  %817 = vmatprep.subr.bf16.mxu1 %v989_v43 }
  0x68   :  { %765 = vmatpush1.bf16.msra.mxu0 %v986_v30  ;;  %818 = vmatpush1.bf16.msra.mxu1 %v988_v31 }
  0x69   :  { %766 = vmatprep.subr.bf16.mxu0 %v979_v32  ;;  %819 = vmatprep.subr.bf16.mxu1 %v981_v33 }
  0x6c   :  { %767 = vmatpush1.bf16.msra.mxu0 %v978_v38  ;;  %820 = vmatpush1.bf16.msra.mxu1 %v980_v39 }
  0x6d   :  { %776 = vmatprep.subr.bf16.mxu0 %v1067_v40  ;;  %829 = vmatprep.subr.bf16.mxu1 %v1069_v42 }
  0x70   :  { %777 = vmatpush2.bf16.msra.mxu0 %v1066_v48  ;;  %830 = vmatpush2.bf16.msra.mxu1 %v1068_v49 }
  0x71   :  { %778 = vmatprep.subr.bf16.mxu0 %v1059_v50  ;;  %831 = vmatprep.subr.bf16.mxu1 %v1061_v52 }
  0x74   :  { %779 = vmatpush2.bf16.msra.mxu0 %v1058_v57  ;;  %832 = vmatpush2.bf16.msra.mxu1 %v1060_v58 }
  0x75   :  { %780 = vmatprep.subr.bf16.mxu0 %v1051_v59  ;;  %833 = vmatprep.subr.bf16.mxu1 %v1053_v60 }
  0x78   :  { %781 = vmatpush2.bf16.msra.mxu0 %v1050_v2  ;;  %834 = vmatpush2.bf16.msra.mxu1 %v1052_v3 }
  0x79   :  { %782 = vmatprep.subr.bf16.mxu0 %v1043_v4  ;;  %835 = vmatprep.subr.bf16.mxu1 %v1045_v5 }
  0x7c   :  { %783 = vmatpush2.bf16.msra.mxu0 %v1042_v6  ;;  %836 = vmatpush2.bf16.msra.mxu1 %v1044_v7 }
  0x7f   :  { %785 = vmatmul.mubr.bf16.vlgmr.msra.gmra.mxu0 %v1182_v41  ;;  %838 = vmatmul.mubr.bf16.vlgmr.msra.gmra.mxu1 %v1182_v41 }
  0x80   :  { %1075 = vmatprep.mubr.msk.bf16.mxu0 %vm639_vm0, %v1187_v51  ;;  %1077 = vmatprep.mubr.msk.bf16.mxu1 %vm639_vm0, %v1187_v51  ;;  %v877_v51 = vshrl.u32 %v876_v17, 7 }
  0x82   :  { %v886_v23 = vsub.s32 2, %v877_v51  ;;  %v882_v24 = vsub.s32 1, %v877_v51  ;;  %v890_v43 = vsub.s32 3, %v877_v51 }
  0x84   :  { %v1226_v29 = vrot.slane %v874_v22, %v886_v23  ;;  %v1228_v32 = vrot.slane %v874_v22, %v882_v24  ;;  %v1230_v35 = vrot.slane %v874_v22, %v890_v43 }
  0x87   :  { %795 = vmatmul.mubr.bf16.gmra.mxu0 %v1198_v62  ;;  %848 = vmatmul.mubr.bf16.gmra.mxu1 %v1198_v62  ;;  %v878_v62 = vsub.s32 0, %v877_v51 }
  0x89   :  { %v879_v27 = vrot.slane %v874_v22, %v878_v62 }
 0x10f   :  { %v680_v8 = vpop.f32.mrf.mxu0  ;;  %v733_v9 = vpop.f32.mrf.mxu1 }
 0x111   :  { %v682_v10 = vpop.f32.mrf.mxu0  ;;  %v735_v11 = vpop.f32.mrf.mxu1 }
 0x113   :  { %v684_v12 = vpop.f32.mrf.mxu0  ;;  %v737_v13 = vpop.f32.mrf.mxu1 }
 0x115   :  { %v686_v14 = vpop.f32.mrf.mxu0  ;;  %v739_v15 = vpop.f32.mrf.mxu1 }
 0x117   :  { %v690_v16 = vpop.f32.mrf.mxu0  ;;  %v743_v41 = vpop.f32.mrf.mxu1 }
 0x119   :  { %v1214_v18 = vpop.f32.mrf.mxu0  ;;  %v1216_v19 = vpop.f32.mrf.mxu1 }
 0x11b   :  { %v1218_v20 = vpop.f32.mrf.mxu0  ;;  %v1220_v21 = vpop.f32.mrf.mxu1 }
 0x11d   :  { %v1222_v25 = vpop.f32.mrf.mxu0  ;;  %v1224_v26 = vpop.f32.mrf.mxu1 }
 0x13f   :  { %v786_v28 = vpop.f32.mrf.mxu0  ;;  %v839_v31 = vpop.f32.mrf.mxu1 }
 0x140   :  { %v858_v30 = vmax.f32 %v680_v8, %v786_v28  ;;  %v860_v33 = vmax.f32 %v733_v9, %v839_v31 }
 0x141   :  { %v788_v34 = vpop.f32.mrf.mxu0  ;;  %v841_v38 = vpop.f32.mrf.mxu1 }
 0x142   :  { %v896_v36 = vadd.f32 %v879_v27, %v858_v30  ;;  %v859_v37 = vmax.f32 %v682_v10, %v788_v34  ;;  %v898_v39 = vadd.f32 %v1226_v29, %v860_v33  ;;  %v861_v40 = vmax.f32 %v735_v11, %v841_v38 }
 0x143   :  { %v790_v42 = vpop.f32.mrf.mxu0  ;;  %v843_v47 = vpop.f32.mrf.mxu1 }
 0x144   :  { %v912_v44 = vmax.f32 %v896_v36, 0.0  ;;  %v897_v45 = vadd.f32 %v1228_v32, %v859_v37  ;;  %v862_v46 = vmax.f32 %v684_v12, %v790_v42  ;;  %v914_v48 = vmax.f32 %v898_v39, 0.0 }
 0x145   :  { %v899_v49 = vadd.f32 %v1230_v35, %v861_v40  ;;  %v864_v50 = vmax.f32 %v737_v13, %v843_v47  ;;  %v792_v52 = vpop.f32.mrf.mxu0  ;;  %v845_v56 = vpop.f32.mrf.mxu1 }
 0x146   :  { %v913_v53 = vmax.f32 %v897_v45, 0.0  ;;  %v900_v54 = vadd.f32 %v879_v27, %v862_v46  ;;  %v863_v55 = vmax.f32 %v686_v14, %v792_v52  ;;  %v865_v59 = vmax.f32 %v739_v15, %v845_v56 }
 0x147   :  { %v915_v57 = vmax.f32 %v899_v49, 0.0  ;;  %v902_v58 = vadd.f32 %v1226_v29, %v864_v50  ;;  %v796_v60 = vpop.f32.mrf.mxu0  ;;  %v928_v61 = vmax.f32 %v912_v44, %v914_v48  ;;  %v849_v2 = vpop.f32.mrf.mxu1 }
 0x148   :  { %v916_v63 = vmax.f32 %v900_v54, 0.0  ;;  %v901_v0 = vadd.f32 %v1228_v32, %v863_v55  ;;  %v866_v1 = vmax.f32 %v690_v16, %v796_v60  ;;  %v903_v5 = vadd.f32 %v1230_v35, %v865_v59 }
 0x149   :  { %v929_v3 = vmax.f32 %v913_v53, %v915_v57  ;;  %v918_v4 = vmax.f32 %v902_v58, 0.0  ;;  %v868_v6 = vmax.f32 %v743_v41, %v849_v2  ;;  %v798_v7 = vpop.f32.mrf.mxu0  ;;  %v851_v11 = vpop.f32.mrf.mxu1 }
 0x14a   :  { %v917_v8 = vmax.f32 %v901_v0, 0.0  ;;  %v904_v9 = vadd.f32 %v879_v27, %v866_v1  ;;  %v867_v10 = vmax.f32 %v1214_v18, %v798_v7  ;;  %v919_v13 = vmax.f32 %v903_v5, 0.0 }
 0x14b   :  { %v1082_v12 = vpack.c.bf16 %v929_v3, %v928_v61  ;;  %v906_v14 = vadd.f32 %v1226_v29, %v868_v6  ;;  %v800_v15 = vpop.f32.mrf.mxu0  ;;  %v930_v17 = vmax.f32 %v916_v63, %v918_v4  ;;  %v869_v51 = vmax.f32 %v1216_v19, %v851_v11  ;;  %v853_v22 = vpop.f32.mrf.mxu1 }
 0x14c   :  { %v905_v16 = vadd.f32 %v1228_v32, %v867_v10  ;;  %v870_v62 = vmax.f32 %v1218_v20, %v800_v15  ;;  %v931_v41 = vmax.f32 %v917_v8, %v919_v13  ;;  %v920_v18 = vmax.f32 %v904_v9, 0.0 }
 0x14d   :  { %960 = vst [vmem:[%s1265_s3] sm:$0xff] %v1082_v12  ;;  %v922_v23 = vmax.f32 %v906_v14, 0.0  ;;  %v872_v24 = vmax.f32 %v1220_v21, %v853_v22  ;;  %v802_v43 = vpop.f32.mrf.mxu0  ;;  %v907_v30 = vadd.f32 %v1230_v35, %v869_v51  ;;  %v855_v19 = vpop.f32.mrf.mxu1 }
 0x14e   :  { %v921_v28 = vmax.f32 %v905_v16, 0.0  ;;  %v908_v31 = vadd.f32 %v879_v27, %v870_v62  ;;  %v871_v33 = vmax.f32 %v1222_v25, %v802_v43  ;;  %v1083_v34 = vpack.c.bf16 %v931_v41, %v930_v17 }
 0x14f   :  { %v910_v20 = vadd.f32 %v1226_v29, %v872_v24  ;;  %v873_v36 = vmax.f32 %v1224_v26, %v855_v19  ;;  %v923_v37 = vmax.f32 %v907_v30, 0.0  ;;  %v932_v27 = vmax.f32 %v920_v18, %v922_v23 }
 0x150   :  { %v909_v38 = vadd.f32 %v1228_v32, %v871_v33  ;;  %961 = vst [vmem:[%s1265_s3 + $0x8] sm:$0xff] %v1083_v34  ;;  %v924_v21 = vmax.f32 %v908_v31, 0.0 }
 0x151   :  { %v926_v39 = vmax.f32 %v910_v20, 0.0  ;;  %v911_v40 = vadd.f32 %v1230_v35, %v873_v36  ;;  %v933_v42 = vmax.f32 %v921_v28, %v923_v37 }
 0x152   :  { %v925_v25 = vmax.f32 %v909_v38, 0.0 }
 0x153   :  { %v927_v44 = vmax.f32 %v911_v40, 0.0  ;;  %v1084_v45 = vpack.c.bf16 %v933_v42, %v932_v27  ;;  %v934_v46 = vmax.f32 %v924_v21, %v926_v39 }
 0x155   :  { %v935_v29 = vmax.f32 %v925_v25, %v927_v44  ;;  %962 = vst [vmem:[%s1265_s3 + $0x10] sm:$0xff] %v1084_v45 }
 0x157   :  { %v1085_v26 = vpack.c.bf16 %v935_v29, %v934_v46 }
 0x159   :  { %963 = vst [vmem:[%s1265_s3 + $0x18] sm:$0x33] %v1085_v26 }
 0x15a   :  { %968 = vsyncpa [#allocation3], 1 }
 0x15b   :  { %969 = vsyncpa [#allocation5], 1 }

// kernel: cnn_forward.3
= control target key start
LH: loop header
LB: loop body
LE: loop exit
PB: predicated region body
PF: predicated region fallthrough
CT: control target
= control target key end

     0   :  { %10 = vsyncpa [#allocation3], 0  ;;  %s10204_s0 = inlined_call_operand.vmem [shape: bf16[1,18,576], index: 0, kind: input, shape index: {}]   ;;  %s10205_s1 = inlined_call_operand.hbm [shape: bf16[3,576,1024], index: 1, kind: input, shape index: {}]   ;;  %s10206_s2 = inlined_call_operand.hbm [shape: f32[1,512], index: 2, kind: input, shape index: {}]   ;;  %s10207_s3 = inlined_call_operand.hbm [shape: bf16[7,256,128], index: 3, kind: input, shape index: {}]   ;;  %s10208_s4 = inlined_call_operand.hbm [shape: f32[1,128], index: 4, kind: input, shape index: {}]   ;;  %s10209_s5 = inlined_call_operand.hbm [shape: f32[1,2,128], index: 5, kind: output, shape index: {}]  }
   0x1   :  { %11 = vsyncpa [#allocation6], 0 }
   0x2   :  { %12 = vsyncpa [#allocation9], 0 }
   0x3   :  { %13 = vsyncpa [#allocation4], 0  ;;  %s9678_s18 = smov [#allocation5]   ;;  %s9679_s20 = smov [#allocation2]  }
   0x4   :  { %s34_s19 = sshll.u32 %s9678_s18, 4  ;;  %s21_s21 = sshll.u32 %s9679_s20, 4  ;;  %s35_s19 = int_to_ptr.vmem [resolvable:$true] %s34_s19  ;;  %s22_s21 = int_to_ptr.vmem [resolvable:$true] %s21_s21 }
   0x5   :  { %s9578_s22 = scalar_lea.vmem %s35_s19, 64  ;;  %p9583_p1 = scmp.lt.s32.totalorder %s35_s19, %s35_s19 }
   0x6   :  { %p9579_p0 = scmp.ne.s32.totalorder %s35_s19, %s9578_s22  ;;  %p9584_p2 = scmp.lt.s32.totalorder %s9578_s22, %s9578_s22 }
   0x8   :  { %p9585_p3 = por %p9584_p2, %p9583_p1 }
   0xa   :  { %p9586_p4 = pnand %p9585_p3, %p9579_p0 }
   0xc   :  { %9589 = shalt.err (!%p9586_p4)
}
   0xd   :  { %37 = dma.hbm_to_vmem [thread:$0]  %s10206_s2, 64, %s35_s19, [#allocation6]  }
   0xe   :  { %s9598_s25 = scalar_lea.vmem %s22_s21, 110592  ;;  %p9603_p6 = scmp.lt.s32.totalorder %s22_s21, %s22_s21 }
   0xf   :  { %p9599_p5 = scmp.ne.s32.totalorder %s22_s21, %s9598_s25  ;;  %p9604_p7 = scmp.lt.s32.totalorder %s9598_s25, %s9598_s25 }
  0x11   :  { %p9605_p8 = por %p9604_p7, %p9603_p6 }
  0x13   :  { %p9606_p9 = pnand %p9605_p8, %p9599_p5 }
  0x15   :  { %9609 = shalt.err (!%p9606_p9)
}
  0x16   :  { %s9680_s26 = smov 512   ;;  %s9681_s27 = smov 32  }
  0x17   :  { %27 = dma.hbm_to_vmem [thread:$0]  %s10205_s1, 110592, %s22_s21, [#allocation3], %s9680_s26, %s9680_s26, %s9681_s27  }
  0x18   :  { %s9682_s30 = smov [#allocation7]  }
  0x19   :  { %s43_s6 = sshll.u32 %s9682_s30, 4  ;;  %s44_s6 = int_to_ptr.vmem [resolvable:$true] %s43_s6 }
  0x1a   :  { %s9618_s7 = scalar_lea.vmem %s44_s6, 14336  ;;  %p9623_p11 = scmp.lt.s32.totalorder %s44_s6, %s44_s6 }
  0x1b   :  { %p9619_p10 = scmp.ne.s32.totalorder %s44_s6, %s9618_s7  ;;  %p9624_p12 = scmp.lt.s32.totalorder %s9618_s7, %s9618_s7 }
  0x1d   :  { %p9625_p13 = por %p9624_p12, %p9623_p11 }
  0x1f   :  { %p9626_p0 = pnand %p9625_p13, %p9619_p10 }
  0x21   :  { %9629 = shalt.err (!%p9626_p0)
}
  0x22   :  { %s9683_s2 = smov 64   ;;  %s9684_s8 = smov 4  }
  0x23   :  { %49 = dma.hbm_to_vmem [thread:$0]  %s10207_s3, 14336, %s44_s6, [#allocation6], %s9683_s2, %s9683_s2, %s9684_s8  }
  0x24   :  { %s9685_s11 = smov [#allocation8]  }
  0x25   :  { %s56_s12 = sshll.u32 %s9685_s11, 4  ;;  %s57_s12 = int_to_ptr.vmem [resolvable:$true] %s56_s12 }
  0x26   :  { %s9638_s1 = scalar_lea.vmem %s57_s12, 16  ;;  %s9642_s13 = scalar_lea.vmem %s57_s12, 32 }
  0x27   :  { %p9639_p1 = scmp.ne.s32.totalorder %s57_s12, %s9638_s1  ;;  %p9643_p2 = scmp.lt.s32.totalorder %s57_s12, %s57_s12 }
  0x28   :  { %p9644_p3 = scmp.lt.s32.totalorder %s9642_s13, %s9638_s1 }
  0x2a   :  { %p9645_p4 = por %p9644_p3, %p9643_p2 }
  0x2c   :  { %p9646_p5 = pnand %p9645_p4, %p9639_p1 }
  0x2e   :  { %9649 = shalt.err (!%p9646_p5)
}
  0x2f   :  { %59 = dma.hbm_to_vmem [thread:$0]  %s10208_s4, 16, %s57_s12, [#allocation9]  }
  0x30   :  { %9670 = dma.done.wait [#allocation3], 110592  }
  0x31   :  { %9671 = vsyncadd [#allocation3], 4294856704 }
  0x32   :  { %9672 = dma.done.wait [#allocation6], 14400  }
  0x33   :  { %9673 = vsyncadd [#allocation6], 4294952896 }
  0x34   :  { %9674 = dma.done.wait [#allocation9], 16  }
  0x35   :  { %9675 = vsyncadd [#allocation9], 4294967280  ;;  %v430_v0 = vld [vmem:[#allocation2 + $0xac0] sm:$0xff]  ;;  %vm2132_vm0 = vcmask 523264   ;;  %vm4968_vm1 = vcmask 1045504  }
  0x36   :  { %v434_v1 = vld [vmem:[#allocation2 + $0xae0] sm:$0xff] }
  0x37   :  { %v558_v2 = vld [vmem:[#allocation2 + $0xec0] sm:$0xff]  ;;  %v8316_v3 = vcombine.high %v430_v0, %v434_v1  ;;  %v8315_v5 = vcombine.low %v430_v0, %v434_v1 }
  0x38   :  { %v562_v4 = vld [vmem:[#allocation2 + $0xee0] sm:$0xff] }
  0x39   :  { %v422_v6 = vld [vmem:[#allocation2 + $0xa80] sm:$0xff]  ;;  %v8444_v8 = vcombine.high %v558_v2, %v562_v4  ;;  %v8443_v9 = vcombine.low %v558_v2, %v562_v4  ;;  %2136 = vmatprep.subr.bf16.mxu0 %v8316_v3 }
  0x3a   :  { %v426_v7 = vld [vmem:[#allocation2 + $0xaa0] sm:$0xff]  ;;  %2137 = vmatpush1.bf16.msra.mxu0 %v8315_v5 }
  0x3b   :  { %v8308_v10 = vcombine.high %v422_v6, %v426_v7  ;;  %v550_v11 = vld [vmem:[#allocation2 + $0xe80] sm:$0xff]  ;;  %2179 = vmatprep.subr.bf16.mxu1 %v8444_v8  ;;  %v8307_v18 = vcombine.low %v422_v6, %v426_v7 }
  0x3c   :  { %v554_v12 = vld [vmem:[#allocation2 + $0xea0] sm:$0xff]  ;;  %2180 = vmatpush1.bf16.msra.mxu1 %v8443_v9 }
  0x3d   :  { %v414_v13 = vld [vmem:[#allocation2 + $0xa40] sm:$0xff]  ;;  %v8436_v14 = vcombine.high %v550_v11, %v554_v12  ;;  %2138 = vmatprep.subr.bf16.mxu0 %v8308_v10  ;;  %v8435_v19 = vcombine.low %v550_v11, %v554_v12 }
  0x3e   :  { %v418_v15 = vld [vmem:[#allocation2 + $0xa60] sm:$0xff]  ;;  %2139 = vmatpush1.bf16.msra.mxu0 %v8307_v18 }
  0x3f   :  { %v542_v16 = vld [vmem:[#allocation2 + $0xe40] sm:$0xff]  ;;  %v8300_v20 = vcombine.high %v414_v13, %v418_v15  ;;  %2181 = vmatprep.subr.bf16.mxu1 %v8436_v14  ;;  %v8299_v26 = vcombine.low %v414_v13, %v418_v15 }
  0x40   :  { %v546_v17 = vld [vmem:[#allocation2 + $0xe60] sm:$0xff]  ;;  %2182 = vmatpush1.bf16.msra.mxu1 %v8435_v19 }
  0x41   :  { %v8428_v21 = vcombine.high %v542_v16, %v546_v17  ;;  %v406_v22 = vld [vmem:[#allocation2 + $0xa00] sm:$0xff]  ;;  %2140 = vmatprep.subr.bf16.mxu0 %v8300_v20  ;;  %v8427_v27 = vcombine.low %v542_v16, %v546_v17 }
  0x42   :  { %v410_v23 = vld [vmem:[#allocation2 + $0xa20] sm:$0xff]  ;;  %2141 = vmatpush1.bf16.msra.mxu0 %v8299_v26 }
  0x43   :  { %v534_v24 = vld [vmem:[#allocation2 + $0xe00] sm:$0xff]  ;;  %v8292_v28 = vcombine.high %v406_v22, %v410_v23  ;;  %2183 = vmatprep.subr.bf16.mxu1 %v8428_v21  ;;  %v8291_v34 = vcombine.low %v406_v22, %v410_v23 }
  0x44   :  { %v538_v25 = vld [vmem:[#allocation2 + $0xe20] sm:$0xff]  ;;  %2184 = vmatpush1.bf16.msra.mxu1 %v8427_v27 }
  0x45   :  { %v8420_v29 = vcombine.high %v534_v24, %v538_v25  ;;  %v398_v30 = vld [vmem:[#allocation2 + $0x9c0] sm:$0xff]  ;;  %2142 = vmatprep.subr.bf16.mxu0 %v8292_v28  ;;  %v8419_v35 = vcombine.low %v534_v24, %v538_v25 }
  0x46   :  { %v402_v31 = vld [vmem:[#allocation2 + $0x9e0] sm:$0xff]  ;;  %2143 = vmatpush1.bf16.msra.mxu0 %v8291_v34 }
  0x47   :  { %v526_v32 = vld [vmem:[#allocation2 + $0xdc0] sm:$0xff]  ;;  %v8284_v36 = vcombine.high %v398_v30, %v402_v31  ;;  %2185 = vmatprep.subr.bf16.mxu1 %v8420_v29  ;;  %v8283_v42 = vcombine.low %v398_v30, %v402_v31 }
  0x48   :  { %v530_v33 = vld [vmem:[#allocation2 + $0xde0] sm:$0xff]  ;;  %2186 = vmatpush1.bf16.msra.mxu1 %v8419_v35 }
  0x49   :  { %v8412_v37 = vcombine.high %v526_v32, %v530_v33  ;;  %v390_v38 = vld [vmem:[#allocation2 + $0x980] sm:$0xff]  ;;  %2144 = vmatprep.subr.bf16.mxu0 %v8284_v36  ;;  %v8411_v43 = vcombine.low %v526_v32, %v530_v33 }
  0x4a   :  { %v394_v39 = vld [vmem:[#allocation2 + $0x9a0] sm:$0xff]  ;;  %2145 = vmatpush1.bf16.msra.mxu0 %v8283_v42 }
  0x4b   :  { %v518_v40 = vld [vmem:[#allocation2 + $0xd80] sm:$0xff]  ;;  %v8276_v44 = vcombine.high %v390_v38, %v394_v39  ;;  %2187 = vmatprep.subr.bf16.mxu1 %v8412_v37  ;;  %v8275_v50 = vcombine.low %v390_v38, %v394_v39 }
  0x4c   :  { %v522_v41 = vld [vmem:[#allocation2 + $0xda0] sm:$0xff]  ;;  %2188 = vmatpush1.bf16.msra.mxu1 %v8411_v43 }
  0x4d   :  { %v8404_v45 = vcombine.high %v518_v40, %v522_v41  ;;  %v382_v46 = vld [vmem:[#allocation2 + $0x940] sm:$0xff]  ;;  %2146 = vmatprep.subr.bf16.mxu0 %v8276_v44  ;;  %v8403_v52 = vcombine.low %v518_v40, %v522_v41 }
  0x4e   :  { %v386_v47 = vld [vmem:[#allocation2 + $0x960] sm:$0xff]  ;;  %2147 = vmatpush1.bf16.msra.mxu0 %v8275_v50 }
  0x4f   :  { %v510_v48 = vld [vmem:[#allocation2 + $0xd40] sm:$0xff]  ;;  %v8268_v53 = vcombine.high %v382_v46, %v386_v47  ;;  %2189 = vmatprep.subr.bf16.mxu1 %v8404_v45  ;;  %v8267_v60 = vcombine.low %v382_v46, %v386_v47 }
  0x50   :  { %v514_v49 = vld [vmem:[#allocation2 + $0xd60] sm:$0xff]  ;;  %2190 = vmatpush1.bf16.msra.mxu1 %v8403_v52 }
  0x51   :  { %v374_v51 = vld [vmem:[#allocation2 + $0x900] sm:$0xff]  ;;  %v8396_v55 = vcombine.high %v510_v48, %v514_v49  ;;  %2148 = vmatprep.subr.bf16.mxu0 %v8268_v53  ;;  %v8395_v62 = vcombine.low %v510_v48, %v514_v49 }
  0x52   :  { %v378_v54 = vld [vmem:[#allocation2 + $0x920] sm:$0xff]  ;;  %2149 = vmatpush1.bf16.msra.mxu0 %v8267_v60 }
  0x53   :  { %v9427_v56 = vld [vmem:[%s10204_s0 + $0x4] ss:$20 sps:$4 sm:$0xfe]   ;;  %v9429_v59 = vld [vmem:[%s10204_s0 + $0xc] ss:$20 sps:$4 sm:$0xfe]   ;;  %v8260_v63 = vcombine.high %v374_v51, %v378_v54  ;;  %2191 = vmatprep.subr.bf16.mxu1 %v8396_v55  ;;  %v8259_v6 = vcombine.low %v374_v51, %v378_v54 }
  0x54   :  { %v502_v57 = vld [vmem:[#allocation2 + $0xd00] sm:$0xff]  ;;  %v9736_v61 = vrot.slane %v9427_v56, 1  ;;  %v9738_v0 = vrot.slane %v9429_v59, 1  ;;  %2192 = vmatpush1.bf16.msra.mxu1 %v8395_v62 }
  0x55   :  { %v506_v58 = vld [vmem:[#allocation2 + $0xd20] sm:$0xff]  ;;  %2150 = vmatprep.subr.bf16.mxu0 %v8260_v63 }
  0x56   :  { %v8388_v1 = vcombine.high %v502_v57, %v506_v58  ;;  %v494_v2 = vld [vmem:[#allocation2 + $0xcc0] sm:$0xff]  ;;  %2168 = vmatprep.mubr.bf16.mxu0 %v9736_v61  ;;  %2211 = vmatprep.mubr.bf16.mxu1 %v9738_v0  ;;  %v8387_v7 = vcombine.low %v502_v57, %v506_v58 }
  0x57   :  { %v498_v3 = vld [vmem:[#allocation2 + $0xce0] sm:$0xff]  ;;  %2151 = vmatpush1.bf16.msra.mxu0 %v8259_v6 }
  0x58   :  { %v622_v4 = vld [vmem:[#allocation2 + $0x10c0] sm:$0xff]  ;;  %v8380_v8 = vcombine.high %v494_v2, %v498_v3  ;;  %2193 = vmatprep.subr.bf16.mxu1 %v8388_v1  ;;  %v8379_v14 = vcombine.low %v494_v2, %v498_v3 }
  0x59   :  { %v626_v5 = vld [vmem:[#allocation2 + $0x10e0] sm:$0xff]  ;;  %2194 = vmatpush1.bf16.msra.mxu1 %v8387_v7 }
  0x5a   :  { %v8508_v9 = vcombine.high %v622_v4, %v626_v5  ;;  %v486_v10 = vld [vmem:[#allocation2 + $0xc80] sm:$0xff]  ;;  %2152 = vmatprep.subr.bf16.mxu0 %v8380_v8  ;;  %v8507_v15 = vcombine.low %v622_v4, %v626_v5  ;;  %v559_v4 = vld [vmem:[#allocation2 + $0xec8] sm:$0xff] }
  0x5b   :  { %v490_v11 = vld [vmem:[#allocation2 + $0xca0] sm:$0xff]  ;;  %2153 = vmatpush2.bf16.msra.mxu0 %v8379_v14  ;;  %v563_v5 = vld [vmem:[#allocation2 + $0xee8] sm:$0xff] }
  0x5c   :  { %v614_v12 = vld [vmem:[#allocation2 + $0x1080] sm:$0xff]  ;;  %v8372_v16 = vcombine.high %v486_v10, %v490_v11  ;;  %2195 = vmatprep.subr.bf16.mxu1 %v8508_v9  ;;  %v8371_v22 = vcombine.low %v486_v10, %v490_v11  ;;  %v9432_v10 = vld [vmem:[%s10204_s0 + $0x8] ss:$20 sps:$4 sm:$0xfe]  }
  0x5d   :  { %v618_v13 = vld [vmem:[#allocation2 + $0x10a0] sm:$0xff]  ;;  %2196 = vmatpush2.bf16.msra.mxu1 %v8507_v15  ;;  %v551_v14 = vld [vmem:[#allocation2 + $0xe88] sm:$0xff] }
  0x5e   :  { %v8500_v17 = vcombine.high %v614_v12, %v618_v13  ;;  %v478_v18 = vld [vmem:[#allocation2 + $0xc40] sm:$0xff]  ;;  %2154 = vmatprep.subr.bf16.mxu0 %v8372_v16  ;;  %v8499_v23 = vcombine.low %v614_v12, %v618_v13  ;;  %v8446_v12 = vcombine.high %v559_v4, %v563_v5  ;;  %v555_v15 = vld [vmem:[#allocation2 + $0xea8] sm:$0xff] }
  0x5f   :  { %v482_v19 = vld [vmem:[#allocation2 + $0xc60] sm:$0xff]  ;;  %2155 = vmatpush2.bf16.msra.mxu0 %v8371_v22  ;;  %v8438_v22 = vcombine.high %v551_v14, %v555_v15 }
  0x60   :  { %v606_v20 = vld [vmem:[#allocation2 + $0x1040] sm:$0xff]  ;;  %v8364_v24 = vcombine.high %v478_v18, %v482_v19  ;;  %2197 = vmatprep.subr.bf16.mxu1 %v8500_v17  ;;  %v8363_v30 = vcombine.low %v478_v18, %v482_v19  ;;  %v9750_v19 = vrot.slane %v9432_v10, 1 }
  0x61   :  { %v610_v21 = vld [vmem:[#allocation2 + $0x1060] sm:$0xff]  ;;  %2198 = vmatpush2.bf16.msra.mxu1 %v8499_v23 }
  0x62   :  { %v8492_v25 = vcombine.high %v606_v20, %v610_v21  ;;  %v470_v26 = vld [vmem:[#allocation2 + $0xc00] sm:$0xff]  ;;  %2156 = vmatprep.subr.bf16.mxu0 %v8364_v24  ;;  %v8491_v31 = vcombine.low %v606_v20, %v610_v21  ;;  %v8445_v20 = vcombine.low %v559_v4, %v563_v5  ;;  %v543_v24 = vld [vmem:[#allocation2 + $0xe48] sm:$0xff] }
  0x63   :  { %v474_v27 = vld [vmem:[#allocation2 + $0xc20] sm:$0xff]  ;;  %2157 = vmatpush2.bf16.msra.mxu0 %v8363_v30  ;;  %v407_v4 = vld [vmem:[#allocation2 + $0xa08] sm:$0xff] }
  0x64   :  { %v598_v28 = vld [vmem:[#allocation2 + $0x1000] sm:$0xff]  ;;  %v8356_v32 = vcombine.high %v470_v26, %v474_v27  ;;  %2199 = vmatprep.subr.bf16.mxu1 %v8492_v25  ;;  %v8355_v38 = vcombine.low %v470_v26, %v474_v27  ;;  %v547_v25 = vld [vmem:[#allocation2 + $0xe68] sm:$0xff] }
  0x65   :  { %v602_v29 = vld [vmem:[#allocation2 + $0x1020] sm:$0xff]  ;;  %2200 = vmatpush2.bf16.msra.mxu1 %v8491_v31  ;;  %v8430_v30 = vcombine.high %v543_v24, %v547_v25  ;;  %v411_v5 = vld [vmem:[#allocation2 + $0xa28] sm:$0xff] }
  0x66   :  { %v8484_v33 = vcombine.high %v598_v28, %v602_v29  ;;  %v462_v34 = vld [vmem:[#allocation2 + $0xbc0] sm:$0xff]  ;;  %2158 = vmatprep.subr.bf16.mxu0 %v8356_v32  ;;  %v8483_v39 = vcombine.low %v598_v28, %v602_v29  ;;  %v8437_v28 = vcombine.low %v551_v14, %v555_v15  ;;  %v623_v14 = vld [vmem:[#allocation2 + $0x10c8] sm:$0xff]  ;;  %v8294_v15 = vcombine.high %v407_v4, %v411_v5 }
  0x67   :  { %v466_v35 = vld [vmem:[#allocation2 + $0xbe0] sm:$0xff]  ;;  %2159 = vmatpush2.bf16.msra.mxu0 %v8355_v38 }
  0x68   :  { %v590_v36 = vld [vmem:[#allocation2 + $0xfc0] sm:$0xff]  ;;  %v8348_v40 = vcombine.high %v462_v34, %v466_v35  ;;  %2201 = vmatprep.subr.bf16.mxu1 %v8484_v33  ;;  %v8347_v46 = vcombine.low %v462_v34, %v466_v35  ;;  %v535_v34 = vld [vmem:[#allocation2 + $0xe08] sm:$0xff] }
  0x69   :  { %v594_v37 = vld [vmem:[#allocation2 + $0xfe0] sm:$0xff]  ;;  %2202 = vmatpush2.bf16.msra.mxu1 %v8483_v39  ;;  %v539_v35 = vld [vmem:[#allocation2 + $0xe28] sm:$0xff] }
  0x6a   :  { %v8476_v41 = vcombine.high %v590_v36, %v594_v37  ;;  %v454_v42 = vld [vmem:[#allocation2 + $0xb80] sm:$0xff]  ;;  %2160 = vmatprep.subr.bf16.mxu0 %v8348_v40  ;;  %v8475_v47 = vcombine.low %v590_v36, %v594_v37  ;;  %v9686_v36 = vmov 0   ;;  %v8429_v37 = vcombine.low %v543_v24, %v547_v25  ;;  %v615_v24 = vld [vmem:[#allocation2 + $0x1088] sm:$0xff] }
  0x6b   :  { %v458_v43 = vld [vmem:[#allocation2 + $0xba0] sm:$0xff]  ;;  %2161 = vmatpush2.bf16.msra.mxu0 %v8347_v46  ;;  %v8422_v40 = vcombine.high %v535_v34, %v539_v35  ;;  %v8421_v46 = vcombine.low %v535_v34, %v539_v35  ;;  %v611_v34 = vld [vmem:[#allocation2 + $0x1068] sm:$0xff] }
  0x6c   :  { %v582_v44 = vld [vmem:[#allocation2 + $0xf80] sm:$0xff]  ;;  %v8340_v48 = vcombine.high %v454_v42, %v458_v43  ;;  %2203 = vmatprep.subr.bf16.mxu1 %v8476_v41  ;;  %v8339_v54 = vcombine.low %v454_v42, %v458_v43  ;;  %v431_v41 = vld [vmem:[#allocation2 + $0xac8] sm:$0xff] }
  0x6d   :  { %v586_v45 = vld [vmem:[#allocation2 + $0xfa0] sm:$0xff]  ;;  %2204 = vmatpush2.bf16.msra.mxu1 %v8475_v47  ;;  %v435_v42 = vld [vmem:[#allocation2 + $0xae8] sm:$0xff] }
  0x6e   :  { %v8468_v49 = vcombine.high %v582_v44, %v586_v45  ;;  %v446_v50 = vld [vmem:[#allocation2 + $0xb40] sm:$0xff]  ;;  %2162 = vmatprep.subr.bf16.mxu0 %v8340_v48  ;;  %v8467_v55 = vcombine.low %v582_v44, %v586_v45  ;;  %v527_v43 = vld [vmem:[#allocation2 + $0xdc8] sm:$0xff] }
  0x6f   :  { %v450_v51 = vld [vmem:[#allocation2 + $0xb60] sm:$0xff]  ;;  %2163 = vmatpush2.bf16.msra.mxu0 %v8339_v54  ;;  %v531_v45 = vld [vmem:[#allocation2 + $0xde8] sm:$0xff] }
  0x70   :  { %v574_v52 = vld [vmem:[#allocation2 + $0xf40] sm:$0xff]  ;;  %v8332_v56 = vcombine.high %v446_v50, %v450_v51  ;;  %2205 = vmatprep.subr.bf16.mxu1 %v8468_v49  ;;  %v8331_v63 = vcombine.low %v446_v50, %v450_v51  ;;  %v8414_v48 = vcombine.high %v527_v43, %v531_v45  ;;  %v423_v49 = vld [vmem:[#allocation2 + $0xa88] sm:$0xff] }
  0x71   :  { %v578_v53 = vld [vmem:[#allocation2 + $0xf60] sm:$0xff]  ;;  %2206 = vmatpush2.bf16.msra.mxu1 %v8467_v55  ;;  %v427_v50 = vld [vmem:[#allocation2 + $0xaa8] sm:$0xff]  ;;  %v8413_v55 = vcombine.low %v527_v43, %v531_v45 }
  0x72   :  { %v8460_v57 = vcombine.high %v574_v52, %v578_v53  ;;  %v438_v58 = vld [vmem:[#allocation2 + $0xb00] sm:$0xff]  ;;  %2164 = vmatprep.subr.bf16.mxu0 %v8332_v56  ;;  %v8459_v1 = vcombine.low %v574_v52, %v578_v53  ;;  %v519_v51 = vld [vmem:[#allocation2 + $0xd88] sm:$0xff]  ;;  %v8318_v53 = vcombine.high %v431_v41, %v435_v42  ;;  %v8317_v56 = vcombine.low %v431_v41, %v435_v42 }
  0x73   :  { %v442_v59 = vld [vmem:[#allocation2 + $0xb20] sm:$0xff]  ;;  %2165 = vmatpush2.bf16.msra.mxu0 %v8331_v63  ;;  %v523_v54 = vld [vmem:[#allocation2 + $0xda8] sm:$0xff] }
  0x74   :  { %v566_v60 = vld [vmem:[#allocation2 + $0xf00] sm:$0xff]  ;;  %v8324_v2 = vcombine.high %v438_v58, %v442_v59  ;;  %2207 = vmatprep.subr.bf16.mxu1 %v8460_v57  ;;  %v8323_v9 = vcombine.low %v438_v58, %v442_v59  ;;  %v8406_v57 = vcombine.high %v519_v51, %v523_v54  ;;  %v415_v58 = vld [vmem:[#allocation2 + $0xa48] sm:$0xff] }
  0x75   :  { %v570_v62 = vld [vmem:[#allocation2 + $0xf20] sm:$0xff]  ;;  %2208 = vmatpush2.bf16.msra.mxu1 %v8459_v1  ;;  %v419_v59 = vld [vmem:[#allocation2 + $0xa68] sm:$0xff]  ;;  %v8405_v1 = vcombine.low %v519_v51, %v523_v54 }
  0x76   :  { %v8452_v3 = vcombine.high %v566_v60, %v570_v62  ;;  %v9431_v6 = vld [vmem:[%s10204_s0] ss:$20 sps:$4 sm:$0xfe]   ;;  %2166 = vmatprep.subr.bf16.mxu0 %v8324_v2  ;;  %v8451_v11 = vcombine.low %v566_v60, %v570_v62  ;;  %v9433_v38 = vld [vmem:[%s10204_s0 + $0x10] ss:$20 sps:$4 sm:$0xfe]   ;;  %v8310_v62 = vcombine.high %v423_v49, %v427_v50  ;;  %v8309_v2 = vcombine.low %v423_v49, %v427_v50 }
  0x77   :  { %v654_v7 = vld [vmem:[#allocation2 + $0x11c0] sm:$0xff]  ;;  %v9748_v16 = vrot.slane %v9431_v6, 1  ;;  %2167 = vmatpush2.bf16.msra.mxu0 %v8323_v9  ;;  %v9759_v52 = vrot.slane %v9433_v38, 1  ;;  %v511_v60 = vld [vmem:[#allocation2 + $0xd48] sm:$0xff]  ;;  %v8301_v10 = vcombine.low %v415_v58, %v419_v59 }
  0x78   :  { %v658_v8 = vld [vmem:[#allocation2 + $0x11e0] sm:$0xff]  ;;  %2209 = vmatprep.subr.bf16.mxu1 %v8452_v3  ;;  %2308 = vmatprep.subr.bf16.mxu0 %v8446_v12  ;;  %v515_v63 = vld [vmem:[#allocation2 + $0xd68] sm:$0xff] }
  0x79   :  { %v8540_v13 = vcombine.high %v654_v7, %v658_v8  ;;  %v646_v17 = vld [vmem:[#allocation2 + $0x1180] sm:$0xff]  ;;  %2210 = vmatpush2.bf16.msra.mxu1 %v8451_v11  ;;  %v8539_v21 = vcombine.low %v654_v7, %v658_v8  ;;  %v8398_v3 = vcombine.high %v511_v60, %v515_v63  ;;  %v503_v6 = vld [vmem:[#allocation2 + $0xd08] sm:$0xff]  ;;  %v8302_v7 = vcombine.high %v415_v58, %v419_v59 }
  0x7a   :  { %v650_v18 = vld [vmem:[#allocation2 + $0x11a0] sm:$0xff]  ;;  %2169 = vmatmul.mubr.bf16.vlgmr.msra.gmra.mxu0 %v9748_v16  ;;  %v507_v8 = vld [vmem:[#allocation2 + $0xd28] sm:$0xff]  ;;  %v8397_v9 = vcombine.low %v511_v60, %v515_v63 }
  0x7b   :  { %2230 = vmatprep.subr.bf16.mxu1 %v8540_v13  ;;  %v8532_v23 = vcombine.high %v646_v17, %v650_v18  ;;  %v638_v26 = vld [vmem:[#allocation2 + $0x1140] sm:$0xff]  ;;  %2309 = vmatpush1.bf16.msra.mxu0 %v8445_v20  ;;  %v8531_v29 = vcombine.low %v646_v17, %v650_v18  ;;  %v8390_v11 = vcombine.high %v503_v6, %v507_v8  ;;  %v399_v12 = vld [vmem:[#allocation2 + $0x9c8] sm:$0xff] }
  0x7c   :  { %v642_v27 = vld [vmem:[#allocation2 + $0x1160] sm:$0xff]  ;;  %2212 = vmatmul.mubr.bf16.vlgmr.msra.gmra.mxu1 %v9750_v19  ;;  %2310 = vmatprep.subr.bf16.mxu0 %v8438_v22  ;;  %v403_v13 = vld [vmem:[#allocation2 + $0x9e8] sm:$0xff]  ;;  %v8389_v18 = vcombine.low %v503_v6, %v507_v8  ;;  %v8293_v20 = vcombine.low %v407_v4, %v411_v5 }
  0x7d   :  { %2231 = vmatpush1.bf16.msra.mxu1 %v8539_v21  ;;  %v630_v31 = vld [vmem:[#allocation2 + $0x1100] sm:$0xff]  ;;  %v8524_v33 = vcombine.high %v638_v26, %v642_v27  ;;  %2254 = vmatprep.mubr.bf16.mxu1 %v9686_v36  ;;  %v8523_v39 = vcombine.low %v638_v26, %v642_v27  ;;  %v627_v17 = vld [vmem:[#allocation2 + $0x10e8] sm:$0xff]  ;;  %v8286_v25 = vcombine.high %v399_v12, %v403_v13 }
  0x7e   :  { %v634_v32 = vld [vmem:[#allocation2 + $0x1120] sm:$0xff]  ;;  %2232 = vmatprep.subr.bf16.mxu1 %v8532_v23  ;;  %2340 = vmatprep.mubr.bf16.mxu0 %v9738_v0  ;;  %v8510_v21 = vcombine.high %v623_v14, %v627_v17  ;;  %v391_v22 = vld [vmem:[#allocation2 + $0x988] sm:$0xff]  ;;  %v8509_v27 = vcombine.low %v623_v14, %v627_v17 }
  0x7f   :  { %2311 = vmatpush1.bf16.msra.mxu0 %v8437_v28  ;;  %v8516_v44 = vcombine.high %v630_v31, %v634_v32  ;;  %v8515_v47 = vcombine.low %v630_v31, %v634_v32  ;;  %v395_v23 = vld [vmem:[#allocation2 + $0x9a8] sm:$0xff]  ;;  %v8285_v28 = vcombine.low %v399_v12, %v403_v13 }
  0x80   :  { %2312 = vmatprep.subr.bf16.mxu0 %v8430_v30  ;;  %v619_v26 = vld [vmem:[#allocation2 + $0x10a8] sm:$0xff] }
  0x81   :  { %2233 = vmatpush1.bf16.msra.mxu1 %v8531_v29  ;;  %v8502_v29 = vcombine.high %v615_v24, %v619_v26  ;;  %v383_v30 = vld [vmem:[#allocation2 + $0x948] sm:$0xff]  ;;  %v8501_v35 = vcombine.low %v615_v24, %v619_v26  ;;  %v436_v24 = vld [vmem:[#allocation2 + $0xaf0] sm:$0xff] }
  0x82   :  { %2234 = vmatprep.subr.bf16.mxu1 %v8524_v33  ;;  %v387_v31 = vld [vmem:[#allocation2 + $0x968] sm:$0xff]  ;;  %v8278_v33 = vcombine.high %v391_v22, %v395_v23 }
  0x83   :  { %2313 = vmatpush1.bf16.msra.mxu0 %v8429_v37  ;;  %v607_v32 = vld [vmem:[#allocation2 + $0x1048] sm:$0xff]  ;;  %v8277_v37 = vcombine.low %v391_v22, %v395_v23  ;;  %v8270_v42 = vcombine.high %v383_v30, %v387_v31  ;;  %v8269_v45 = vcombine.low %v383_v30, %v387_v31  ;;  %v432_v22 = vld [vmem:[#allocation2 + $0xad0] sm:$0xff] }
  0x84   :  { %2314 = vmatprep.subr.bf16.mxu0 %v8422_v40  ;;  %v8494_v38 = vcombine.high %v607_v32, %v611_v34  ;;  %v379_v40 = vld [vmem:[#allocation2 + $0x928] sm:$0xff]  ;;  %v424_v30 = vld [vmem:[#allocation2 + $0xa90] sm:$0xff] }
  0x85   :  { %2235 = vmatpush1.bf16.msra.mxu1 %v8523_v39  ;;  %v375_v39 = vld [vmem:[#allocation2 + $0x908] sm:$0xff] }
  0x86   :  { %2236 = vmatprep.subr.bf16.mxu1 %v8516_v44  ;;  %v599_v41 = vld [vmem:[#allocation2 + $0x1008] sm:$0xff]  ;;  %v8493_v44 = vcombine.low %v607_v32, %v611_v34  ;;  %v8262_v50 = vcombine.high %v375_v39, %v379_v40  ;;  %v8261_v54 = vcombine.low %v375_v39, %v379_v40  ;;  %v428_v32 = vld [vmem:[#allocation2 + $0xab0] sm:$0xff] }
  0x87   :  { %2315 = vmatpush1.bf16.msra.mxu0 %v8421_v46  ;;  %v603_v43 = vld [vmem:[#allocation2 + $0x1028] sm:$0xff]  ;;  %v416_v39 = vld [vmem:[#allocation2 + $0xa50] sm:$0xff] }
  0x88   :  { %2316 = vmatprep.subr.bf16.mxu0 %v8414_v48  ;;  %v8486_v46 = vcombine.high %v599_v41, %v603_v43  ;;  %v499_v48 = vld [vmem:[#allocation2 + $0xce8] sm:$0xff] }
  0x89   :  { %2237 = vmatpush1.bf16.msra.mxu1 %v8515_v47  ;;  %v495_v47 = vld [vmem:[#allocation2 + $0xcc8] sm:$0xff] }
  0x8a   :  { %2265 = vmatprep.subr.bf16.mxu1 %v8318_v53  ;;  %v591_v49 = vld [vmem:[#allocation2 + $0xfc8] sm:$0xff]  ;;  %v8485_v53 = vcombine.low %v599_v41, %v603_v43  ;;  %v8382_v59 = vcombine.high %v495_v47, %v499_v48  ;;  %v8381_v63 = vcombine.low %v495_v47, %v499_v48  ;;  %v420_v41 = vld [vmem:[#allocation2 + $0xa70] sm:$0xff] }
  0x8b   :  { %2317 = vmatpush1.bf16.msra.mxu0 %v8413_v55  ;;  %v595_v51 = vld [vmem:[#allocation2 + $0xfe8] sm:$0xff]  ;;  %v408_v47 = vld [vmem:[#allocation2 + $0xa10] sm:$0xff] }
  0x8c   :  { %8547 = vmatmul.mubr.msk.bf16.vlgmr.msra.gmra.mxu1 %vm2132_vm0, %v9759_v52  ;;  %2318 = vmatprep.subr.bf16.mxu0 %v8406_v57  ;;  %v8478_v55 = vcombine.high %v591_v49, %v595_v51  ;;  %v491_v57 = vld [vmem:[#allocation2 + $0xca8] sm:$0xff] }
  0x8d   :  { %2266 = vmatpush1.bf16.msra.mxu1 %v8317_v56  ;;  %2297 = vmatprep.mubr.bf16.mxu1 %v9736_v61  ;;  %v487_v56 = vld [vmem:[#allocation2 + $0xc88] sm:$0xff] }
  0x8e   :  { %2267 = vmatprep.subr.bf16.mxu1 %v8310_v62  ;;  %v583_v58 = vld [vmem:[#allocation2 + $0xf88] sm:$0xff]  ;;  %v8477_v62 = vcombine.low %v591_v49, %v595_v51  ;;  %v8374_v5 = vcombine.high %v487_v56, %v491_v57  ;;  %v8373_v8 = vcombine.low %v487_v56, %v491_v57  ;;  %v412_v49 = vld [vmem:[#allocation2 + $0xa30] sm:$0xff] }
  0x8f   :  { %2319 = vmatpush1.bf16.msra.mxu0 %v8405_v1  ;;  %v587_v60 = vld [vmem:[#allocation2 + $0xfa8] sm:$0xff]  ;;  %v400_v56 = vld [vmem:[#allocation2 + $0x9d0] sm:$0xff] }
  0x90   :  { %2320 = vmatprep.subr.bf16.mxu0 %v8398_v3  ;;  %v8470_v1 = vcombine.high %v583_v58, %v587_v60  ;;  %v483_v3 = vld [vmem:[#allocation2 + $0xc68] sm:$0xff] }
  0x91   :  { %2268 = vmatpush1.bf16.msra.mxu1 %v8309_v2  ;;  %v479_v2 = vld [vmem:[#allocation2 + $0xc48] sm:$0xff] }
  0x92   :  { %2269 = vmatprep.subr.bf16.mxu1 %v8302_v7  ;;  %v575_v4 = vld [vmem:[#allocation2 + $0xf48] sm:$0xff]  ;;  %v8469_v7 = vcombine.low %v583_v58, %v587_v60  ;;  %v8366_v13 = vcombine.high %v479_v2, %v483_v3  ;;  %v8365_v17 = vcombine.low %v479_v2, %v483_v3  ;;  %v404_v58 = vld [vmem:[#allocation2 + $0x9f0] sm:$0xff] }
  0x93   :  { %2321 = vmatpush1.bf16.msra.mxu0 %v8397_v9  ;;  %v579_v6 = vld [vmem:[#allocation2 + $0xf68] sm:$0xff]  ;;  %v392_v2 = vld [vmem:[#allocation2 + $0x990] sm:$0xff] }
  0x94   :  { %2322 = vmatprep.subr.bf16.mxu0 %v8390_v11  ;;  %v8462_v9 = vcombine.high %v575_v4, %v579_v6  ;;  %v475_v11 = vld [vmem:[#allocation2 + $0xc28] sm:$0xff] }
  0x95   :  { %2270 = vmatpush1.bf16.msra.mxu1 %v8301_v10  ;;  %v471_v10 = vld [vmem:[#allocation2 + $0xc08] sm:$0xff] }
  0x96   :  { %2271 = vmatprep.subr.bf16.mxu1 %v8294_v15  ;;  %v567_v12 = vld [vmem:[#allocation2 + $0xf08] sm:$0xff]  ;;  %v8461_v15 = vcombine.low %v575_v4, %v579_v6  ;;  %v8358_v23 = vcombine.high %v471_v10, %v475_v11  ;;  %v8357_v26 = vcombine.low %v471_v10, %v475_v11  ;;  %v396_v4 = vld [vmem:[#allocation2 + $0x9b0] sm:$0xff] }
  0x97   :  { %2323 = vmatpush1.bf16.msra.mxu0 %v8389_v18  ;;  %v571_v14 = vld [vmem:[#allocation2 + $0xf28] sm:$0xff]  ;;  %v384_v10 = vld [vmem:[#allocation2 + $0x950] sm:$0xff] }
  0x98   :  { %2324 = vmatprep.subr.bf16.mxu0 %v8510_v21  ;;  %v8454_v18 = vcombine.high %v567_v12, %v571_v14  ;;  %v467_v21 = vld [vmem:[#allocation2 + $0xbe8] sm:$0xff] }
  0x99   :  { %2272 = vmatpush1.bf16.msra.mxu1 %v8293_v20  ;;  %v463_v20 = vld [vmem:[#allocation2 + $0xbc8] sm:$0xff] }
  0x9a   :  { %2273 = vmatprep.subr.bf16.mxu1 %v8286_v25  ;;  %v8453_v25 = vcombine.low %v567_v12, %v571_v14  ;;  %v8350_v31 = vcombine.high %v463_v20, %v467_v21  ;;  %v8349_v34 = vcombine.low %v463_v20, %v467_v21  ;;  %v388_v12 = vld [vmem:[#allocation2 + $0x970] sm:$0xff] }
  0x9b   :  { %2325 = vmatpush2.bf16.msra.mxu0 %v8509_v27  ;;  %v8320_v27 = vcombine.high %v432_v22, %v436_v24  ;;  %v376_v20 = vld [vmem:[#allocation2 + $0x910] sm:$0xff] }
  0x9c   :  { %2326 = vmatprep.subr.bf16.mxu0 %v8502_v29  ;;  %v459_v29 = vld [vmem:[#allocation2 + $0xba8] sm:$0xff] }
  0x9d   :  { %2274 = vmatpush1.bf16.msra.mxu1 %v8285_v28  ;;  %v455_v28 = vld [vmem:[#allocation2 + $0xb88] sm:$0xff] }
  0x9e   :  { %2275 = vmatprep.subr.bf16.mxu1 %v8278_v33  ;;  %v8319_v33 = vcombine.low %v432_v22, %v436_v24  ;;  %v8342_v40 = vcombine.high %v455_v28, %v459_v29  ;;  %v8341_v43 = vcombine.low %v455_v28, %v459_v29  ;;  %v380_v22 = vld [vmem:[#allocation2 + $0x930] sm:$0xff] }
  0x9f   :  { %2327 = vmatpush2.bf16.msra.mxu0 %v8501_v35  ;;  %v8312_v35 = vcombine.high %v424_v30, %v428_v32  ;;  %v560_v28 = vld [vmem:[#allocation2 + $0xed0] sm:$0xff] }
  0xa0   :  { %2328 = vmatprep.subr.bf16.mxu0 %v8494_v38  ;;  %v451_v38 = vld [vmem:[#allocation2 + $0xb68] sm:$0xff] }
  0xa1   :  { %2276 = vmatpush1.bf16.msra.mxu1 %v8277_v37  ;;  %v447_v37 = vld [vmem:[#allocation2 + $0xb48] sm:$0xff] }
  0xa2   :  { %2277 = vmatprep.subr.bf16.mxu1 %v8270_v42  ;;  %v8311_v42 = vcombine.low %v424_v30, %v428_v32  ;;  %v8334_v48 = vcombine.high %v447_v37, %v451_v38  ;;  %v8333_v51 = vcombine.low %v447_v37, %v451_v38  ;;  %v564_v30 = vld [vmem:[#allocation2 + $0xef0] sm:$0xff] }
  0xa3   :  { %2329 = vmatpush2.bf16.msra.mxu0 %v8493_v44  ;;  %v8304_v44 = vcombine.high %v416_v39, %v420_v41  ;;  %v552_v37 = vld [vmem:[#allocation2 + $0xe90] sm:$0xff]  ;;  %v8448_v38 = vcombine.high %v560_v28, %v564_v30 }
  0xa4   :  { %2330 = vmatprep.subr.bf16.mxu0 %v8486_v46  ;;  %v443_v46 = vld [vmem:[#allocation2 + $0xb28] sm:$0xff] }
  0xa5   :  { %2278 = vmatpush1.bf16.msra.mxu1 %v8269_v45  ;;  %v439_v45 = vld [vmem:[#allocation2 + $0xb08] sm:$0xff] }
  0xa6   :  { %2279 = vmatprep.subr.bf16.mxu1 %v8262_v50  ;;  %v8303_v50 = vcombine.low %v416_v39, %v420_v41  ;;  %v8326_v57 = vcombine.high %v439_v45, %v443_v46  ;;  %v8325_v60 = vcombine.low %v439_v45, %v443_v46  ;;  %v556_v39 = vld [vmem:[#allocation2 + $0xeb0] sm:$0xff]  ;;  %v8447_v41 = vcombine.low %v560_v28, %v564_v30 }
  0xa7   :  { %2331 = vmatpush2.bf16.msra.mxu0 %v8485_v53  ;;  %v8296_v53 = vcombine.high %v408_v47, %v412_v49  ;;  %v544_v45 = vld [vmem:[#allocation2 + $0xe50] sm:$0xff]  ;;  %v8440_v46 = vcombine.high %v552_v37, %v556_v39 }
  0xa8   :  { %2332 = vmatprep.subr.bf16.mxu0 %v8478_v55  ;;  %v659_v55 = vld [vmem:[#allocation2 + $0x11e8] sm:$0xff]  ;;  %v508_v28 = vld [vmem:[#allocation2 + $0xd30] sm:$0xff] }
  0xa9   :  { %2280 = vmatpush1.bf16.msra.mxu1 %v8261_v54  ;;  %v655_v54 = vld [vmem:[#allocation2 + $0x11c8] sm:$0xff] }
  0xaa   :  { %2281 = vmatprep.subr.bf16.mxu1 %v8382_v59  ;;  %v8295_v59 = vcombine.low %v408_v47, %v412_v49  ;;  %v8542_v3 = vcombine.high %v655_v54, %v659_v55  ;;  %v8541_v6 = vcombine.low %v655_v54, %v659_v55  ;;  %v548_v47 = vld [vmem:[#allocation2 + $0xe70] sm:$0xff]  ;;  %v8439_v49 = vcombine.low %v552_v37, %v556_v39 }
  0xab   :  { %2333 = vmatpush2.bf16.msra.mxu0 %v8477_v62  ;;  %v8288_v62 = vcombine.high %v400_v56, %v404_v58  ;;  %v536_v54 = vld [vmem:[#allocation2 + $0xe10] sm:$0xff]  ;;  %v8432_v55 = vcombine.high %v544_v45, %v548_v47 }
  0xac   :  { %2334 = vmatprep.subr.bf16.mxu0 %v8470_v1  ;;  %v651_v1 = vld [vmem:[#allocation2 + $0x11a8] sm:$0xff]  ;;  %v660_v37 = vld [vmem:[#allocation2 + $0x11f0] sm:$0xff] }
  0xad   :  { %2282 = vmatpush2.bf16.msra.mxu1 %v8381_v63  ;;  %v647_v63 = vld [vmem:[#allocation2 + $0x1188] sm:$0xff] }
  0xae   :  { %2283 = vmatprep.subr.bf16.mxu1 %v8374_v5  ;;  %v8287_v5 = vcombine.low %v400_v56, %v404_v58  ;;  %v8534_v11 = vcombine.high %v647_v63, %v651_v1  ;;  %v8533_v14 = vcombine.low %v647_v63, %v651_v1  ;;  %v540_v56 = vld [vmem:[#allocation2 + $0xe30] sm:$0xff]  ;;  %v8431_v58 = vcombine.low %v544_v45, %v548_v47 }
  0xaf   :  { %2335 = vmatpush2.bf16.msra.mxu0 %v8469_v7  ;;  %v8280_v7 = vcombine.high %v392_v2, %v396_v4  ;;  %v528_v63 = vld [vmem:[#allocation2 + $0xdd0] sm:$0xff]  ;;  %v8424_v1 = vcombine.high %v536_v54, %v540_v56 }
  0xb0   :  { %2336 = vmatprep.subr.bf16.mxu0 %v8462_v9  ;;  %v643_v9 = vld [vmem:[#allocation2 + $0x1168] sm:$0xff]  ;;  %v620_v45 = vld [vmem:[#allocation2 + $0x10b0] sm:$0xff] }
  0xb1   :  { %2284 = vmatpush2.bf16.msra.mxu1 %v8373_v8  ;;  %v639_v8 = vld [vmem:[#allocation2 + $0x1148] sm:$0xff] }
  0xb2   :  { %2285 = vmatprep.subr.bf16.mxu1 %v8366_v13  ;;  %v8279_v13 = vcombine.low %v392_v2, %v396_v4  ;;  %v8526_v21 = vcombine.high %v639_v8, %v643_v9  ;;  %v8525_v24 = vcombine.low %v639_v8, %v643_v9  ;;  %v532_v2 = vld [vmem:[#allocation2 + $0xdf0] sm:$0xff]  ;;  %v8423_v4 = vcombine.low %v536_v54, %v540_v56 }
  0xb3   :  { %2337 = vmatpush2.bf16.msra.mxu0 %v8461_v15  ;;  %v8272_v15 = vcombine.high %v384_v10, %v388_v12  ;;  %v520_v8 = vld [vmem:[#allocation2 + $0xd90] sm:$0xff]  ;;  %v8416_v9 = vcombine.high %v528_v63, %v532_v2 }
  0xb4   :  { %2338 = vmatprep.subr.bf16.mxu0 %v8454_v18  ;;  %v635_v18 = vld [vmem:[#allocation2 + $0x1128] sm:$0xff]  ;;  %v612_v54 = vld [vmem:[#allocation2 + $0x1070] sm:$0xff] }
  0xb5   :  { %2286 = vmatpush2.bf16.msra.mxu1 %v8365_v17  ;;  %v631_v17 = vld [vmem:[#allocation2 + $0x1108] sm:$0xff] }
  0xb6   :  { %2287 = vmatprep.subr.bf16.mxu1 %v8358_v23  ;;  %v8271_v23 = vcombine.low %v384_v10, %v388_v12  ;;  %v8518_v29 = vcombine.high %v631_v17, %v635_v18  ;;  %v8517_v32 = vcombine.low %v631_v17, %v635_v18  ;;  %v524_v10 = vld [vmem:[#allocation2 + $0xdb0] sm:$0xff]  ;;  %v8415_v12 = vcombine.low %v528_v63, %v532_v2 }
  0xb7   :  { %2339 = vmatpush2.bf16.msra.mxu0 %v8453_v25  ;;  %v8264_v25 = vcombine.high %v376_v20, %v380_v22  ;;  %v512_v17 = vld [vmem:[#allocation2 + $0xd50] sm:$0xff]  ;;  %v8408_v18 = vcombine.high %v520_v8, %v524_v10 }
  0xb8   :  { %2394 = vmatprep.subr.bf16.mxu0 %v8320_v27  ;;  %v500_v27 = vld [vmem:[#allocation2 + $0xcf0] sm:$0xff] }
  0xb9   :  { %2288 = vmatpush2.bf16.msra.mxu1 %v8357_v26  ;;  %v496_v26 = vld [vmem:[#allocation2 + $0xcd0] sm:$0xff] }
  0xba   :  { %2289 = vmatprep.subr.bf16.mxu1 %v8350_v31  ;;  %2341 = vmatmul.mubr.bf16.vlgmr.msra.gmra.mxu0 %v9750_v19  ;;  %v8263_v31 = vcombine.low %v376_v20, %v380_v22  ;;  %v516_v20 = vld [vmem:[#allocation2 + $0xd70] sm:$0xff]  ;;  %v8407_v22 = vcombine.low %v520_v8, %v524_v10 }
  0xbb   :  { %2395 = vmatpush1.bf16.msra.mxu0 %v8319_v33  ;;  %2426 = vmatprep.mubr.bf16.mxu0 %v9736_v61  ;;  %v8384_v33 = vcombine.high %v496_v26, %v500_v27  ;;  %v8399_v30 = vcombine.low %v512_v17, %v516_v20  ;;  %v604_v63 = vld [vmem:[#allocation2 + $0x1030] sm:$0xff] }
  0xbc   :  { %2396 = vmatprep.subr.bf16.mxu0 %v8312_v35  ;;  %v492_v35 = vld [vmem:[#allocation2 + $0xcb0] sm:$0xff] }
  0xbd   :  { %2290 = vmatpush2.bf16.msra.mxu1 %v8349_v34  ;;  %v488_v34 = vld [vmem:[#allocation2 + $0xc90] sm:$0xff] }
  0xbe   :  { %2291 = vmatprep.subr.bf16.mxu1 %v8342_v40  ;;  %v8383_v40 = vcombine.low %v496_v26, %v500_v27  ;;  %v504_v26 = vld [vmem:[#allocation2 + $0xd10] sm:$0xff]  ;;  %v8400_v27 = vcombine.high %v512_v17, %v516_v20 }
  0xbf   :  { %2397 = vmatpush1.bf16.msra.mxu0 %v8311_v42  ;;  %v8376_v42 = vcombine.high %v488_v34, %v492_v35  ;;  %v8391_v39 = vcombine.low %v504_v26, %v508_v28  ;;  %v596_v8 = vld [vmem:[#allocation2 + $0xff0] sm:$0xff] }
  0xc0   :  { %2398 = vmatprep.subr.bf16.mxu0 %v8304_v44  ;;  %v484_v44 = vld [vmem:[#allocation2 + $0xc70] sm:$0xff] }
  0xc1   :  { %2292 = vmatpush2.bf16.msra.mxu1 %v8341_v43  ;;  %v480_v43 = vld [vmem:[#allocation2 + $0xc50] sm:$0xff] }
  0xc2   :  { %2293 = vmatprep.subr.bf16.mxu1 %v8334_v48  ;;  %v8375_v48 = vcombine.low %v488_v34, %v492_v35  ;;  %v656_v34 = vld [vmem:[#allocation2 + $0x11d0] sm:$0xff]  ;;  %v8392_v35 = vcombine.high %v504_v26, %v508_v28 }
  0xc3   :  { %2399 = vmatpush1.bf16.msra.mxu0 %v8303_v50  ;;  %v8368_v50 = vcombine.high %v480_v43, %v484_v44  ;;  %v588_v17 = vld [vmem:[#allocation2 + $0xfb0] sm:$0xff] }
  0xc4   :  { %2400 = vmatprep.subr.bf16.mxu0 %v8296_v53  ;;  %v476_v53 = vld [vmem:[#allocation2 + $0xc30] sm:$0xff] }
  0xc5   :  { %2294 = vmatpush2.bf16.msra.mxu1 %v8333_v51  ;;  %v472_v51 = vld [vmem:[#allocation2 + $0xc10] sm:$0xff] }
  0xc6   :  { %2295 = vmatprep.subr.bf16.mxu1 %v8326_v57  ;;  %v8367_v57 = vcombine.low %v480_v43, %v484_v44  ;;  %v652_v43 = vld [vmem:[#allocation2 + $0x11b0] sm:$0xff] }
  0xc7   :  { %2401 = vmatpush1.bf16.msra.mxu0 %v8295_v59  ;;  %v8360_v59 = vcombine.high %v472_v51, %v476_v53  ;;  %v616_v44 = vld [vmem:[#allocation2 + $0x1090] sm:$0xff] }
  0xc8   :  { %2402 = vmatprep.subr.bf16.mxu0 %v8288_v62  ;;  %v468_v62 = vld [vmem:[#allocation2 + $0xbf0] sm:$0xff]  ;;  %v8503_v56 = vcombine.low %v616_v44, %v620_v45 }
  0xc9   :  { %2296 = vmatpush2.bf16.msra.mxu1 %v8325_v60  ;;  %v464_v60 = vld [vmem:[#allocation2 + $0xbd0] sm:$0xff] }
  0xca   :  { %2359 = vmatprep.subr.bf16.mxu1 %v8542_v3  ;;  %v8359_v3 = vcombine.low %v472_v51, %v476_v53  ;;  %v644_v51 = vld [vmem:[#allocation2 + $0x1170] sm:$0xff] }
  0xcb   :  { %2403 = vmatpush1.bf16.msra.mxu0 %v8287_v5  ;;  %v8352_v5 = vcombine.high %v464_v60, %v468_v62  ;;  %v608_v53 = vld [vmem:[#allocation2 + $0x1050] sm:$0xff] }
  0xcc   :  { %2298 = vmatmul.mubr.bf16.vlgmr.msra.gmra.mxu1 %v9748_v16  ;;  %2404 = vmatprep.subr.bf16.mxu0 %v8280_v7  ;;  %v460_v7 = vld [vmem:[#allocation2 + $0xbb0] sm:$0xff]  ;;  %v8495_v2 = vcombine.low %v608_v53, %v612_v54 }
  0xcd   :  { %2360 = vmatpush1.bf16.msra.mxu1 %v8541_v6  ;;  %2383 = vmatprep.mubr.bf16.mxu1 %v9686_v36  ;;  %v456_v6 = vld [vmem:[#allocation2 + $0xb90] sm:$0xff] }
  0xce   :  { %2361 = vmatprep.subr.bf16.mxu1 %v8534_v11  ;;  %v8351_v11 = vcombine.low %v464_v60, %v468_v62  ;;  %v636_v60 = vld [vmem:[#allocation2 + $0x1130] sm:$0xff] }
  0xcf   :  { %2405 = vmatpush1.bf16.msra.mxu0 %v8279_v13  ;;  %v8344_v13 = vcombine.high %v456_v6, %v460_v7  ;;  %v600_v62 = vld [vmem:[#allocation2 + $0x1010] sm:$0xff] }
  0xd0   :  { %2406 = vmatprep.subr.bf16.mxu0 %v8272_v15  ;;  %v452_v15 = vld [vmem:[#allocation2 + $0xb70] sm:$0xff]  ;;  %v8487_v10 = vcombine.low %v600_v62, %v604_v63 }
  0xd1   :  { %2362 = vmatpush1.bf16.msra.mxu1 %v8533_v14  ;;  %v448_v14 = vld [vmem:[#allocation2 + $0xb50] sm:$0xff] }
  0xd2   :  { %2363 = vmatprep.subr.bf16.mxu1 %v8526_v21  ;;  %v8343_v21 = vcombine.low %v456_v6, %v460_v7  ;;  %v565_v6 = vld [vmem:[#allocation2 + $0xef8] sm:$0xff]  ;;  %v592_v7 = vld [vmem:[#allocation2 + $0xfd0] sm:$0xff] }
  0xd3   :  { %2407 = vmatpush1.bf16.msra.mxu0 %v8271_v23  ;;  %v8336_v23 = vcombine.high %v448_v14, %v452_v15  ;;  %v8479_v20 = vcombine.low %v592_v7, %v596_v8  ;;  %v580_v26 = vld [vmem:[#allocation2 + $0xf70] sm:$0xff] }
  0xd4   :  { %2408 = vmatprep.subr.bf16.mxu0 %v8264_v25  ;;  %v444_v25 = vld [vmem:[#allocation2 + $0xb30] sm:$0xff] }
  0xd5   :  { %2364 = vmatpush1.bf16.msra.mxu1 %v8525_v24  ;;  %v440_v24 = vld [vmem:[#allocation2 + $0xb10] sm:$0xff] }
  0xd6   :  { %2365 = vmatprep.subr.bf16.mxu1 %v8518_v29  ;;  %v8335_v29 = vcombine.low %v448_v14, %v452_v15  ;;  %v557_v14 = vld [vmem:[#allocation2 + $0xeb8] sm:$0xff]  ;;  %v584_v15 = vld [vmem:[#allocation2 + $0xf90] sm:$0xff] }
  0xd7   :  { %2409 = vmatpush1.bf16.msra.mxu0 %v8263_v31  ;;  %v8328_v31 = vcombine.high %v440_v24, %v444_v25  ;;  %v8471_v28 = vcombine.low %v584_v15, %v588_v17 }
  0xd8   :  { %2410 = vmatprep.subr.bf16.mxu0 %v8384_v33  ;;  %v628_v33 = vld [vmem:[#allocation2 + $0x10f0] sm:$0xff] }
  0xd9   :  { %2366 = vmatpush1.bf16.msra.mxu1 %v8517_v32  ;;  %v624_v32 = vld [vmem:[#allocation2 + $0x10d0] sm:$0xff] }
  0xda   :  { %2437 = vmatprep.subr.bf16.mxu1 %v8448_v38  ;;  %v8327_v38 = vcombine.low %v440_v24, %v444_v25  ;;  %v8511_v47 = vcombine.low %v624_v32, %v628_v33  ;;  %v549_v24 = vld [vmem:[#allocation2 + $0xe78] sm:$0xff]  ;;  %v576_v25 = vld [vmem:[#allocation2 + $0xf50] sm:$0xff] }
  0xdb   :  { %2411 = vmatpush2.bf16.msra.mxu0 %v8383_v40  ;;  %v8544_v40 = vcombine.high %v656_v34, %v660_v37 }
  0xdc   :  { %8548 = vmatmul.mubr.msk.bf16.vlgmr.msra.gmra.mxu1 %vm2132_vm0, %v9759_v52  ;;  %2412 = vmatprep.subr.bf16.mxu0 %v8376_v42  ;;  %v648_v42 = vld [vmem:[#allocation2 + $0x1190] sm:$0xff] }
  0xdd   :  { %2438 = vmatpush1.bf16.msra.mxu1 %v8447_v41  ;;  %2469 = vmatprep.mubr.bf16.mxu1 %v9738_v0  ;;  %v8512_v41 = vcombine.high %v624_v32, %v628_v33  ;;  %v541_v32 = vld [vmem:[#allocation2 + $0xe38] sm:$0xff]  ;;  %v568_v33 = vld [vmem:[#allocation2 + $0xf10] sm:$0xff] }
  0xde   :  { %2439 = vmatprep.subr.bf16.mxu1 %v8440_v46  ;;  %v8543_v46 = vcombine.low %v656_v34, %v660_v37  ;;  %v572_v34 = vld [vmem:[#allocation2 + $0xf30] sm:$0xff]  ;;  %v8463_v37 = vcombine.low %v576_v25, %v580_v26 }
  0xdf   :  { %2413 = vmatpush2.bf16.msra.mxu0 %v8375_v48  ;;  %v8536_v48 = vcombine.high %v648_v42, %v652_v43 }
  0xe0   :  { %2414 = vmatprep.subr.bf16.mxu0 %v8368_v50  ;;  %v640_v50 = vld [vmem:[#allocation2 + $0x1150] sm:$0xff] }
  0xe1   :  { %2440 = vmatpush1.bf16.msra.mxu1 %v8439_v49  ;;  %v8504_v49 = vcombine.high %v616_v44, %v620_v45  ;;  %v8455_v44 = vcombine.low %v568_v33, %v572_v34 }
  0xe2   :  { %2441 = vmatprep.subr.bf16.mxu1 %v8432_v55  ;;  %v8535_v55 = vcombine.low %v648_v42, %v652_v43  ;;  %v437_v42 = vld [vmem:[#allocation2 + $0xaf8] sm:$0xff] }
  0xe3   :  { %2415 = vmatpush2.bf16.msra.mxu0 %v8367_v57  ;;  %v8528_v57 = vcombine.high %v640_v50, %v644_v51 }
  0xe4   :  { %2416 = vmatprep.subr.bf16.mxu0 %v8360_v59  ;;  %v632_v59 = vld [vmem:[#allocation2 + $0x1110] sm:$0xff] }
  0xe5   :  { %2442 = vmatpush1.bf16.msra.mxu1 %v8431_v58  ;;  %v8496_v58 = vcombine.high %v608_v53, %v612_v54 }
  0xe6   :  { %2443 = vmatprep.subr.bf16.mxu1 %v8424_v1  ;;  %v8527_v1 = vcombine.low %v640_v50, %v644_v51  ;;  %v429_v50 = vld [vmem:[#allocation2 + $0xab8] sm:$0xff] }
  0xe7   :  { %2417 = vmatpush2.bf16.msra.mxu0 %v8359_v3  ;;  %v8520_v3 = vcombine.high %v632_v59, %v636_v60 }
  0xe8   :  { %2418 = vmatprep.subr.bf16.mxu0 %v8352_v5  ;;  %v561_v5 = vld [vmem:[#allocation2 + $0xed8] sm:$0xff] }
  0xe9   :  { %2444 = vmatpush1.bf16.msra.mxu1 %v8423_v4  ;;  %v8488_v4 = vcombine.high %v600_v62, %v604_v63 }
  0xea   :  { %2445 = vmatprep.subr.bf16.mxu1 %v8416_v9  ;;  %v8519_v9 = vcombine.low %v632_v59, %v636_v60  ;;  %v421_v59 = vld [vmem:[#allocation2 + $0xa78] sm:$0xff] }
  0xeb   :  { %2419 = vmatpush2.bf16.msra.mxu0 %v8351_v11  ;;  %v8450_v11 = vcombine.high %v561_v5, %v565_v6 }
  0xec   :  { %2420 = vmatprep.subr.bf16.mxu0 %v8344_v13  ;;  %v553_v13 = vld [vmem:[#allocation2 + $0xe98] sm:$0xff] }
  0xed   :  { %2446 = vmatpush1.bf16.msra.mxu1 %v8415_v12  ;;  %v8480_v12 = vcombine.high %v592_v7, %v596_v8 }
  0xee   :  { %2447 = vmatprep.subr.bf16.mxu1 %v8408_v18  ;;  %v8449_v18 = vcombine.low %v561_v5, %v565_v6  ;;  %v413_v5 = vld [vmem:[#allocation2 + $0xa38] sm:$0xff] }
  0xef   :  { %2421 = vmatpush2.bf16.msra.mxu0 %v8343_v21  ;;  %v8442_v21 = vcombine.high %v553_v13, %v557_v14 }
  0xf0   :  { %2422 = vmatprep.subr.bf16.mxu0 %v8336_v23  ;;  %v545_v23 = vld [vmem:[#allocation2 + $0xe58] sm:$0xff] }
  0xf1   :  { %2448 = vmatpush1.bf16.msra.mxu1 %v8407_v22  ;;  %v8472_v22 = vcombine.high %v584_v15, %v588_v17 }
  0xf2   :  { %2449 = vmatprep.subr.bf16.mxu1 %v8400_v27  ;;  %v8441_v27 = vcombine.low %v553_v13, %v557_v14  ;;  %v405_v13 = vld [vmem:[#allocation2 + $0x9f8] sm:$0xff] }
  0xf3   :  { %2423 = vmatpush2.bf16.msra.mxu0 %v8335_v29  ;;  %v8434_v29 = vcombine.high %v545_v23, %v549_v24 }
  0xf4   :  { %2424 = vmatprep.subr.bf16.mxu0 %v8328_v31  ;;  %v537_v31 = vld [vmem:[#allocation2 + $0xe18] sm:$0xff] }
  0xf5   :  { %2450 = vmatpush1.bf16.msra.mxu1 %v8399_v30  ;;  %v8464_v30 = vcombine.high %v576_v25, %v580_v26  ;;  %v8425_v43 = vcombine.low %v537_v31, %v541_v32 }
  0xf6   :  { %2451 = vmatprep.subr.bf16.mxu1 %v8392_v35  ;;  %v8433_v35 = vcombine.low %v545_v23, %v549_v24 }
  0xf7   :  { %2425 = vmatpush2.bf16.msra.mxu0 %v8327_v38  ;;  %v8426_v38 = vcombine.high %v537_v31, %v541_v32 }
  0xf8   :  { %2488 = vmatprep.subr.bf16.mxu0 %v8544_v40  ;;  %v529_v40 = vld [vmem:[#allocation2 + $0xdd8] sm:$0xff] }
  0xf9   :  { %2452 = vmatpush1.bf16.msra.mxu1 %v8391_v39  ;;  %v8456_v39 = vcombine.high %v568_v33, %v572_v34 }
  0xfa   :  { %2453 = vmatprep.subr.bf16.mxu1 %v8512_v41  ;;  %2427 = vmatmul.mubr.bf16.vlgmr.msra.gmra.mxu0 %v9748_v16  ;;  %v433_v41 = vld [vmem:[#allocation2 + $0xad8] sm:$0xff] }
  0xfb   :  { %2489 = vmatpush1.bf16.msra.mxu0 %v8543_v46  ;;  %2512 = vmatprep.mubr.bf16.mxu0 %v9686_v36  ;;  %v8322_v46 = vcombine.high %v433_v41, %v437_v42  ;;  %v8321_v53 = vcombine.low %v433_v41, %v437_v42 }
  0xfc   :  { %2490 = vmatprep.subr.bf16.mxu0 %v8536_v48  ;;  %v525_v48 = vld [vmem:[#allocation2 + $0xdb8] sm:$0xff] }
  0xfd   :  { %2454 = vmatpush2.bf16.msra.mxu1 %v8511_v47  ;;  %v521_v47 = vld [vmem:[#allocation2 + $0xd98] sm:$0xff] }
  0xfe   :  { %2455 = vmatprep.subr.bf16.mxu1 %v8504_v49  ;;  %v425_v49 = vld [vmem:[#allocation2 + $0xa98] sm:$0xff]  ;;  %v8410_v54 = vcombine.high %v521_v47, %v525_v48  ;;  %v8409_v60 = vcombine.low %v521_v47, %v525_v48 }
  0xff   :  { %2491 = vmatpush1.bf16.msra.mxu0 %v8535_v55  ;;  %v8314_v55 = vcombine.high %v425_v49, %v429_v50  ;;  %v8313_v62 = vcombine.low %v425_v49, %v429_v50 }
 0x100   :  { %2492 = vmatprep.subr.bf16.mxu0 %v8528_v57  ;;  %v517_v57 = vld [vmem:[#allocation2 + $0xd78] sm:$0xff] }
 0x101   :  { %2456 = vmatpush2.bf16.msra.mxu1 %v8503_v56  ;;  %v513_v56 = vld [vmem:[#allocation2 + $0xd58] sm:$0xff] }
 0x102   :  { %2457 = vmatprep.subr.bf16.mxu1 %v8496_v58  ;;  %v417_v58 = vld [vmem:[#allocation2 + $0xa58] sm:$0xff]  ;;  %v8402_v63 = vcombine.high %v513_v56, %v517_v57  ;;  %v8401_v6 = vcombine.low %v513_v56, %v517_v57 }
 0x103   :  { %2493 = vmatpush1.bf16.msra.mxu0 %v8527_v1  ;;  %v8306_v1 = vcombine.high %v417_v58, %v421_v59  ;;  %v8305_v7 = vcombine.low %v417_v58, %v421_v59 }
 0x104   :  { %2494 = vmatprep.subr.bf16.mxu0 %v8520_v3  ;;  %v509_v3 = vld [vmem:[#allocation2 + $0xd38] sm:$0xff] }
 0x105   :  { %2458 = vmatpush2.bf16.msra.mxu1 %v8495_v2  ;;  %v505_v2 = vld [vmem:[#allocation2 + $0xd18] sm:$0xff] }
 0x106   :  { %2459 = vmatprep.subr.bf16.mxu1 %v8488_v4  ;;  %v409_v4 = vld [vmem:[#allocation2 + $0xa18] sm:$0xff]  ;;  %v8394_v8 = vcombine.high %v505_v2, %v509_v3  ;;  %v8393_v14 = vcombine.low %v505_v2, %v509_v3 }
 0x107   :  { %2495 = vmatpush1.bf16.msra.mxu0 %v8519_v9  ;;  %v8298_v9 = vcombine.high %v409_v4, %v413_v5  ;;  %v8297_v15 = vcombine.low %v409_v4, %v413_v5  ;;  %v485_v2 = vld [vmem:[#allocation2 + $0xc78] sm:$0xff] }
 0x108   :  { %2566 = vmatprep.subr.bf16.mxu0 %v8450_v11  ;;  %v629_v11 = vld [vmem:[#allocation2 + $0x10f8] sm:$0xff] }
 0x109   :  { %2460 = vmatpush2.bf16.msra.mxu1 %v8487_v10  ;;  %v625_v10 = vld [vmem:[#allocation2 + $0x10d8] sm:$0xff] }
 0x10a   :  { %2461 = vmatprep.subr.bf16.mxu1 %v8480_v12  ;;  %8549 = vmatmul.mubr.msk.bf16.vlgmr.msra.gmra.mxu0 %vm2132_vm0, %v9759_v52  ;;  %v401_v12 = vld [vmem:[#allocation2 + $0x9d8] sm:$0xff]  ;;  %v8513_v23 = vcombine.low %v625_v10, %v629_v11 }
 0x10b   :  { %2567 = vmatpush1.bf16.msra.mxu0 %v8449_v18  ;;  %2598 = vmatprep.mubr.bf16.mxu0 %v9738_v0  ;;  %v533_v0 = vld [vmem:[#allocation2 + $0xdf8] sm:$0xff]  ;;  %v8290_v17 = vcombine.high %v401_v12, %v405_v13  ;;  %v8289_v24 = vcombine.low %v401_v12, %v405_v13 }
 0x10c   :  { %2568 = vmatprep.subr.bf16.mxu0 %v8442_v21  ;;  %v8418_v45 = vcombine.high %v529_v40, %v533_v0  ;;  %v8417_v51 = vcombine.low %v529_v40, %v533_v0  ;;  %v617_v18 = vld [vmem:[#allocation2 + $0x1098] sm:$0xff] }
 0x10d   :  { %2462 = vmatpush2.bf16.msra.mxu1 %v8479_v20  ;;  %v621_v20 = vld [vmem:[#allocation2 + $0x10b8] sm:$0xff] }
 0x10e   :  { %2463 = vmatprep.subr.bf16.mxu1 %v8472_v22  ;;  %v393_v21 = vld [vmem:[#allocation2 + $0x998] sm:$0xff]  ;;  %v8506_v25 = vcombine.high %v617_v18, %v621_v20  ;;  %v8505_v31 = vcombine.low %v617_v18, %v621_v20 }
 0x10f   :  { %2569 = vmatpush1.bf16.msra.mxu0 %v8441_v27  ;;  %v397_v22 = vld [vmem:[#allocation2 + $0x9b8] sm:$0xff] }
 0x110   :  { %2570 = vmatprep.subr.bf16.mxu0 %v8434_v29  ;;  %v8282_v26 = vcombine.high %v393_v21, %v397_v22  ;;  %v609_v27 = vld [vmem:[#allocation2 + $0x1058] sm:$0xff]  ;;  %v8281_v32 = vcombine.low %v393_v21, %v397_v22 }
 0x111   :  { %2464 = vmatpush2.bf16.msra.mxu1 %v8471_v28  ;;  %v613_v28 = vld [vmem:[#allocation2 + $0x1078] sm:$0xff] }
 0x112   :  { %2465 = vmatprep.subr.bf16.mxu1 %v8464_v30  ;;  %v385_v29 = vld [vmem:[#allocation2 + $0x958] sm:$0xff]  ;;  %v8498_v33 = vcombine.high %v609_v27, %v613_v28  ;;  %v8497_v40 = vcombine.low %v609_v27, %v613_v28  ;;  %v139_v27 = vld [vmem:[#allocation2 + $0x1e0] sm:$0xff] }
 0x113   :  { %2571 = vmatpush1.bf16.msra.mxu0 %v8433_v35  ;;  %v389_v30 = vld [vmem:[#allocation2 + $0x978] sm:$0xff] }
 0x114   :  { %2572 = vmatprep.subr.bf16.mxu0 %v8426_v38  ;;  %v8274_v34 = vcombine.high %v385_v29, %v389_v30  ;;  %v601_v35 = vld [vmem:[#allocation2 + $0x1018] sm:$0xff]  ;;  %v8273_v0 = vcombine.low %v385_v29, %v389_v30 }
 0x115   :  { %2466 = vmatpush2.bf16.msra.mxu1 %v8463_v37  ;;  %v605_v37 = vld [vmem:[#allocation2 + $0x1038] sm:$0xff] }
 0x116   :  { %2467 = vmatprep.subr.bf16.mxu1 %v8456_v39  ;;  %v377_v38 = vld [vmem:[#allocation2 + $0x918] sm:$0xff]  ;;  %v8490_v41 = vcombine.high %v601_v35, %v605_v37  ;;  %v8489_v47 = vcombine.low %v601_v35, %v605_v37  ;;  %v127_v35 = vld [vmem:[#allocation2 + $0x180] sm:$0xff] }
 0x117   :  { %2573 = vmatpush1.bf16.msra.mxu0 %v8425_v43  ;;  %v381_v39 = vld [vmem:[#allocation2 + $0x938] sm:$0xff]  ;;  %v131_v37 = vld [vmem:[#allocation2 + $0x1a0] sm:$0xff] }
 0x118   :  { %2574 = vmatprep.subr.bf16.mxu0 %v8418_v45  ;;  %v8266_v42 = vcombine.high %v377_v38, %v381_v39  ;;  %v593_v43 = vld [vmem:[#allocation2 + $0xfd8] sm:$0xff]  ;;  %v8265_v48 = vcombine.low %v377_v38, %v381_v39 }
 0x119   :  { %2468 = vmatpush2.bf16.msra.mxu1 %v8455_v44  ;;  %v597_v44 = vld [vmem:[#allocation2 + $0xff8] sm:$0xff] }
 0x11a   :  { %2523 = vmatprep.subr.bf16.mxu1 %v8322_v46  ;;  %v497_v45 = vld [vmem:[#allocation2 + $0xcd8] sm:$0xff]  ;;  %v8482_v49 = vcombine.high %v593_v43, %v597_v44  ;;  %v8481_v56 = vcombine.low %v593_v43, %v597_v44  ;;  %v119_v44 = vld [vmem:[#allocation2 + $0x140] sm:$0xff] }
 0x11b   :  { %2575 = vmatpush1.bf16.msra.mxu0 %v8417_v51  ;;  %v501_v46 = vld [vmem:[#allocation2 + $0xcf8] sm:$0xff] }
 0x11c   :  { %2470 = vmatmul.mubr.bf16.vlgmr.msra.gmra.mxu1 %v9750_v19  ;;  %2576 = vmatprep.subr.bf16.mxu0 %v8410_v54  ;;  %v8386_v50 = vcombine.high %v497_v45, %v501_v46  ;;  %v585_v51 = vld [vmem:[#allocation2 + $0xf98] sm:$0xff]  ;;  %v8385_v57 = vcombine.low %v497_v45, %v501_v46  ;;  %v123_v45 = vld [vmem:[#allocation2 + $0x160] sm:$0xff] }
 0x11d   :  { %2524 = vmatpush1.bf16.msra.mxu1 %v8321_v53  ;;  %2555 = vmatprep.mubr.bf16.mxu1 %v9736_v61  ;;  %v8514_v61 = vcombine.high %v625_v10, %v629_v11  ;;  %v589_v53 = vld [vmem:[#allocation2 + $0xfb8] sm:$0xff] }
 0x11e   :  { %2525 = vmatprep.subr.bf16.mxu1 %v8314_v55  ;;  %v489_v54 = vld [vmem:[#allocation2 + $0xc98] sm:$0xff]  ;;  %v8474_v58 = vcombine.high %v585_v51, %v589_v53  ;;  %v8473_v4 = vcombine.low %v585_v51, %v589_v53  ;;  %v8597_v53 = vcombine.high %v119_v44, %v123_v45 }
 0x11f   :  { %2577 = vmatpush1.bf16.msra.mxu0 %v8409_v60  ;;  %v493_v55 = vld [vmem:[#allocation2 + $0xcb8] sm:$0xff] }
 0x120   :  { %2578 = vmatprep.subr.bf16.mxu0 %v8402_v63  ;;  %v8378_v59 = vcombine.high %v489_v54, %v493_v55  ;;  %v577_v60 = vld [vmem:[#allocation2 + $0xf58] sm:$0xff] }
 0x121   :  { %2526 = vmatpush1.bf16.msra.mxu1 %v8313_v62  ;;  %v581_v62 = vld [vmem:[#allocation2 + $0xf78] sm:$0xff] }
 0x122   :  { %2527 = vmatprep.subr.bf16.mxu1 %v8306_v1  ;;  %v481_v1 = vld [vmem:[#allocation2 + $0xc58] sm:$0xff]  ;;  %v8465_v18 = vcombine.low %v577_v60, %v581_v62 }
 0x123   :  { %2579 = vmatpush1.bf16.msra.mxu0 %v8401_v6  ;;  %v8370_v10 = vcombine.high %v481_v1, %v485_v2  ;;  %v569_v11 = vld [vmem:[#allocation2 + $0xf18] sm:$0xff]  ;;  %v8369_v22 = vcombine.low %v481_v1, %v485_v2 }
 0x124   :  { %2580 = vmatprep.subr.bf16.mxu0 %v8394_v8  ;;  %v8466_v8 = vcombine.high %v577_v60, %v581_v62  ;;  %v573_v12 = vld [vmem:[#allocation2 + $0xf38] sm:$0xff]  ;;  %v8596_v62 = vcombine.low %v119_v44, %v123_v45 }
 0x125   :  { %2528 = vmatpush1.bf16.msra.mxu1 %v8305_v7  ;;  %v8377_v7 = vcombine.low %v489_v54, %v493_v55  ;;  %v465_v29 = vld [vmem:[#allocation2 + $0xbd8] sm:$0xff] }
 0x126   :  { %2529 = vmatprep.subr.bf16.mxu1 %v8298_v9  ;;  %v469_v30 = vld [vmem:[#allocation2 + $0xbf8] sm:$0xff] }
 0x127   :  { %2581 = vmatpush1.bf16.msra.mxu0 %v8393_v14  ;;  %v457_v38 = vld [vmem:[#allocation2 + $0xb98] sm:$0xff] }
 0x128   :  { %2582 = vmatprep.subr.bf16.mxu0 %v8514_v61  ;;  %v477_v61 = vld [vmem:[#allocation2 + $0xc38] sm:$0xff] }
 0x129   :  { %2530 = vmatpush1.bf16.msra.mxu1 %v8297_v15  ;;  %v473_v15 = vld [vmem:[#allocation2 + $0xc18] sm:$0xff] }
 0x12a   :  { %2531 = vmatprep.subr.bf16.mxu1 %v8290_v17  ;;  %v461_v39 = vld [vmem:[#allocation2 + $0xbb8] sm:$0xff] }
 0x12b   :  { %2583 = vmatpush2.bf16.msra.mxu0 %v8513_v23  ;;  %v8458_v23 = vcombine.high %v569_v11, %v573_v12  ;;  %v8346_v43 = vcombine.high %v457_v38, %v461_v39  ;;  %v449_v46 = vld [vmem:[#allocation2 + $0xb58] sm:$0xff]  ;;  %v8345_v51 = vcombine.low %v457_v38, %v461_v39  ;;  %v199_v39 = vld [vmem:[#allocation2 + $0x3c0] sm:$0xff] }
 0x12c   :  { %2584 = vmatprep.subr.bf16.mxu0 %v8506_v25  ;;  %v8362_v25 = vcombine.high %v473_v15, %v477_v61 }
 0x12d   :  { %2532 = vmatpush1.bf16.msra.mxu1 %v8289_v24 }
 0x12e   :  { %2533 = vmatprep.subr.bf16.mxu1 %v8282_v26  ;;  %v135_v26 = vld [vmem:[#allocation2 + $0x1c0] sm:$0xff] }
 0x12f   :  { %2585 = vmatpush2.bf16.msra.mxu0 %v8505_v31  ;;  %v8457_v31 = vcombine.low %v569_v11, %v573_v12 }
 0x130   :  { %2586 = vmatprep.subr.bf16.mxu0 %v8498_v33  ;;  %v8613_v33 = vcombine.high %v135_v26, %v139_v27 }
 0x131   :  { %2534 = vmatpush1.bf16.msra.mxu1 %v8281_v32  ;;  %v8361_v32 = vcombine.low %v473_v15, %v477_v61  ;;  %v99_v15 = vld [vmem:[#allocation2 + $0xa0] sm:$0xff]  ;;  %v649_v61 = vld [vmem:[#allocation2 + $0x1198] sm:$0xff] }
 0x132   :  { %2535 = vmatprep.subr.bf16.mxu1 %v8274_v34  ;;  %v8354_v34 = vcombine.high %v465_v29, %v469_v30 }
 0x133   :  { %2587 = vmatpush2.bf16.msra.mxu0 %v8497_v40  ;;  %v8612_v40 = vcombine.low %v135_v26, %v139_v27  ;;  %v645_v26 = vld [vmem:[#allocation2 + $0x1178] sm:$0xff] }
 0x134   :  { %2588 = vmatprep.subr.bf16.mxu0 %v8490_v41  ;;  %v8353_v41 = vcombine.low %v465_v29, %v469_v30 }
 0x135   :  { %2536 = vmatpush1.bf16.msra.mxu1 %v8273_v0  ;;  %v9781_v0 = vld [vmem:[%s10204_s0 + $0x4] ss:$20 sps:$4 sm:$0x7f]  }
 0x136   :  { %2537 = vmatprep.subr.bf16.mxu1 %v8266_v42  ;;  %v8605_v42 = vcombine.high %v127_v35, %v131_v37 }
 0x137   :  { %2589 = vmatpush2.bf16.msra.mxu0 %v8489_v47  ;;  %v453_v47 = vld [vmem:[#allocation2 + $0xb78] sm:$0xff] }
 0x138   :  { %2590 = vmatprep.subr.bf16.mxu0 %v8482_v49  ;;  %v8604_v49 = vcombine.low %v127_v35, %v131_v37  ;;  %v8338_v55 = vcombine.high %v449_v46, %v453_v47  ;;  %v8337_v1 = vcombine.low %v449_v46, %v453_v47  ;;  %v191_v47 = vld [vmem:[#allocation2 + $0x380] sm:$0xff] }
 0x139   :  { %2538 = vmatpush1.bf16.msra.mxu1 %v8265_v48 }
 0x13a   :  { %2539 = vmatprep.subr.bf16.mxu1 %v8386_v50  ;;  %v2170_v63 = vpop.f32.mrf.mxu0 }
 0x13b   :  { %2591 = vmatpush2.bf16.msra.mxu0 %v8481_v56  ;;  %v111_v56 = vld [vmem:[#allocation2 + $0x100] sm:$0xff] }
 0x13c   :  { %v2213_v3 = vpop.f32.mrf.mxu1  ;;  %v2172_v6 = vpop.f32.mrf.mxu0  ;;  %2592 = vmatprep.subr.bf16.mxu0 %v8474_v58 }
 0x13d   :  { %v2214_v5 = vadd.f32 %v2213_v3, %v2170_v63  ;;  %2540 = vmatpush2.bf16.msra.mxu1 %v8385_v57  ;;  %v115_v57 = vld [vmem:[#allocation2 + $0x120] sm:$0xff] }
 0x13e   :  { %v2215_v9 = vpop.f32.mrf.mxu1  ;;  %2541 = vmatprep.subr.bf16.mxu1 %v8378_v59  ;;  %v2174_v14 = vpop.f32.mrf.mxu0  ;;  %v445_v59 = vld [vmem:[#allocation2 + $0xb38] sm:$0xff]  ;;  %v8589_v2 = vcombine.high %v111_v56, %v115_v57 }
 0x13f   :  { %v2216_v13 = vadd.f32 %v2215_v9, %v2172_v6  ;;  %2593 = vmatpush2.bf16.msra.mxu0 %v8473_v4  ;;  %v107_v6 = vld [vmem:[#allocation2 + $0xe0] sm:$0xff]  ;;  %v661_v9 = vld [vmem:[#allocation2 + $0x11f8] sm:$0xff] }
 0x140   :  { %v2217_v17 = vpop.f32.mrf.mxu1  ;;  %v2176_v21 = vpop.f32.mrf.mxu0  ;;  %2594 = vmatprep.subr.bf16.mxu0 %v8466_v8  ;;  %v657_v8 = vld [vmem:[#allocation2 + $0x11d8] sm:$0xff] }
 0x141   :  { %v2218_v20 = vadd.f32 %v2217_v17, %v2174_v14  ;;  %2542 = vmatpush2.bf16.msra.mxu1 %v8377_v7  ;;  %v95_v14 = vld [vmem:[#allocation2 + $0x80] sm:$0xff]  ;;  %v653_v17 = vld [vmem:[#allocation2 + $0x11b8] sm:$0xff] }
 0x142   :  { %v2219_v24 = vpop.f32.mrf.mxu1  ;;  %2543 = vmatprep.subr.bf16.mxu1 %v8370_v10  ;;  %v8588_v10 = vcombine.low %v111_v56, %v115_v57  ;;  %v8572_v27 = vcombine.low %v95_v14, %v99_v15  ;;  %v183_v57 = vld [vmem:[#allocation2 + $0x340] sm:$0xff] }
 0x143   :  { %v2220_v28 = vadd.f32 %v2219_v24, %v2176_v21  ;;  %2595 = vmatpush2.bf16.msra.mxu0 %v8465_v18  ;;  %v8573_v21 = vcombine.high %v95_v14, %v99_v15  ;;  %v91_v24 = vld [vmem:[#allocation2 + $0x60] sm:$0xff] }
 0x144   :  { %2596 = vmatprep.subr.bf16.mxu0 %v8458_v23  ;;  %v87_v23 = vld [vmem:[#allocation2 + $0x40] sm:$0xff] }
 0x145   :  { %2544 = vmatpush2.bf16.msra.mxu1 %v8369_v22  ;;  %v8538_v22 = vcombine.high %v649_v61, %v653_v17  ;;  %v8565_v29 = vcombine.high %v87_v23, %v91_v24  ;;  %v8564_v35 = vcombine.low %v87_v23, %v91_v24  ;;  %v171_v14 = vld [vmem:[#allocation2 + $0x2e0] sm:$0xff] }
 0x146   :  { %2545 = vmatprep.subr.bf16.mxu1 %v8362_v25  ;;  %v641_v25 = vld [vmem:[#allocation2 + $0x1158] sm:$0xff]  ;;  %v231_v15 = vld [vmem:[#allocation2 + $0x4c0] sm:$0xff] }
 0x147   :  { %2597 = vmatpush2.bf16.msra.mxu0 %v8457_v31  ;;  %v8530_v30 = vcombine.high %v641_v25, %v645_v26  ;;  %v79_v31 = vld [vmem:[#allocation2] sm:$0xff]  ;;  %v8529_v37 = vcombine.low %v641_v25, %v645_v26 }
 0x148   :  { %4120 = vmatprep.subr.bf16.mxu0 %v8613_v33  ;;  %v633_v33 = vld [vmem:[#allocation2 + $0x1118] sm:$0xff]  ;;  %v163_v23 = vld [vmem:[#allocation2 + $0x2a0] sm:$0xff] }
 0x149   :  { %2546 = vmatpush2.bf16.msra.mxu1 %v8361_v32  ;;  %v83_v32 = vld [vmem:[#allocation2 + $0x20] sm:$0xff] }
 0x14a   :  { %2547 = vmatprep.subr.bf16.mxu1 %v8354_v34  ;;  %2599 = vmatmul.mubr.bf16.vlgmr.msra.gmra.mxu0 %v9750_v19  ;;  %v441_v19 = vld [vmem:[#allocation2 + $0xb18] sm:$0xff]  ;;  %v223_v24 = vld [vmem:[#allocation2 + $0x480] sm:$0xff] }
 0x14b   :  { %4121 = vmatpush1.bf16.msra.mxu0 %v8612_v40  ;;  %4152 = vmatprep.mubr.bf16.mxu0 %v9781_v0  ;;  %v8330_v4 = vcombine.high %v441_v19, %v445_v59  ;;  %v8329_v11 = vcombine.low %v441_v19, %v445_v59  ;;  %v637_v34 = vld [vmem:[#allocation2 + $0x1138] sm:$0xff]  ;;  %v203_v40 = vld [vmem:[#allocation2 + $0x3e0] sm:$0xff] }
 0x14c   :  { %v2256_v48 = vpop.f32.mrf.mxu1  ;;  %4122 = vmatprep.subr.bf16.mxu0 %v8605_v42  ;;  %v8522_v38 = vcombine.high %v633_v33, %v637_v34  ;;  %v267_v42 = vld [vmem:[#allocation2 + $0x5e0] sm:$0xff]  ;;  %v8521_v44 = vcombine.low %v633_v33, %v637_v34  ;;  %v8677_v45 = vcombine.high %v199_v39, %v203_v40 }
 0x14d   :  { %v9785_v50 = vadd.f32 %v2256_v48, %v2214_v5  ;;  %2548 = vmatpush2.bf16.msra.mxu1 %v8353_v41  ;;  %v103_v5 = vld [vmem:[#allocation2 + $0xc0] sm:$0xff] }
 0x14e   :  { %v2258_v54 = vpop.f32.mrf.mxu1  ;;  %2549 = vmatprep.subr.bf16.mxu1 %v8346_v43  ;;  %v8581_v12 = vcombine.high %v103_v5, %v107_v6  ;;  %v8580_v18 = vcombine.low %v103_v5, %v107_v6  ;;  %v263_v41 = vld [vmem:[#allocation2 + $0x5c0] sm:$0xff]  ;;  %v8556_v43 = vcombine.low %v79_v31, %v83_v32 }
 0x14f   :  { %v9787_v58 = vadd.f32 %v2258_v54, %v2216_v13  ;;  %4123 = vmatpush1.bf16.msra.mxu0 %v8604_v49  ;;  %v8546_v13 = vcombine.high %v657_v8, %v661_v9  ;;  %v8741_v46 = vcombine.high %v263_v41, %v267_v42  ;;  %v195_v48 = vld [vmem:[#allocation2 + $0x3a0] sm:$0xff]  ;;  %v8740_v54 = vcombine.low %v263_v41, %v267_v42 }
 0x150   :  { %v2260_v60 = vpop.f32.mrf.mxu1  ;;  %4124 = vmatprep.subr.bf16.mxu0 %v8597_v53  ;;  %v255_v49 = vld [vmem:[#allocation2 + $0x580] sm:$0xff]  ;;  %v8676_v53 = vcombine.low %v199_v39, %v203_v40 }
 0x151   :  { %v9789_v63 = vadd.f32 %v2260_v60, %v2218_v20  ;;  %2550 = vmatpush2.bf16.msra.mxu1 %v8345_v51  ;;  %v8545_v20 = vcombine.low %v657_v8, %v661_v9  ;;  %v259_v51 = vld [vmem:[#allocation2 + $0x5a0] sm:$0xff] }
 0x152   :  { %v2262_v3 = vpop.f32.mrf.mxu1  ;;  %2551 = vmatprep.subr.bf16.mxu1 %v8338_v55  ;;  %v8669_v55 = vcombine.high %v191_v47, %v195_v48  ;;  %v8733_v56 = vcombine.high %v255_v49, %v259_v51  ;;  %v187_v19 = vld [vmem:[#allocation2 + $0x360] sm:$0xff] }
 0x153   :  { %v9791_v7 = vadd.f32 %v2262_v3, %v2220_v28  ;;  %4125 = vmatpush1.bf16.msra.mxu0 %v8596_v62  ;;  %v8537_v28 = vcombine.low %v649_v61, %v653_v17  ;;  %v9798_v59 = vld [vmem:[%s10204_s0 + $0xc] ss:$20 sps:$4 sm:$0x7f]   ;;  %v8661_v3 = vcombine.high %v183_v57, %v187_v19 }
 0x154   :  { %4126 = vmatprep.subr.bf16.mxu0 %v8589_v2  ;;  %v247_v60 = vld [vmem:[#allocation2 + $0x540] sm:$0xff]  ;;  %v8732_v2 = vcombine.low %v255_v49, %v259_v51 }
 0x155   :  { %2552 = vmatpush2.bf16.msra.mxu1 %v8337_v1  ;;  %v251_v62 = vld [vmem:[#allocation2 + $0x560] sm:$0xff]  ;;  %v8668_v1 = vcombine.low %v191_v47, %v195_v48 }
 0x156   :  { %2553 = vmatprep.subr.bf16.mxu1 %v8330_v4  ;;  %v8725_v4 = vcombine.high %v247_v60, %v251_v62  ;;  %v175_v5 = vld [vmem:[#allocation2 + $0x300] sm:$0xff] }
 0x157   :  { %4127 = vmatpush1.bf16.msra.mxu0 %v8588_v10  ;;  %v179_v6 = vld [vmem:[#allocation2 + $0x320] sm:$0xff]  ;;  %v8660_v10 = vcombine.low %v183_v57, %v187_v19 }
 0x158   :  { %4128 = vmatprep.subr.bf16.mxu0 %v8581_v12  ;;  %v239_v8 = vld [vmem:[#allocation2 + $0x500] sm:$0xff]  ;;  %v8652_v17 = vcombine.low %v175_v5, %v179_v6 }
 0x159   :  { %2554 = vmatpush2.bf16.msra.mxu1 %v8329_v11  ;;  %v243_v9 = vld [vmem:[#allocation2 + $0x520] sm:$0xff]  ;;  %v8724_v11 = vcombine.low %v247_v60, %v251_v62 }
 0x15a   :  { %2617 = vmatprep.subr.bf16.mxu1 %v8546_v13  ;;  %v8717_v12 = vcombine.high %v239_v8, %v243_v9  ;;  %v167_v13 = vld [vmem:[#allocation2 + $0x2c0] sm:$0xff] }
 0x15b   :  { %4129 = vmatpush1.bf16.msra.mxu0 %v8580_v18  ;;  %v235_v61 = vld [vmem:[#allocation2 + $0x4e0] sm:$0xff]  ;;  %v8716_v18 = vcombine.low %v239_v8, %v243_v9  ;;  %v8644_v26 = vcombine.low %v167_v13, %v171_v14 }
 0x15c   :  { %2556 = vmatmul.mubr.bf16.vlgmr.msra.gmra.mxu1 %v9748_v16  ;;  %4130 = vmatprep.subr.bf16.mxu0 %v8573_v21  ;;  %v8557_v16 = vcombine.high %v79_v31, %v83_v32  ;;  %v8709_v21 = vcombine.high %v231_v15, %v235_v61  ;;  %v227_v25 = vld [vmem:[#allocation2 + $0x4a0] sm:$0xff] }
 0x15d   :  { %2618 = vmatpush1.bf16.msra.mxu1 %v8545_v20  ;;  %2641 = vmatprep.mubr.bf16.mxu1 %v9686_v36  ;;  %v8645_v20 = vcombine.high %v167_v13, %v171_v14  ;;  %v155_v31 = vld [vmem:[#allocation2 + $0x260] sm:$0xff] }
 0x15e   :  { %2619 = vmatprep.subr.bf16.mxu1 %v8538_v22  ;;  %v159_v22 = vld [vmem:[#allocation2 + $0x280] sm:$0xff] }
 0x15f   :  { %4131 = vmatpush1.bf16.msra.mxu0 %v8572_v27  ;;  %v8708_v27 = vcombine.low %v231_v15, %v235_v61  ;;  %v215_v32 = vld [vmem:[#allocation2 + $0x440] sm:$0xff]  ;;  %v8636_v34 = vcombine.low %v159_v22, %v163_v23 }
 0x160   :  { %4132 = vmatprep.subr.bf16.mxu0 %v8565_v29  ;;  %v8701_v29 = vcombine.high %v223_v24, %v227_v25  ;;  %v219_v33 = vld [vmem:[#allocation2 + $0x460] sm:$0xff] }
 0x161   :  { %2620 = vmatpush1.bf16.msra.mxu1 %v8537_v28  ;;  %v8637_v28 = vcombine.high %v159_v22, %v163_v23  ;;  %v147_v39 = vld [vmem:[#allocation2 + $0x220] sm:$0xff] }
 0x162   :  { %2621 = vmatprep.subr.bf16.mxu1 %v8530_v30  ;;  %v151_v30 = vld [vmem:[#allocation2 + $0x240] sm:$0xff] }
 0x163   :  { %4133 = vmatpush1.bf16.msra.mxu0 %v8564_v35  ;;  %v8700_v35 = vcombine.low %v223_v24, %v227_v25  ;;  %v207_v40 = vld [vmem:[#allocation2 + $0x400] sm:$0xff]  ;;  %v8628_v42 = vcombine.low %v151_v30, %v155_v31 }
 0x164   :  { %4134 = vmatprep.subr.bf16.mxu0 %v8557_v16  ;;  %v8693_v16 = vcombine.high %v215_v32, %v219_v33  ;;  %v211_v41 = vld [vmem:[#allocation2 + $0x420] sm:$0xff] }
 0x165   :  { %2622 = vmatpush1.bf16.msra.mxu1 %v8529_v37  ;;  %v8629_v37 = vcombine.high %v151_v30, %v155_v31  ;;  %v363_v47 = vld [vmem:[#allocation2 + $0x8e0] sm:$0xff] }
 0x166   :  { %2623 = vmatprep.subr.bf16.mxu1 %v8522_v38  ;;  %v143_v38 = vld [vmem:[#allocation2 + $0x200] sm:$0xff] }
 0x167   :  { %4135 = vmatpush1.bf16.msra.mxu0 %v8556_v43  ;;  %v8692_v43 = vcombine.low %v215_v32, %v219_v33  ;;  %v327_v48 = vld [vmem:[#allocation2 + $0x7c0] sm:$0xff]  ;;  %v8620_v51 = vcombine.low %v143_v38, %v147_v39  ;;  %v264_v33 = vld [vmem:[#allocation2 + $0x5c8] sm:$0xff] }
 0x168   :  { %4136 = vmatprep.subr.bf16.mxu0 %v8677_v45  ;;  %v8685_v45 = vcombine.high %v207_v40, %v211_v41  ;;  %v331_v49 = vld [vmem:[#allocation2 + $0x7e0] sm:$0xff] }
 0x169   :  { %2624 = vmatpush1.bf16.msra.mxu1 %v8521_v44  ;;  %v8621_v44 = vcombine.high %v143_v38, %v147_v39  ;;  %v351_v57 = vld [vmem:[#allocation2 + $0x880] sm:$0xff] }
 0x16a   :  { %4163 = vmatprep.subr.bf16.mxu1 %v8741_v46  ;;  %v359_v46 = vld [vmem:[#allocation2 + $0x8c0] sm:$0xff] }
 0x16b   :  { %4137 = vmatpush2.bf16.msra.mxu0 %v8676_v53  ;;  %v355_v19 = vld [vmem:[#allocation2 + $0x8a0] sm:$0xff] }
 0x16c   :  { %8550 = vmatmul.mubr.msk.bf16.vlgmr.msra.gmra.mxu1 %vm2132_vm0, %v9759_v52  ;;  %4138 = vmatprep.subr.bf16.mxu0 %v8669_v55  ;;  %v8653_v52 = vcombine.high %v175_v5, %v179_v6  ;;  %v8837_v55 = vcombine.high %v359_v46, %v363_v47  ;;  %v9806_v60 = vld [vmem:[%s10204_s0] ss:$20 sps:$4 sm:$0x7f]   ;;  %v8829_v5 = vcombine.high %v351_v57, %v355_v19 }
 0x16d   :  { %4164 = vmatpush1.bf16.msra.mxu1 %v8740_v54  ;;  %4195 = vmatprep.mubr.bf16.mxu1 %v9798_v59  ;;  %v8684_v54 = vcombine.low %v207_v40, %v211_v41  ;;  %v319_v62 = vld [vmem:[#allocation2 + $0x780] sm:$0xff]  ;;  %v8828_v13 = vcombine.low %v351_v57, %v355_v19 }
 0x16e   :  { %4165 = vmatprep.subr.bf16.mxu1 %v8733_v56  ;;  %v8805_v56 = vcombine.high %v327_v48, %v331_v49  ;;  %v343_v8 = vld [vmem:[#allocation2 + $0x840] sm:$0xff] }
 0x16f   :  { %4139 = vmatpush2.bf16.msra.mxu0 %v8668_v1  ;;  %v323_v1 = vld [vmem:[#allocation2 + $0x7a0] sm:$0xff] }
 0x170   :  { %4140 = vmatprep.subr.bf16.mxu0 %v8661_v3  ;;  %v8797_v6 = vcombine.high %v319_v62, %v323_v1  ;;  %v347_v9 = vld [vmem:[#allocation2 + $0x860] sm:$0xff]  ;;  %v8796_v15 = vcombine.low %v319_v62, %v323_v1 }
 0x171   :  { %4166 = vmatpush1.bf16.msra.mxu1 %v8732_v2  ;;  %v8836_v2 = vcombine.low %v359_v46, %v363_v47  ;;  %v8821_v61 = vcombine.high %v343_v8, %v347_v9  ;;  %v303_v23 = vld [vmem:[#allocation2 + $0x700] sm:$0xff] }
 0x172   :  { %4167 = vmatprep.subr.bf16.mxu1 %v8725_v4  ;;  %v8804_v4 = vcombine.low %v327_v48, %v331_v49  ;;  %v307_v24 = vld [vmem:[#allocation2 + $0x720] sm:$0xff] }
 0x173   :  { %4141 = vmatpush2.bf16.msra.mxu0 %v8660_v10  ;;  %v311_v10 = vld [vmem:[#allocation2 + $0x740] sm:$0xff]  ;;  %v8781_v32 = vcombine.high %v303_v23, %v307_v24  ;;  %v8780_v39 = vcombine.low %v303_v23, %v307_v24 }
 0x174   :  { %4142 = vmatprep.subr.bf16.mxu0 %v8653_v52  ;;  %v291_v46 = vld [vmem:[#allocation2 + $0x6a0] sm:$0xff] }
 0x175   :  { %4168 = vmatpush1.bf16.msra.mxu1 %v8724_v11  ;;  %v315_v11 = vld [vmem:[#allocation2 + $0x760] sm:$0xff] }
 0x176   :  { %4169 = vmatprep.subr.bf16.mxu1 %v8717_v12 }
 0x177   :  { %4143 = vmatpush2.bf16.msra.mxu0 %v8652_v17 }
 0x178   :  { %4144 = vmatprep.subr.bf16.mxu0 %v8645_v20  ;;  %v335_v20 = vld [vmem:[#allocation2 + $0x800] sm:$0xff] }
 0x179   :  { %4170 = vmatpush1.bf16.msra.mxu1 %v8716_v18  ;;  %v8789_v18 = vcombine.high %v311_v10, %v315_v11 }
 0x17a   :  { %4171 = vmatprep.subr.bf16.mxu1 %v8709_v21  ;;  %v2342_v53 = vpop.f32.mrf.mxu0  ;;  %v339_v21 = vld [vmem:[#allocation2 + $0x820] sm:$0xff] }
 0x17b   :  { %4145 = vmatpush2.bf16.msra.mxu0 %v8644_v26  ;;  %v8813_v30 = vcombine.high %v335_v20, %v339_v21  ;;  %v8812_v38 = vcombine.low %v335_v20, %v339_v21  ;;  %v136_v21 = vld [vmem:[#allocation2 + $0x1c8] sm:$0xff] }
 0x17c   :  { %4146 = vmatprep.subr.bf16.mxu0 %v8637_v28  ;;  %v2344_v3 = vpop.f32.mrf.mxu0 }
 0x17d   :  { %4172 = vmatpush1.bf16.msra.mxu1 %v8708_v27  ;;  %v8820_v27 = vcombine.low %v343_v8, %v347_v9  ;;  %v271_v9 = vld [vmem:[#allocation2 + $0x600] sm:$0xff] }
 0x17e   :  { %4173 = vmatprep.subr.bf16.mxu1 %v8701_v29  ;;  %v2346_v12 = vpop.f32.mrf.mxu0  ;;  %v8788_v29 = vcombine.low %v311_v10, %v315_v11  ;;  %v275_v10 = vld [vmem:[#allocation2 + $0x620] sm:$0xff] }
 0x17f   :  { %4147 = vmatpush2.bf16.msra.mxu0 %v8636_v34  ;;  %v268_v34 = vld [vmem:[#allocation2 + $0x5e8] sm:$0xff]  ;;  %v8748_v24 = vcombine.low %v271_v9, %v275_v10 }
 0x180   :  { %4148 = vmatprep.subr.bf16.mxu0 %v8629_v37  ;;  %v2348_v26 = vpop.f32.mrf.mxu0  ;;  %v295_v37 = vld [vmem:[#allocation2 + $0x6c0] sm:$0xff]  ;;  %v8743_v40 = vcombine.high %v264_v33, %v268_v34  ;;  %v8742_v47 = vcombine.low %v264_v33, %v268_v34 }
 0x181   :  { %4174 = vmatpush1.bf16.msra.mxu1 %v8700_v35 }
 0x182   :  { %4175 = vmatprep.subr.bf16.mxu1 %v8693_v16  ;;  %v299_v16 = vld [vmem:[#allocation2 + $0x6e0] sm:$0xff] }
 0x183   :  { %4149 = vmatpush2.bf16.msra.mxu0 %v8628_v42  ;;  %v8773_v41 = vcombine.high %v295_v37, %v299_v16  ;;  %v256_v42 = vld [vmem:[#allocation2 + $0x588] sm:$0xff]  ;;  %v8772_v48 = vcombine.low %v295_v37, %v299_v16 }
 0x184   :  { %4150 = vmatprep.subr.bf16.mxu0 %v8621_v44  ;;  %v9813_v44 = vld [vmem:[%s10204_s0 + $0x10] ss:$20 sps:$4 sm:$0x7f]   ;;  %v216_v37 = vld [vmem:[#allocation2 + $0x448] sm:$0xff] }
 0x185   :  { %4176 = vmatpush1.bf16.msra.mxu1 %v8692_v43  ;;  %v260_v43 = vld [vmem:[#allocation2 + $0x5a8] sm:$0xff] }
 0x186   :  { %4177 = vmatprep.subr.bf16.mxu1 %v8685_v45  ;;  %v287_v45 = vld [vmem:[#allocation2 + $0x680] sm:$0xff]  ;;  %v8735_v49 = vcombine.high %v256_v42, %v260_v43  ;;  %v8734_v19 = vcombine.low %v256_v42, %v260_v43  ;;  %v220_v16 = vld [vmem:[#allocation2 + $0x468] sm:$0xff] }
 0x187   :  { %4151 = vmatpush2.bf16.msra.mxu0 %v8620_v51  ;;  %v8765_v51 = vcombine.high %v287_v45, %v291_v46  ;;  %v8764_v1 = vcombine.low %v287_v45, %v291_v46  ;;  %v8695_v42 = vcombine.high %v216_v37, %v220_v16  ;;  %v208_v45 = vld [vmem:[#allocation2 + $0x408] sm:$0xff] }
 0x188   :  { %4214 = vmatprep.subr.bf16.mxu0 %v8837_v55  ;;  %v279_v55 = vld [vmem:[#allocation2 + $0x640] sm:$0xff]  ;;  %v212_v46 = vld [vmem:[#allocation2 + $0x428] sm:$0xff] }
 0x189   :  { %4178 = vmatpush1.bf16.msra.mxu1 %v8684_v54  ;;  %v252_v54 = vld [vmem:[#allocation2 + $0x568] sm:$0xff] }
 0x18a   :  { %4179 = vmatprep.subr.bf16.mxu1 %v8805_v56  ;;  %4153 = vmatmul.mubr.bf16.vlgmr.msra.gmra.mxu0 %v9806_v60  ;;  %v283_v56 = vld [vmem:[#allocation2 + $0x660] sm:$0xff] }
 0x18b   :  { %4215 = vmatpush1.bf16.msra.mxu0 %v8836_v2  ;;  %4238 = vmatprep.mubr.bf16.mxu0 %v9686_v36 }
 0x18c   :  { %v2299_v52 = vpop.f32.mrf.mxu1  ;;  %4216 = vmatprep.subr.bf16.mxu0 %v8829_v5  ;;  %v240_v5 = vld [vmem:[#allocation2 + $0x508] sm:$0xff] }
 0x18d   :  { %v2343_v14 = vadd.f32 %v2342_v53, %v2299_v52  ;;  %4180 = vmatpush2.bf16.msra.mxu1 %v8804_v4  ;;  %v248_v53 = vld [vmem:[#allocation2 + $0x548] sm:$0xff]  ;;  %v8757_v4 = vcombine.high %v279_v55, %v283_v56 }
 0x18e   :  { %v2301_v17 = vpop.f32.mrf.mxu1  ;;  %4181 = vmatprep.subr.bf16.mxu1 %v8797_v6  ;;  %v8727_v2 = vcombine.high %v248_v53, %v252_v54  ;;  %v244_v6 = vld [vmem:[#allocation2 + $0x528] sm:$0xff]  ;;  %v8726_v52 = vcombine.low %v248_v53, %v252_v54  ;;  %v8687_v53 = vcombine.high %v208_v45, %v212_v46 }
 0x18f   :  { %v2345_v22 = vadd.f32 %v2344_v3, %v2301_v17  ;;  %4217 = vmatpush1.bf16.msra.mxu0 %v8828_v13  ;;  %v8756_v13 = vcombine.low %v279_v55, %v283_v56  ;;  %v232_v17 = vld [vmem:[#allocation2 + $0x4c8] sm:$0xff]  ;;  %v8718_v23 = vcombine.low %v240_v5, %v244_v6 }
 0x190   :  { %v2303_v25 = vpop.f32.mrf.mxu1  ;;  %4218 = vmatprep.subr.bf16.mxu0 %v8821_v61  ;;  %v8749_v61 = vcombine.high %v271_v9, %v275_v10  ;;  %v328_v55 = vld [vmem:[#allocation2 + $0x7c8] sm:$0xff] }
 0x191   :  { %v2347_v28 = vadd.f32 %v2346_v12, %v2303_v25  ;;  %4182 = vmatpush2.bf16.msra.mxu1 %v8796_v15  ;;  %v332_v56 = vld [vmem:[#allocation2 + $0x7e8] sm:$0xff] }
 0x192   :  { %v2305_v31 = vpop.f32.mrf.mxu1  ;;  %4183 = vmatprep.subr.bf16.mxu1 %v8789_v18  ;;  %v236_v18 = vld [vmem:[#allocation2 + $0x4e8] sm:$0xff] }
 0x193   :  { %v2349_v35 = vadd.f32 %v2348_v26, %v2305_v31  ;;  %4219 = vmatpush1.bf16.msra.mxu0 %v8820_v27  ;;  %v8711_v25 = vcombine.high %v232_v17, %v236_v18  ;;  %v224_v27 = vld [vmem:[#allocation2 + $0x488] sm:$0xff] }
 0x194   :  { %4220 = vmatprep.subr.bf16.mxu0 %v8813_v30  ;;  %v132_v30 = vld [vmem:[#allocation2 + $0x1a8] sm:$0xff] }
 0x195   :  { %4184 = vmatpush2.bf16.msra.mxu1 %v8788_v29  ;;  %v128_v29 = vld [vmem:[#allocation2 + $0x188] sm:$0xff] }
 0x196   :  { %4185 = vmatprep.subr.bf16.mxu1 %v8781_v32  ;;  %v9829_v31 = vld [vmem:[%s10204_s0 + $0x8] ss:$20 sps:$4 sm:$0x7f]   ;;  %v8710_v32 = vcombine.low %v232_v17, %v236_v18 }
 0x197   :  { %4221 = vmatpush1.bf16.msra.mxu0 %v8812_v38  ;;  %v120_v38 = vld [vmem:[#allocation2 + $0x148] sm:$0xff] }
 0x198   :  { %4292 = vmatprep.subr.bf16.mxu0 %v8743_v40  ;;  %v96_v9 = vld [vmem:[#allocation2 + $0x88] sm:$0xff] }
 0x199   :  { %4186 = vmatpush2.bf16.msra.mxu1 %v8780_v39  ;;  %v124_v39 = vld [vmem:[#allocation2 + $0x168] sm:$0xff] }
 0x19a   :  { %4187 = vmatprep.subr.bf16.mxu1 %v8773_v41  ;;  %8844 = vmatmul.mubr.msk.bf16.vlgmr.msra.gmra.mxu0 %vm2132_vm0, %v9813_v44  ;;  %v8606_v41 = vcombine.low %v128_v29, %v132_v30  ;;  %v8599_v43 = vcombine.high %v120_v38, %v124_v39  ;;  %v100_v10 = vld [vmem:[#allocation2 + $0xa8] sm:$0xff] }
 0x19b   :  { %4293 = vmatpush1.bf16.msra.mxu0 %v8742_v47  ;;  %4324 = vmatprep.mubr.bf16.mxu0 %v9798_v59  ;;  %v112_v47 = vld [vmem:[#allocation2 + $0x108] sm:$0xff] }
 0x19c   :  { %v2385_v57 = vpop.f32.mrf.mxu1  ;;  %4294 = vmatprep.subr.bf16.mxu0 %v8735_v49  ;;  %v8694_v49 = vcombine.low %v216_v37, %v220_v16  ;;  %v88_v17 = vld [vmem:[#allocation2 + $0x48] sm:$0xff] }
 0x19d   :  { %v9818_v62 = vadd.f32 %v2385_v57, %v2343_v14  ;;  %4188 = vmatpush2.bf16.msra.mxu1 %v8772_v48  ;;  %v8719_v14 = vcombine.high %v240_v5, %v244_v6  ;;  %v116_v48 = vld [vmem:[#allocation2 + $0x128] sm:$0xff] }
 0x19e   :  { %v2387_v3 = vpop.f32.mrf.mxu1  ;;  %4189 = vmatprep.subr.bf16.mxu1 %v8765_v51  ;;  %v8598_v51 = vcombine.low %v120_v38, %v124_v39  ;;  %v8591_v54 = vcombine.high %v112_v47, %v116_v48  ;;  %v104_v57 = vld [vmem:[#allocation2 + $0xc8] sm:$0xff] }
 0x19f   :  { %v9820_v8 = vadd.f32 %v2387_v3, %v2345_v22  ;;  %4295 = vmatpush1.bf16.msra.mxu0 %v8734_v19  ;;  %v140_v22 = vld [vmem:[#allocation2 + $0x1e8] sm:$0xff]  ;;  %v8807_v3 = vcombine.high %v328_v55, %v332_v56 }
 0x1a0   :  { %v2389_v11 = vpop.f32.mrf.mxu1  ;;  %4296 = vmatprep.subr.bf16.mxu0 %v8727_v2  ;;  %v8615_v26 = vcombine.high %v136_v21, %v140_v22  ;;  %v8614_v33 = vcombine.low %v136_v21, %v140_v22  ;;  %v108_v19 = vld [vmem:[#allocation2 + $0xe8] sm:$0xff]  ;;  %v8590_v2 = vcombine.low %v112_v47, %v116_v48  ;;  %v8574_v22 = vcombine.low %v96_v9, %v100_v10 }
 0x1a1   :  { %v9822_v12 = vadd.f32 %v2389_v11, %v2347_v28  ;;  %4190 = vmatpush2.bf16.msra.mxu1 %v8764_v1  ;;  %v228_v28 = vld [vmem:[#allocation2 + $0x4a8] sm:$0xff]  ;;  %v8686_v1 = vcombine.low %v208_v45, %v212_v46  ;;  %v8806_v11 = vcombine.low %v328_v55, %v332_v56 }
 0x1a2   :  { %v2391_v15 = vpop.f32.mrf.mxu1  ;;  %4191 = vmatprep.subr.bf16.mxu1 %v8757_v4  ;;  %v8703_v34 = vcombine.high %v224_v27, %v228_v28  ;;  %v8702_v40 = vcombine.low %v224_v27, %v228_v28  ;;  %v8583_v4 = vcombine.high %v104_v57, %v108_v19  ;;  %v320_v5 = vld [vmem:[#allocation2 + $0x788] sm:$0xff] }
 0x1a3   :  { %v9824_v20 = vadd.f32 %v2391_v15, %v2349_v35  ;;  %4297 = vmatpush1.bf16.msra.mxu0 %v8726_v52  ;;  %v8607_v35 = vcombine.high %v128_v29, %v132_v30  ;;  %v324_v6 = vld [vmem:[#allocation2 + $0x7a8] sm:$0xff]  ;;  %v8582_v52 = vcombine.low %v104_v57, %v108_v19 }
 0x1a4   :  { %4298 = vmatprep.subr.bf16.mxu0 %v8719_v14  ;;  %v8575_v14 = vcombine.high %v96_v9, %v100_v10  ;;  %v312_v15 = vld [vmem:[#allocation2 + $0x748] sm:$0xff]  ;;  %v8798_v21 = vcombine.low %v320_v5, %v324_v6 }
 0x1a5   :  { %4192 = vmatpush2.bf16.msra.mxu1 %v8756_v13  ;;  %v8799_v13 = vcombine.high %v320_v5, %v324_v6  ;;  %v92_v18 = vld [vmem:[#allocation2 + $0x68] sm:$0xff] }
 0x1a6   :  { %4193 = vmatprep.subr.bf16.mxu1 %v8749_v61  ;;  %v316_v61 = vld [vmem:[#allocation2 + $0x768] sm:$0xff]  ;;  %v8566_v30 = vcombine.low %v88_v17, %v92_v18 }
 0x1a7   :  { %4299 = vmatpush1.bf16.msra.mxu0 %v8718_v23  ;;  %v8791_v23 = vcombine.high %v312_v15, %v316_v61  ;;  %v80_v27 = vld [vmem:[#allocation2 + $0x8] sm:$0xff]  ;;  %v8790_v29 = vcombine.low %v312_v15, %v316_v61 }
 0x1a8   :  { %4300 = vmatprep.subr.bf16.mxu0 %v8711_v25  ;;  %v304_v25 = vld [vmem:[#allocation2 + $0x708] sm:$0xff] }
 0x1a9   :  { %4194 = vmatpush2.bf16.msra.mxu1 %v8748_v24  ;;  %v8567_v24 = vcombine.high %v88_v17, %v92_v18  ;;  %v84_v28 = vld [vmem:[#allocation2 + $0x28] sm:$0xff]  ;;  %v137_v17 = vld [vmem:[#allocation2 + $0x1d0] sm:$0xff] }
 0x1aa   :  { %4249 = vmatprep.subr.bf16.mxu1 %v8615_v26  ;;  %v308_v26 = vld [vmem:[#allocation2 + $0x728] sm:$0xff]  ;;  %v8558_v39 = vcombine.low %v80_v27, %v84_v28  ;;  %v141_v18 = vld [vmem:[#allocation2 + $0x1f0] sm:$0xff] }
 0x1ab   :  { %4301 = vmatpush1.bf16.msra.mxu0 %v8710_v32  ;;  %v8783_v32 = vcombine.high %v304_v25, %v308_v26  ;;  %v200_v37 = vld [vmem:[#allocation2 + $0x3c8] sm:$0xff]  ;;  %v8782_v38 = vcombine.low %v304_v25, %v308_v26  ;;  %v8617_v25 = vcombine.high %v137_v17, %v141_v18 }
 0x1ac   :  { %4196 = vmatmul.mubr.bf16.vlgmr.msra.gmra.mxu1 %v9829_v31  ;;  %4302 = vmatprep.subr.bf16.mxu0 %v8703_v34  ;;  %v296_v34 = vld [vmem:[#allocation2 + $0x6c8] sm:$0xff] }
 0x1ad   :  { %4250 = vmatpush1.bf16.msra.mxu1 %v8614_v33  ;;  %4281 = vmatprep.mubr.bf16.mxu1 %v9781_v0  ;;  %v8559_v33 = vcombine.high %v80_v27, %v84_v28  ;;  %v204_v16 = vld [vmem:[#allocation2 + $0x3e8] sm:$0xff]  ;;  %v129_v28 = vld [vmem:[#allocation2 + $0x190] sm:$0xff] }
 0x1ae   :  { %4251 = vmatprep.subr.bf16.mxu1 %v8607_v35  ;;  %v300_v35 = vld [vmem:[#allocation2 + $0x6e8] sm:$0xff] }
 0x1af   :  { %4303 = vmatpush1.bf16.msra.mxu0 %v8702_v40  ;;  %v8775_v40 = vcombine.high %v296_v34, %v300_v35  ;;  %v192_v46 = vld [vmem:[#allocation2 + $0x388] sm:$0xff]  ;;  %v8774_v48 = vcombine.low %v296_v34, %v300_v35 }
 0x1b0   :  { %4304 = vmatprep.subr.bf16.mxu0 %v8695_v42  ;;  %v288_v42 = vld [vmem:[#allocation2 + $0x688] sm:$0xff] }
 0x1b1   :  { %4252 = vmatpush1.bf16.msra.mxu1 %v8606_v41  ;;  %v8679_v41 = vcombine.high %v200_v37, %v204_v16  ;;  %v196_v47 = vld [vmem:[#allocation2 + $0x3a8] sm:$0xff] }
 0x1b2   :  { %4253 = vmatprep.subr.bf16.mxu1 %v8599_v43  ;;  %v292_v43 = vld [vmem:[#allocation2 + $0x6a8] sm:$0xff] }
 0x1b3   :  { %4305 = vmatpush1.bf16.msra.mxu0 %v8694_v49  ;;  %v8678_v49 = vcombine.low %v200_v37, %v204_v16  ;;  %v284_v55 = vld [vmem:[#allocation2 + $0x668] sm:$0xff] }
 0x1b4   :  { %4306 = vmatprep.subr.bf16.mxu0 %v8687_v53  ;;  %v8671_v53 = vcombine.high %v192_v46, %v196_v47  ;;  %v184_v57 = vld [vmem:[#allocation2 + $0x348] sm:$0xff] }
 0x1b5   :  { %4254 = vmatpush1.bf16.msra.mxu1 %v8598_v51  ;;  %v8767_v51 = vcombine.high %v288_v42, %v292_v43  ;;  %v188_v19 = vld [vmem:[#allocation2 + $0x368] sm:$0xff] }
 0x1b6   :  { %4255 = vmatprep.subr.bf16.mxu1 %v8591_v54  ;;  %v280_v54 = vld [vmem:[#allocation2 + $0x648] sm:$0xff] }
 0x1b7   :  { %4307 = vmatpush1.bf16.msra.mxu0 %v8686_v1  ;;  %v8766_v1 = vcombine.low %v288_v42, %v292_v43  ;;  %v272_v5 = vld [vmem:[#allocation2 + $0x608] sm:$0xff] }
 0x1b8   :  { %4308 = vmatprep.subr.bf16.mxu0 %v8807_v3  ;;  %v8759_v3 = vcombine.high %v280_v54, %v284_v55  ;;  %v276_v6 = vld [vmem:[#allocation2 + $0x628] sm:$0xff] }
 0x1b9   :  { %4256 = vmatpush1.bf16.msra.mxu1 %v8590_v2  ;;  %v8670_v2 = vcombine.low %v192_v46, %v196_v47  ;;  %v176_v10 = vld [vmem:[#allocation2 + $0x308] sm:$0xff] }
 0x1ba   :  { %4257 = vmatprep.subr.bf16.mxu1 %v8583_v4  ;;  %v9833_v45 = vpop.f32.mrf.mxu0  ;;  %v8663_v4 = vcombine.high %v184_v57, %v188_v19 }
 0x1bb   :  { %4309 = vmatpush2.bf16.msra.mxu0 %v8806_v11  ;;  %v180_v11 = vld [vmem:[#allocation2 + $0x328] sm:$0xff] }
 0x1bc   :  { %4310 = vmatprep.subr.bf16.mxu0 %v8799_v13  ;;  %v9835_v56 = vpop.f32.mrf.mxu0  ;;  %v8662_v13 = vcombine.low %v184_v57, %v188_v19  ;;  %v8655_v15 = vcombine.high %v176_v10, %v180_v11 }
 0x1bd   :  { %4258 = vmatpush1.bf16.msra.mxu1 %v8582_v52  ;;  %v8758_v52 = vcombine.low %v280_v54, %v284_v55  ;;  %v113_v54 = vld [vmem:[#allocation2 + $0x110] sm:$0xff] }
 0x1be   :  { %4259 = vmatprep.subr.bf16.mxu1 %v8575_v14  ;;  %v9837_v9 = vpop.f32.mrf.mxu0  ;;  %v8751_v14 = vcombine.high %v272_v5, %v276_v6  ;;  %v117_v55 = vld [vmem:[#allocation2 + $0x130] sm:$0xff] }
 0x1bf   :  { %4311 = vmatpush2.bf16.msra.mxu0 %v8798_v21  ;;  %v168_v21 = vld [vmem:[#allocation2 + $0x2c8] sm:$0xff] }
 0x1c0   :  { %4312 = vmatprep.subr.bf16.mxu0 %v8791_v23  ;;  %v9839_v61 = vpop.f32.mrf.mxu0  ;;  %v8750_v23 = vcombine.low %v272_v5, %v276_v6  ;;  %v8593_v6 = vcombine.high %v113_v54, %v117_v55 }
 0x1c1   :  { %4260 = vmatpush1.bf16.msra.mxu1 %v8574_v22  ;;  %v172_v22 = vld [vmem:[#allocation2 + $0x2e8] sm:$0xff] }
 0x1c2   :  { %4261 = vmatprep.subr.bf16.mxu1 %v8567_v24  ;;  %v8654_v24 = vcombine.low %v176_v10, %v180_v11  ;;  %v8647_v26 = vcombine.high %v168_v21, %v172_v22  ;;  %v8646_v34 = vcombine.low %v168_v21, %v172_v22  ;;  %v8592_v21 = vcombine.low %v113_v54, %v117_v55  ;;  %v205_v54 = vld [vmem:[#allocation2 + $0x3f0] sm:$0xff] }
 0x1c3   :  { %4313 = vmatpush2.bf16.msra.mxu0 %v8790_v29  ;;  %v133_v29 = vld [vmem:[#allocation2 + $0x1b0] sm:$0xff] }
 0x1c4   :  { %4314 = vmatprep.subr.bf16.mxu0 %v8783_v32  ;;  %v164_v32 = vld [vmem:[#allocation2 + $0x2a8] sm:$0xff]  ;;  %v8609_v35 = vcombine.high %v129_v28, %v133_v29  ;;  %v8608_v43 = vcombine.low %v129_v28, %v133_v29  ;;  %v265_v55 = vld [vmem:[#allocation2 + $0x5d0] sm:$0xff] }
 0x1c5   :  { %4262 = vmatpush1.bf16.msra.mxu1 %v8566_v30  ;;  %v160_v30 = vld [vmem:[#allocation2 + $0x288] sm:$0xff] }
 0x1c6   :  { %4263 = vmatprep.subr.bf16.mxu1 %v8559_v33  ;;  %v8616_v33 = vcombine.low %v137_v17, %v141_v18  ;;  %v8639_v16 = vcombine.high %v160_v30, %v164_v32  ;;  %v8638_v47 = vcombine.low %v160_v30, %v164_v32  ;;  %v360_v17 = vld [vmem:[#allocation2 + $0x8c8] sm:$0xff] }
 0x1c7   :  { %4315 = vmatpush2.bf16.msra.mxu0 %v8782_v38  ;;  %v121_v38 = vld [vmem:[#allocation2 + $0x150] sm:$0xff]  ;;  %v364_v18 = vld [vmem:[#allocation2 + $0x8e8] sm:$0xff] }
 0x1c8   :  { %4316 = vmatprep.subr.bf16.mxu0 %v8775_v40  ;;  %v152_v40 = vld [vmem:[#allocation2 + $0x248] sm:$0xff]  ;;  %v8838_v29 = vcombine.low %v360_v17, %v364_v18 }
 0x1c9   :  { %4264 = vmatpush1.bf16.msra.mxu1 %v8558_v39  ;;  %v125_v39 = vld [vmem:[#allocation2 + $0x170] sm:$0xff]  ;;  %v356_v28 = vld [vmem:[#allocation2 + $0x8a8] sm:$0xff] }
 0x1ca   :  { %4265 = vmatprep.subr.bf16.mxu1 %v8679_v41  ;;  %v2514_v27 = vpop.f32.mrf.mxu0  ;;  %v156_v41 = vld [vmem:[#allocation2 + $0x268] sm:$0xff] }
 0x1cb   :  { %4317 = vmatpush2.bf16.msra.mxu0 %v8774_v48  ;;  %v8601_v48 = vcombine.high %v121_v38, %v125_v39 }
 0x1cc   :  { %4318 = vmatprep.subr.bf16.mxu0 %v8767_v51  ;;  %v2516_v37 = vpop.f32.mrf.mxu0 }
 0x1cd   :  { %4266 = vmatpush2.bf16.msra.mxu1 %v8678_v49 }
 0x1ce   :  { %4267 = vmatprep.subr.bf16.mxu1 %v8671_v53  ;;  %v2518_v51 = vpop.f32.mrf.mxu0  ;;  %v8631_v53 = vcombine.high %v152_v40, %v156_v41 }
 0x1cf   :  { %4319 = vmatpush2.bf16.msra.mxu0 %v8766_v1  ;;  %v144_v1 = vld [vmem:[#allocation2 + $0x208] sm:$0xff] }
 0x1d0   :  { %4320 = vmatprep.subr.bf16.mxu0 %v8759_v3  ;;  %v2520_v11 = vpop.f32.mrf.mxu0 }
 0x1d1   :  { %4268 = vmatpush2.bf16.msra.mxu1 %v8670_v2  ;;  %v148_v2 = vld [vmem:[#allocation2 + $0x228] sm:$0xff] }
 0x1d2   :  { %4269 = vmatprep.subr.bf16.mxu1 %v8663_v4  ;;  %v8622_v22 = vcombine.low %v144_v1, %v148_v2 }
 0x1d3   :  { %4321 = vmatpush2.bf16.msra.mxu0 %v8758_v52  ;;  %v8623_v52 = vcombine.high %v144_v1, %v148_v2 }
 0x1d4   :  { %4322 = vmatprep.subr.bf16.mxu0 %v8751_v14 }
 0x1d5   :  { %4270 = vmatpush2.bf16.msra.mxu1 %v8662_v13  ;;  %v109_v13 = vld [vmem:[#allocation2 + $0xf0] sm:$0xff] }
 0x1d6   :  { %4271 = vmatprep.subr.bf16.mxu1 %v8655_v15 }
 0x1d7   :  { %4323 = vmatpush2.bf16.msra.mxu0 %v8750_v23 }
 0x1d8   :  { %4378 = vmatprep.subr.bf16.mxu0 %v8617_v25  ;;  %v97_v25 = vld [vmem:[#allocation2 + $0x90] sm:$0xff] }
 0x1d9   :  { %4272 = vmatpush2.bf16.msra.mxu1 %v8654_v24  ;;  %v8839_v24 = vcombine.high %v360_v17, %v364_v18  ;;  %v189_v17 = vld [vmem:[#allocation2 + $0x370] sm:$0xff] }
 0x1da   :  { %4273 = vmatprep.subr.bf16.mxu1 %v8647_v26  ;;  %4325 = vmatmul.mubr.bf16.vlgmr.msra.gmra.mxu0 %v9829_v31  ;;  %v101_v26 = vld [vmem:[#allocation2 + $0xb0] sm:$0xff] }
 0x1db   :  { %4379 = vmatpush1.bf16.msra.mxu0 %v8616_v33  ;;  %4410 = vmatprep.mubr.bf16.mxu0 %v9781_v0  ;;  %v8630_v0 = vcombine.low %v152_v40, %v156_v41  ;;  %v8577_v30 = vcombine.high %v97_v25, %v101_v26  ;;  %v89_v33 = vld [vmem:[#allocation2 + $0x50] sm:$0xff] }
 0x1dc   :  { %v2471_v42 = vpop.f32.mrf.mxu1  ;;  %4380 = vmatprep.subr.bf16.mxu0 %v8609_v35  ;;  %v344_v35 = vld [vmem:[#allocation2 + $0x848] sm:$0xff]  ;;  %v81_v41 = vld [vmem:[#allocation2 + $0x10] sm:$0xff] }
 0x1dd   :  { %v2472_v46 = vadd.f32 %v2471_v42, %v9833_v45  ;;  %4274 = vmatpush2.bf16.msra.mxu1 %v8646_v34  ;;  %v8600_v45 = vcombine.low %v121_v38, %v125_v39  ;;  %v93_v34 = vld [vmem:[#allocation2 + $0x70] sm:$0xff] }
 0x1de   :  { %v2473_v49 = vpop.f32.mrf.mxu1  ;;  %4275 = vmatprep.subr.bf16.mxu1 %v8639_v16  ;;  %v8576_v16 = vcombine.low %v97_v25, %v101_v26  ;;  %v8569_v39 = vcombine.high %v89_v33, %v93_v34  ;;  %v85_v42 = vld [vmem:[#allocation2 + $0x30] sm:$0xff] }
 0x1df   :  { %v2474_v57 = vadd.f32 %v2473_v49, %v9835_v56  ;;  %v9845_v19 = vadd.f32 %v2514_v27, %v2472_v46  ;;  %4381 = vmatpush1.bf16.msra.mxu0 %v8608_v43  ;;  %v105_v56 = vld [vmem:[#allocation2 + $0xd0] sm:$0xff]  ;;  %v352_v27 = vld [vmem:[#allocation2 + $0x888] sm:$0xff]  ;;  %v8561_v49 = vcombine.high %v81_v41, %v85_v42  ;;  %v8560_v1 = vcombine.low %v81_v41, %v85_v42 }
 0x1e0   :  { %v2475_v3 = vpop.f32.mrf.mxu1  ;;  %4382 = vmatprep.subr.bf16.mxu0 %v8601_v48  ;;  %v8585_v23 = vcombine.high %v105_v56, %v109_v13  ;;  %v8831_v32 = vcombine.high %v352_v27, %v356_v28  ;;  %v8830_v38 = vcombine.low %v352_v27, %v356_v28  ;;  %v336_v43 = vld [vmem:[#allocation2 + $0x808] sm:$0xff]  ;;  %v249_v18 = vld [vmem:[#allocation2 + $0x550] sm:$0xff] }
 0x1e1   :  { %v2476_v4 = vadd.f32 %v2475_v3, %v9837_v9  ;;  %v9848_v5 = vadd.f32 %v2516_v37, %v2474_v57  ;;  %4276 = vmatpush2.bf16.msra.mxu1 %v8638_v47  ;;  %v348_v37 = vld [vmem:[#allocation2 + $0x868] sm:$0xff]  ;;  %v8568_v47 = vcombine.low %v89_v33, %v93_v34  ;;  %v269_v57 = vld [vmem:[#allocation2 + $0x5f0] sm:$0xff] }
 0x1e2   :  { %v2477_v10 = vpop.f32.mrf.mxu1  ;;  %4277 = vmatprep.subr.bf16.mxu1 %v8631_v53  ;;  %v8823_v40 = vcombine.high %v344_v35, %v348_v37  ;;  %v340_v46 = vld [vmem:[#allocation2 + $0x828] sm:$0xff]  ;;  %v8822_v48 = vcombine.low %v344_v35, %v348_v37  ;;  %v201_v53 = vld [vmem:[#allocation2 + $0x3d0] sm:$0xff] }
 0x1e3   :  { %v2478_v14 = vadd.f32 %v2477_v10, %v9839_v61  ;;  %v9851_v15 = vadd.f32 %v2518_v51, %v2476_v4  ;;  %4383 = vmatpush1.bf16.msra.mxu0 %v8600_v45  ;;  %v8584_v61 = vcombine.low %v105_v56, %v109_v13  ;;  %v8815_v51 = vcombine.high %v336_v43, %v340_v46  ;;  %v193_v45 = vld [vmem:[#allocation2 + $0x390] sm:$0xff] }
 0x1e4   :  { %4384 = vmatprep.subr.bf16.mxu0 %v8593_v6  ;;  %v8814_v2 = vcombine.low %v336_v43, %v340_v46  ;;  %v8681_v3 = vcombine.high %v201_v53, %v205_v54  ;;  %v197_v4 = vld [vmem:[#allocation2 + $0x3b0] sm:$0xff] }
 0x1e5   :  { %v9853_v9 = vadd.f32 %v2520_v11, %v2478_v14  ;;  %4278 = vmatpush2.bf16.msra.mxu1 %v8630_v0  ;;  %v8745_v0 = vcombine.high %v265_v55, %v269_v57  ;;  %v257_v6 = vld [vmem:[#allocation2 + $0x590] sm:$0xff]  ;;  %v8680_v11 = vcombine.low %v201_v53, %v205_v54  ;;  %v8673_v56 = vcombine.high %v193_v45, %v197_v4 }
 0x1e6   :  { %4279 = vmatprep.subr.bf16.mxu1 %v8623_v52  ;;  %v261_v10 = vld [vmem:[#allocation2 + $0x5b0] sm:$0xff]  ;;  %v8744_v52 = vcombine.low %v265_v55, %v269_v57 }
 0x1e7   :  { %4385 = vmatpush1.bf16.msra.mxu0 %v8592_v21  ;;  %v8737_v13 = vcombine.high %v257_v6, %v261_v10  ;;  %v185_v14 = vld [vmem:[#allocation2 + $0x350] sm:$0xff] }
 0x1e8   :  { %4386 = vmatprep.subr.bf16.mxu0 %v8585_v23  ;;  %v253_v21 = vld [vmem:[#allocation2 + $0x570] sm:$0xff]  ;;  %v8736_v23 = vcombine.low %v257_v6, %v261_v10 }
 0x1e9   :  { %4280 = vmatpush2.bf16.msra.mxu1 %v8622_v22  ;;  %v8672_v22 = vcombine.low %v193_v45, %v197_v4  ;;  %v8729_v25 = vcombine.high %v249_v18, %v253_v21  ;;  %v177_v26 = vld [vmem:[#allocation2 + $0x310] sm:$0xff] }
 0x1ea   :  { %4343 = vmatprep.subr.bf16.mxu1 %v8839_v24  ;;  %v8665_v24 = vcombine.high %v185_v14, %v189_v17  ;;  %v181_v27 = vld [vmem:[#allocation2 + $0x330] sm:$0xff] }
 0x1eb   :  { %4387 = vmatpush1.bf16.msra.mxu0 %v8584_v61  ;;  %v241_v28 = vld [vmem:[#allocation2 + $0x510] sm:$0xff] }
 0x1ec   :  { %4282 = vmatmul.mubr.bf16.vlgmr.msra.gmra.mxu1 %v9806_v60  ;;  %4388 = vmatprep.subr.bf16.mxu0 %v8577_v30  ;;  %v245_v61 = vld [vmem:[#allocation2 + $0x530] sm:$0xff]  ;;  %v8728_v30 = vcombine.low %v249_v18, %v253_v21 }
 0x1ed   :  { %4344 = vmatpush1.bf16.msra.mxu1 %v8838_v29  ;;  %4367 = vmatprep.mubr.bf16.mxu1 %v9686_v36  ;;  %v8664_v29 = vcombine.low %v185_v14, %v189_v17  ;;  %v8721_v33 = vcombine.high %v241_v28, %v245_v61  ;;  %v169_v34 = vld [vmem:[#allocation2 + $0x2d0] sm:$0xff] }
 0x1ee   :  { %4345 = vmatprep.subr.bf16.mxu1 %v8831_v32  ;;  %v8657_v32 = vcombine.high %v177_v26, %v181_v27  ;;  %v173_v35 = vld [vmem:[#allocation2 + $0x2f0] sm:$0xff] }
 0x1ef   :  { %4389 = vmatpush1.bf16.msra.mxu0 %v8576_v16  ;;  %v233_v37 = vld [vmem:[#allocation2 + $0x4d0] sm:$0xff] }
 0x1f0   :  { %4390 = vmatprep.subr.bf16.mxu0 %v8569_v39  ;;  %v237_v16 = vld [vmem:[#allocation2 + $0x4f0] sm:$0xff]  ;;  %v8720_v39 = vcombine.low %v241_v28, %v245_v61 }
 0x1f1   :  { %4346 = vmatpush1.bf16.msra.mxu1 %v8830_v38  ;;  %v8656_v38 = vcombine.low %v177_v26, %v181_v27  ;;  %v161_v41 = vld [vmem:[#allocation2 + $0x290] sm:$0xff] }
 0x1f2   :  { %4347 = vmatprep.subr.bf16.mxu1 %v8823_v40  ;;  %v8713_v40 = vcombine.high %v233_v37, %v237_v16  ;;  %v165_v42 = vld [vmem:[#allocation2 + $0x2b0] sm:$0xff] }
 0x1f3   :  { %4391 = vmatpush1.bf16.msra.mxu0 %v8568_v47  ;;  %v225_v43 = vld [vmem:[#allocation2 + $0x490] sm:$0xff]  ;;  %v8648_v47 = vcombine.low %v169_v34, %v173_v35 }
 0x1f4   :  { %4392 = vmatprep.subr.bf16.mxu0 %v8561_v49  ;;  %v229_v46 = vld [vmem:[#allocation2 + $0x4b0] sm:$0xff]  ;;  %v8641_v49 = vcombine.high %v161_v41, %v165_v42 }
 0x1f5   :  { %4348 = vmatpush1.bf16.msra.mxu1 %v8822_v48  ;;  %v8712_v48 = vcombine.low %v233_v37, %v237_v16  ;;  %v153_v53 = vld [vmem:[#allocation2 + $0x250] sm:$0xff] }
 0x1f6   :  { %4349 = vmatprep.subr.bf16.mxu1 %v8815_v51  ;;  %v8705_v51 = vcombine.high %v225_v43, %v229_v46  ;;  %v157_v54 = vld [vmem:[#allocation2 + $0x270] sm:$0xff] }
 0x1f7   :  { %4393 = vmatpush1.bf16.msra.mxu0 %v8560_v1  ;;  %v217_v55 = vld [vmem:[#allocation2 + $0x450] sm:$0xff]  ;;  %v8640_v1 = vcombine.low %v161_v41, %v165_v42 }
 0x1f8   :  { %4394 = vmatprep.subr.bf16.mxu0 %v8681_v3  ;;  %v221_v57 = vld [vmem:[#allocation2 + $0x470] sm:$0xff]  ;;  %v8633_v3 = vcombine.high %v153_v53, %v157_v54 }
 0x1f9   :  { %4350 = vmatpush1.bf16.msra.mxu1 %v8814_v2  ;;  %v8704_v2 = vcombine.low %v225_v43, %v229_v46  ;;  %v145_v45 = vld [vmem:[#allocation2 + $0x210] sm:$0xff] }
 0x1fa   :  { %4421 = vmatprep.subr.bf16.mxu1 %v8745_v0  ;;  %v8697_v0 = vcombine.high %v217_v55, %v221_v57  ;;  %v149_v4 = vld [vmem:[#allocation2 + $0x230] sm:$0xff] }
 0x1fb   :  { %4395 = vmatpush2.bf16.msra.mxu0 %v8680_v11  ;;  %v209_v6 = vld [vmem:[#allocation2 + $0x410] sm:$0xff]  ;;  %v8632_v11 = vcombine.low %v153_v53, %v157_v54 }
 0x1fc   :  { %8845 = vmatmul.mubr.msk.bf16.vlgmr.msra.gmra.mxu1 %vm2132_vm0, %v9813_v44  ;;  %4396 = vmatprep.subr.bf16.mxu0 %v8673_v56  ;;  %v213_v10 = vld [vmem:[#allocation2 + $0x430] sm:$0xff]  ;;  %v8625_v56 = vcombine.high %v145_v45, %v149_v4 }
 0x1fd   :  { %4422 = vmatpush1.bf16.msra.mxu1 %v8744_v52  ;;  %4453 = vmatprep.mubr.bf16.mxu1 %v9798_v59  ;;  %v8649_v59 = vcombine.high %v169_v34, %v173_v35  ;;  %v8696_v52 = vcombine.low %v217_v55, %v221_v57  ;;  %v361_v14 = vld [vmem:[#allocation2 + $0x8d0] sm:$0xff] }
 0x1fe   :  { %4423 = vmatprep.subr.bf16.mxu1 %v8737_v13  ;;  %v8689_v13 = vcombine.high %v209_v6, %v213_v10  ;;  %v365_v17 = vld [vmem:[#allocation2 + $0x8f0] sm:$0xff] }
 0x1ff   :  { %4397 = vmatpush2.bf16.msra.mxu0 %v8672_v22  ;;  %v329_v18 = vld [vmem:[#allocation2 + $0x7d0] sm:$0xff]  ;;  %v8624_v22 = vcombine.low %v145_v45, %v149_v4 }
 0x200   :  { %4398 = vmatprep.subr.bf16.mxu0 %v8665_v24  ;;  %v333_v21 = vld [vmem:[#allocation2 + $0x7f0] sm:$0xff]  ;;  %v8688_v24 = vcombine.low %v209_v6, %v213_v10  ;;  %v266_v6 = vld [vmem:[#allocation2 + $0x5d8] sm:$0xff] }
 0x201   :  { %4424 = vmatpush1.bf16.msra.mxu1 %v8736_v23  ;;  %v8809_v26 = vcombine.high %v329_v18, %v333_v21  ;;  %v353_v27 = vld [vmem:[#allocation2 + $0x890] sm:$0xff]  ;;  %v270_v10 = vld [vmem:[#allocation2 + $0x5f8] sm:$0xff] }
 0x202   :  { %4425 = vmatprep.subr.bf16.mxu1 %v8729_v25  ;;  %v8841_v25 = vcombine.high %v361_v14, %v365_v17  ;;  %v357_v28 = vld [vmem:[#allocation2 + $0x8b0] sm:$0xff] }
 0x203   :  { %4399 = vmatpush2.bf16.msra.mxu0 %v8664_v29  ;;  %v321_v61 = vld [vmem:[#allocation2 + $0x790] sm:$0xff]  ;;  %v8833_v34 = vcombine.high %v353_v27, %v357_v28  ;;  %v8832_v41 = vcombine.low %v353_v27, %v357_v28 }
 0x204   :  { %4400 = vmatprep.subr.bf16.mxu0 %v8657_v32  ;;  %v325_v29 = vld [vmem:[#allocation2 + $0x7b0] sm:$0xff]  ;;  %v8840_v32 = vcombine.low %v361_v14, %v365_v17  ;;  %v8747_v17 = vcombine.high %v266_v6, %v270_v10 }
 0x205   :  { %4426 = vmatpush1.bf16.msra.mxu1 %v8728_v30  ;;  %v8801_v35 = vcombine.high %v321_v61, %v325_v29  ;;  %v345_v37 = vld [vmem:[#allocation2 + $0x850] sm:$0xff]  ;;  %v8800_v43 = vcombine.low %v321_v61, %v325_v29  ;;  %v250_v61 = vld [vmem:[#allocation2 + $0x558] sm:$0xff] }
 0x206   :  { %4427 = vmatprep.subr.bf16.mxu1 %v8721_v33  ;;  %v8808_v33 = vcombine.low %v329_v18, %v333_v21  ;;  %v349_v16 = vld [vmem:[#allocation2 + $0x870] sm:$0xff]  ;;  %v258_v21 = vld [vmem:[#allocation2 + $0x598] sm:$0xff] }
 0x207   :  { %4401 = vmatpush2.bf16.msra.mxu0 %v8656_v38  ;;  %v313_v38 = vld [vmem:[#allocation2 + $0x750] sm:$0xff]  ;;  %v8825_v46 = vcombine.high %v345_v37, %v349_v16  ;;  %v254_v29 = vld [vmem:[#allocation2 + $0x578] sm:$0xff] }
 0x208   :  { %4402 = vmatprep.subr.bf16.mxu0 %v8649_v59  ;;  %v309_v54 = vld [vmem:[#allocation2 + $0x730] sm:$0xff] }
 0x209   :  { %4428 = vmatpush1.bf16.msra.mxu1 %v8720_v39  ;;  %v317_v39 = vld [vmem:[#allocation2 + $0x770] sm:$0xff] }
 0x20a   :  { %4429 = vmatprep.subr.bf16.mxu1 %v8713_v40  ;;  %v2600_v23 = vpop.f32.mrf.mxu0 }
 0x20b   :  { %4403 = vmatpush2.bf16.msra.mxu0 %v8648_v47 }
 0x20c   :  { %4404 = vmatprep.subr.bf16.mxu0 %v8641_v49  ;;  %v2602_v30 = vpop.f32.mrf.mxu0  ;;  %v337_v49 = vld [vmem:[#allocation2 + $0x810] sm:$0xff] }
 0x20d   :  { %4430 = vmatpush1.bf16.msra.mxu1 %v8712_v48  ;;  %v8793_v48 = vcombine.high %v313_v38, %v317_v39 }
 0x20e   :  { %4431 = vmatprep.subr.bf16.mxu1 %v8705_v51  ;;  %v2604_v40 = vpop.f32.mrf.mxu0  ;;  %v341_v51 = vld [vmem:[#allocation2 + $0x830] sm:$0xff] }
 0x20f   :  { %4405 = vmatpush2.bf16.msra.mxu0 %v8640_v1  ;;  %v8824_v1 = vcombine.low %v345_v37, %v349_v16 }
 0x210   :  { %4406 = vmatprep.subr.bf16.mxu0 %v8633_v3  ;;  %v2606_v57 = vpop.f32.mrf.mxu0  ;;  %v8792_v3 = vcombine.low %v313_v38, %v317_v39  ;;  %v8731_v38 = vcombine.high %v250_v61, %v254_v29 }
 0x211   :  { %4432 = vmatpush1.bf16.msra.mxu1 %v8704_v2 }
 0x212   :  { %4433 = vmatprep.subr.bf16.mxu1 %v8697_v0  ;;  %v8817_v0 = vcombine.high %v337_v49, %v341_v51 }
 0x213   :  { %4407 = vmatpush2.bf16.msra.mxu0 %v8632_v11 }
 0x214   :  { %4408 = vmatprep.subr.bf16.mxu0 %v8625_v56  ;;  %v301_v56 = vld [vmem:[#allocation2 + $0x6f0] sm:$0xff] }
 0x215   :  { %4434 = vmatpush1.bf16.msra.mxu1 %v8696_v52  ;;  %v297_v52 = vld [vmem:[#allocation2 + $0x6d0] sm:$0xff] }
 0x216   :  { %4435 = vmatprep.subr.bf16.mxu1 %v8689_v13  ;;  %v8816_v13 = vcombine.low %v337_v49, %v341_v51  ;;  %v8777_v18 = vcombine.high %v297_v52, %v301_v56 }
 0x217   :  { %4409 = vmatpush2.bf16.msra.mxu0 %v8624_v22  ;;  %v262_v22 = vld [vmem:[#allocation2 + $0x5b8] sm:$0xff] }
 0x218   :  { %4472 = vmatprep.subr.bf16.mxu0 %v8841_v25  ;;  %v8746_v25 = vcombine.low %v266_v6, %v270_v10  ;;  %v8739_v27 = vcombine.high %v258_v21, %v262_v22  ;;  %v226_v6 = vld [vmem:[#allocation2 + $0x498] sm:$0xff] }
 0x219   :  { %4436 = vmatpush1.bf16.msra.mxu1 %v8688_v24  ;;  %v293_v24 = vld [vmem:[#allocation2 + $0x6b0] sm:$0xff]  ;;  %v230_v10 = vld [vmem:[#allocation2 + $0x4b8] sm:$0xff] }
 0x21a   :  { %4437 = vmatprep.subr.bf16.mxu1 %v8809_v26  ;;  %4411 = vmatmul.mubr.bf16.vlgmr.msra.gmra.mxu0 %v9806_v60  ;;  %v305_v60 = vld [vmem:[#allocation2 + $0x710] sm:$0xff]  ;;  %v8776_v26 = vcombine.low %v297_v52, %v301_v56  ;;  %v130_v52 = vld [vmem:[#allocation2 + $0x198] sm:$0xff] }
 0x21b   :  { %4473 = vmatpush1.bf16.msra.mxu0 %v8840_v32  ;;  %4496 = vmatprep.mubr.bf16.mxu0 %v9686_v36  ;;  %v8785_v4 = vcombine.high %v305_v60, %v309_v54  ;;  %v8784_v14 = vcombine.low %v305_v60, %v309_v54  ;;  %v285_v32 = vld [vmem:[#allocation2 + $0x670] sm:$0xff]  ;;  %v134_v56 = vld [vmem:[#allocation2 + $0x1b8] sm:$0xff] }
 0x21c   :  { %v2557_v59 = vpop.f32.mrf.mxu1  ;;  %4474 = vmatprep.subr.bf16.mxu0 %v8833_v34  ;;  %v8738_v34 = vcombine.low %v258_v21, %v262_v22  ;;  %v222_v21 = vld [vmem:[#allocation2 + $0x478] sm:$0xff] }
 0x21d   :  { %v2601_v42 = vadd.f32 %v2600_v23, %v2557_v59  ;;  %4438 = vmatpush2.bf16.msra.mxu1 %v8808_v33  ;;  %v289_v23 = vld [vmem:[#allocation2 + $0x690] sm:$0xff]  ;;  %v122_v22 = vld [vmem:[#allocation2 + $0x158] sm:$0xff] }
 0x21e   :  { %v2559_v47 = vpop.f32.mrf.mxu1  ;;  %4439 = vmatprep.subr.bf16.mxu1 %v8801_v35  ;;  %v8769_v28 = vcombine.high %v289_v23, %v293_v24  ;;  %v9565_v35 = vld [vmem:[%s10204_s0 + $0xc] ss:$20 sps:$4 sm:$0x7f]   ;;  %v8768_v16 = vcombine.low %v289_v23, %v293_v24  ;;  %v126_v23 = vld [vmem:[#allocation2 + $0x178] sm:$0xff]  ;;  %v8706_v24 = vcombine.low %v226_v6, %v230_v10 }
 0x21f   :  { %v2603_v53 = vadd.f32 %v2602_v30, %v2559_v47  ;;  %4475 = vmatpush1.bf16.msra.mxu0 %v8832_v41  ;;  %v281_v30 = vld [vmem:[#allocation2 + $0x650] sm:$0xff]  ;;  %v246_v41 = vld [vmem:[#allocation2 + $0x538] sm:$0xff] }
 0x220   :  { %v2561_v55 = vpop.f32.mrf.mxu1  ;;  %4476 = vmatprep.subr.bf16.mxu0 %v8825_v46  ;;  %v8761_v59 = vcombine.high %v281_v30, %v285_v32  ;;  %v277_v46 = vld [vmem:[#allocation2 + $0x630] sm:$0xff] }
 0x221   :  { %v2605_v2 = vadd.f32 %v2604_v40, %v2561_v55  ;;  %4440 = vmatpush2.bf16.msra.mxu1 %v8800_v43  ;;  %v242_v40 = vld [vmem:[#allocation2 + $0x518] sm:$0xff]  ;;  %v273_v43 = vld [vmem:[#allocation2 + $0x610] sm:$0xff] }
 0x222   :  { %v2563_v45 = vpop.f32.mrf.mxu1  ;;  %4441 = vmatprep.subr.bf16.mxu1 %v8793_v48  ;;  %v8730_v48 = vcombine.low %v250_v61, %v254_v29  ;;  %v8723_v51 = vcombine.high %v242_v40, %v246_v41  ;;  %v8753_v54 = vcombine.high %v273_v43, %v277_v46  ;;  %v234_v55 = vld [vmem:[#allocation2 + $0x4d8] sm:$0xff] }
 0x223   :  { %v2607_v11 = vadd.f32 %v2606_v57, %v2563_v45  ;;  %4477 = vmatpush1.bf16.msra.mxu0 %v8824_v1  ;;  %v238_v57 = vld [vmem:[#allocation2 + $0x4f8] sm:$0xff]  ;;  %v8752_v45 = vcombine.low %v273_v43, %v277_v46 }
 0x224   :  { %4478 = vmatprep.subr.bf16.mxu0 %v8817_v0  ;;  %v8722_v0 = vcombine.low %v242_v40, %v246_v41  ;;  %v214_v61 = vld [vmem:[#allocation2 + $0x438] sm:$0xff] }
 0x225   :  { %4442 = vmatpush2.bf16.msra.mxu1 %v8792_v3  ;;  %v142_v3 = vld [vmem:[#allocation2 + $0x1f8] sm:$0xff] }
 0x226   :  { %4443 = vmatprep.subr.bf16.mxu1 %v8785_v4  ;;  %v9566_v29 = vld [vmem:[%s10204_s0 + $0x4] ss:$20 sps:$4 sm:$0x7f]  }
 0x227   :  { %4479 = vmatpush1.bf16.msra.mxu0 %v8816_v13  ;;  %v8714_v13 = vcombine.low %v234_v55, %v238_v57 }
 0x228   :  { %4550 = vmatprep.subr.bf16.mxu0 %v8747_v17  ;;  %v8611_v17 = vcombine.high %v130_v52, %v134_v56 }
 0x229   :  { %4444 = vmatpush2.bf16.msra.mxu1 %v8784_v14 }
 0x22a   :  { %4445 = vmatprep.subr.bf16.mxu1 %v8777_v18  ;;  %8846 = vmatmul.mubr.msk.bf16.vlgmr.msra.gmra.mxu0 %vm2132_vm0, %v9813_v44  ;;  %v218_v18 = vld [vmem:[#allocation2 + $0x458] sm:$0xff] }
 0x22b   :  { %4551 = vmatpush1.bf16.msra.mxu0 %v8746_v25  ;;  %4582 = vmatprep.mubr.bf16.mxu0 %v9565_v35  ;;  %v8610_v25 = vcombine.low %v130_v52, %v134_v56 }
 0x22c   :  { %v2643_v33 = vpop.f32.mrf.mxu1  ;;  %4552 = vmatprep.subr.bf16.mxu0 %v8739_v27  ;;  %v8603_v27 = vcombine.high %v122_v22, %v126_v23 }
 0x22d   :  { %v9867_v37 = vadd.f32 %v2643_v33, %v2601_v42  ;;  %4446 = vmatpush2.bf16.msra.mxu1 %v8776_v26  ;;  %v8760_v42 = vcombine.low %v281_v30, %v285_v32  ;;  %v8699_v26 = vcombine.high %v218_v18, %v222_v21  ;;  %v114_v30 = vld [vmem:[#allocation2 + $0x118] sm:$0xff]  ;;  %v8698_v33 = vcombine.low %v218_v18, %v222_v21 }
 0x22e   :  { %v2645_v39 = vpop.f32.mrf.mxu1  ;;  %4447 = vmatprep.subr.bf16.mxu1 %v8769_v28  ;;  %v210_v28 = vld [vmem:[#allocation2 + $0x418] sm:$0xff] }
 0x22f   :  { %v9869_v44 = vadd.f32 %v2645_v39, %v2603_v53  ;;  %4553 = vmatpush1.bf16.msra.mxu0 %v8738_v34  ;;  %v138_v53 = vld [vmem:[#allocation2 + $0x1d8] sm:$0xff]  ;;  %v8691_v34 = vcombine.high %v210_v28, %v214_v61  ;;  %v8690_v40 = vcombine.low %v210_v28, %v214_v61 }
 0x230   :  { %v2647_v47 = vpop.f32.mrf.mxu1  ;;  %4554 = vmatprep.subr.bf16.mxu0 %v8731_v38  ;;  %v8619_v4 = vcombine.high %v138_v53, %v142_v3  ;;  %v8618_v14 = vcombine.low %v138_v53, %v142_v3  ;;  %v118_v32 = vld [vmem:[#allocation2 + $0x138] sm:$0xff] }
 0x231   :  { %v9871_v49 = vadd.f32 %v2647_v47, %v2605_v2  ;;  %4448 = vmatpush2.bf16.msra.mxu1 %v8768_v16  ;;  %v8715_v2 = vcombine.high %v234_v55, %v238_v57  ;;  %v8595_v35 = vcombine.high %v114_v30, %v118_v32  ;;  %v330_v16 = vld [vmem:[#allocation2 + $0x7d8] sm:$0xff]  ;;  %v8594_v41 = vcombine.low %v114_v30, %v118_v32 }
 0x232   :  { %v2649_v60 = vpop.f32.mrf.mxu1  ;;  %4449 = vmatprep.subr.bf16.mxu1 %v8761_v59  ;;  %v334_v38 = vld [vmem:[#allocation2 + $0x7f8] sm:$0xff] }
 0x233   :  { %v9873_v1 = vadd.f32 %v2649_v60, %v2607_v11  ;;  %4555 = vmatpush1.bf16.msra.mxu0 %v8730_v48  ;;  %v8707_v11 = vcombine.high %v226_v6, %v230_v10  ;;  %v106_v39 = vld [vmem:[#allocation2 + $0xd8] sm:$0xff]  ;;  %v8811_v43 = vcombine.high %v330_v16, %v334_v38  ;;  %v8810_v60 = vcombine.low %v330_v16, %v334_v38 }
 0x234   :  { %4556 = vmatprep.subr.bf16.mxu0 %v8723_v51  ;;  %v110_v59 = vld [vmem:[#allocation2 + $0xf8] sm:$0xff] }
 0x235   :  { %4450 = vmatpush2.bf16.msra.mxu1 %v8760_v42  ;;  %v8587_v46 = vcombine.high %v106_v39, %v110_v59  ;;  %v322_v47 = vld [vmem:[#allocation2 + $0x798] sm:$0xff] }
 0x236   :  { %4451 = vmatprep.subr.bf16.mxu1 %v8753_v54  ;;  %v326_v48 = vld [vmem:[#allocation2 + $0x7b8] sm:$0xff]  ;;  %v8586_v54 = vcombine.low %v106_v39, %v110_v59 }
 0x237   :  { %4557 = vmatpush1.bf16.msra.mxu0 %v8722_v0  ;;  %v98_v42 = vld [vmem:[#allocation2 + $0x98] sm:$0xff]  ;;  %v8803_v55 = vcombine.high %v322_v47, %v326_v48  ;;  %v8802_v6 = vcombine.low %v322_v47, %v326_v48 }
 0x238   :  { %4558 = vmatprep.subr.bf16.mxu0 %v8715_v2  ;;  %v102_v51 = vld [vmem:[#allocation2 + $0xb8] sm:$0xff] }
 0x239   :  { %4452 = vmatpush2.bf16.msra.mxu1 %v8752_v45  ;;  %v8579_v57 = vcombine.high %v98_v42, %v102_v51  ;;  %v314_v53 = vld [vmem:[#allocation2 + $0x758] sm:$0xff]  ;;  %v8578_v52 = vcombine.low %v98_v42, %v102_v51 }
 0x23a   :  { %4507 = vmatprep.subr.bf16.mxu1 %v8619_v4  ;;  %v318_v3 = vld [vmem:[#allocation2 + $0x778] sm:$0xff] }
 0x23b   :  { %4559 = vmatpush1.bf16.msra.mxu0 %v8714_v13  ;;  %v90_v45 = vld [vmem:[#allocation2 + $0x58] sm:$0xff]  ;;  %v8795_v56 = vcombine.high %v314_v53, %v318_v3 }
 0x23c   :  { %4454 = vmatmul.mubr.bf16.vlgmr.msra.gmra.mxu1 %v9829_v31  ;;  %4560 = vmatprep.subr.bf16.mxu0 %v8707_v11  ;;  %v8602_v31 = vcombine.low %v122_v22, %v126_v23  ;;  %v94_v2 = vld [vmem:[#allocation2 + $0x78] sm:$0xff]  ;;  %v8794_v23 = vcombine.low %v314_v53, %v318_v3 }
 0x23d   :  { %4508 = vmatpush1.bf16.msra.mxu1 %v8618_v14  ;;  %4539 = vmatprep.mubr.bf16.mxu1 %v9566_v29  ;;  %v8571_v14 = vcombine.high %v90_v45, %v94_v2  ;;  %v306_v11 = vld [vmem:[#allocation2 + $0x718] sm:$0xff] }
 0x23e   :  { %4509 = vmatprep.subr.bf16.mxu1 %v8611_v17  ;;  %v310_v17 = vld [vmem:[#allocation2 + $0x738] sm:$0xff] }
 0x23f   :  { %4561 = vmatpush1.bf16.msra.mxu0 %v8706_v24  ;;  %v82_v21 = vld [vmem:[#allocation2 + $0x18] sm:$0xff]  ;;  %v8786_v32 = vcombine.low %v306_v11, %v310_v17 }
 0x240   :  { %4562 = vmatprep.subr.bf16.mxu0 %v8699_v26  ;;  %v86_v22 = vld [vmem:[#allocation2 + $0x38] sm:$0xff]  ;;  %v8787_v26 = vcombine.high %v306_v11, %v310_v17 }
 0x241   :  { %4510 = vmatpush1.bf16.msra.mxu1 %v8610_v25  ;;  %v8570_v25 = vcombine.low %v90_v45, %v94_v2  ;;  %v298_v28 = vld [vmem:[#allocation2 + $0x6d8] sm:$0xff] }
 0x242   :  { %4511 = vmatprep.subr.bf16.mxu1 %v8603_v27  ;;  %v8563_v27 = vcombine.high %v82_v21, %v86_v22  ;;  %v302_v61 = vld [vmem:[#allocation2 + $0x6f8] sm:$0xff] }
 0x243   :  { %4563 = vmatpush1.bf16.msra.mxu0 %v8698_v33  ;;  %v202_v29 = vld [vmem:[#allocation2 + $0x3d8] sm:$0xff]  ;;  %v8779_v33 = vcombine.high %v298_v28, %v302_v61 }
 0x244   :  { %4564 = vmatprep.subr.bf16.mxu0 %v8691_v34  ;;  %v206_v30 = vld [vmem:[#allocation2 + $0x3f8] sm:$0xff] }
 0x245   :  { %4512 = vmatpush1.bf16.msra.mxu1 %v8602_v31  ;;  %v8683_v31 = vcombine.high %v202_v29, %v206_v30  ;;  %v290_v34 = vld [vmem:[#allocation2 + $0x698] sm:$0xff]  ;;  %v8682_v39 = vcombine.low %v202_v29, %v206_v30 }
 0x246   :  { %4513 = vmatprep.subr.bf16.mxu1 %v8595_v35  ;;  %v294_v35 = vld [vmem:[#allocation2 + $0x6b8] sm:$0xff] }
 0x247   :  { %4565 = vmatpush1.bf16.msra.mxu0 %v8690_v40  ;;  %v194_v16 = vld [vmem:[#allocation2 + $0x398] sm:$0xff]  ;;  %v8771_v59 = vcombine.high %v290_v34, %v294_v35  ;;  %v8770_v48 = vcombine.low %v290_v34, %v294_v35  ;;  %v4686_v35 = vld [vmem:[#allocation2 + $0x1340] sm:$0xff] }
 0x248   :  { %4566 = vmatprep.subr.bf16.mxu0 %v8811_v43  ;;  %v198_v38 = vld [vmem:[#allocation2 + $0x3b8] sm:$0xff] }
 0x249   :  { %4514 = vmatpush1.bf16.msra.mxu1 %v8594_v41  ;;  %v8675_v40 = vcombine.high %v194_v16, %v198_v38  ;;  %v282_v41 = vld [vmem:[#allocation2 + $0x658] sm:$0xff]  ;;  %v8674_v42 = vcombine.low %v194_v16, %v198_v38  ;;  %v4690_v16 = vld [vmem:[#allocation2 + $0x1360] sm:$0xff] }
 0x24a   :  { %4515 = vmatprep.subr.bf16.mxu1 %v8587_v46  ;;  %v4154_v0 = vpop.f32.mrf.mxu0  ;;  %v286_v43 = vld [vmem:[#allocation2 + $0x678] sm:$0xff] }
 0x24b   :  { %v9880_v4 = vadd.f32 %v4154_v0, %v9785_v50  ;;  %4567 = vmatpush2.bf16.msra.mxu0 %v8810_v60  ;;  %v186_v46 = vld [vmem:[#allocation2 + $0x358] sm:$0xff]  ;;  %v8763_v51 = vcombine.high %v282_v41, %v286_v43  ;;  %v8762_v0 = vcombine.low %v282_v41, %v286_v43 }
 0x24c   :  { %v4156_v10 = vpop.f32.mrf.mxu0  ;;  %4568 = vmatprep.subr.bf16.mxu0 %v8803_v55  ;;  %v190_v47 = vld [vmem:[#allocation2 + $0x378] sm:$0xff] }
 0x24d   :  { %4516 = vmatpush1.bf16.msra.mxu1 %v8586_v54  ;;  %v9883_v13 = vadd.f32 %v4156_v10, %v9787_v58  ;;  %v8667_v60 = vcombine.high %v186_v46, %v190_v47  ;;  %v274_v54 = vld [vmem:[#allocation2 + $0x618] sm:$0xff]  ;;  %v8666_v45 = vcombine.low %v186_v46, %v190_v47  ;;  %v8899_v46 = vcombine.high %v4686_v35, %v4690_v16 }
 0x24e   :  { %4517 = vmatprep.subr.bf16.mxu1 %v8579_v57  ;;  %v4158_v18 = vpop.f32.mrf.mxu0  ;;  %v278_v55 = vld [vmem:[#allocation2 + $0x638] sm:$0xff]  ;;  %v9894_v57 = vld [vmem:[%s10204_s0 + $0x28] sm:$0x11] }
 0x24f   :  { %v9886_v50 = vadd.f32 %v4158_v18, %v9789_v63  ;;  %4569 = vmatpush2.bf16.msra.mxu0 %v8802_v6  ;;  %v8562_v63 = vcombine.low %v82_v21, %v86_v22  ;;  %v178_v53 = vld [vmem:[#allocation2 + $0x318] sm:$0xff]  ;;  %v8755_v2 = vcombine.high %v274_v54, %v278_v55  ;;  %v8854_v10 = vcombine.high %v9894_v57, %v9894_v57 }
 0x250   :  { %v4160_v24 = vpop.f32.mrf.mxu0  ;;  %4570 = vmatprep.subr.bf16.mxu0 %v8795_v56  ;;  %v182_v3 = vld [vmem:[#allocation2 + $0x338] sm:$0xff]  ;;  %v4702_v56 = vld [vmem:[#allocation2 + $0x13c0] sm:$0xff]  ;;  %v8754_v18 = vcombine.low %v274_v54, %v278_v55 }
 0x251   :  { %4518 = vmatpush1.bf16.msra.mxu1 %v8578_v52  ;;  %v9889_v58 = vadd.f32 %v4160_v24, %v9791_v7  ;;  %v8778_v7 = vcombine.low %v298_v28, %v302_v61  ;;  %v9441_v6 = vld [vmem:[%s10204_s0 + $0x4] ss:$20 sps:$4 sm:$0xfc]   ;;  %v8659_v52 = vcombine.high %v178_v53, %v182_v3  ;;  %v8658_v21 = vcombine.low %v178_v53, %v182_v3 }
 0x252   :  { %4519 = vmatprep.subr.bf16.mxu1 %v8571_v14  ;;  %v4706_v14 = vld [vmem:[#allocation2 + $0x13e0] sm:$0xff]  ;;  %v170_v11 = vld [vmem:[#allocation2 + $0x2d8] sm:$0xff]  ;;  %v4973_v24 = vrot.slane %v8854_v10, 2 }
 0x253   :  { %4571 = vmatpush2.bf16.msra.mxu0 %v8794_v23  ;;  %v174_v17 = vld [vmem:[#allocation2 + $0x2f8] sm:$0xff]  ;;  %v8915_v22 = vcombine.high %v4702_v56, %v4706_v14  ;;  %v4972_v23 = vrot.slane %v9441_v6, 2  ;;  %v4698_v28 = vld [vmem:[#allocation2 + $0x13a0] sm:$0xff]  ;;  %v8914_v30 = vcombine.low %v4702_v56, %v4706_v14 }
 0x254   :  { %4572 = vmatprep.subr.bf16.mxu0 %v8787_v26  ;;  %v162_v61 = vld [vmem:[#allocation2 + $0x298] sm:$0xff] }
 0x255   :  { %4520 = vmatpush1.bf16.msra.mxu1 %v8570_v25  ;;  %v8651_v25 = vcombine.high %v170_v11, %v174_v17  ;;  %v166_v29 = vld [vmem:[#allocation2 + $0x2b8] sm:$0xff] }
 0x256   :  { %4521 = vmatprep.subr.bf16.mxu1 %v8563_v27  ;;  %v4694_v27 = vld [vmem:[#allocation2 + $0x1380] sm:$0xff]  ;;  %v8643_v34 = vcombine.high %v162_v61, %v166_v29  ;;  %v154_v38 = vld [vmem:[#allocation2 + $0x258] sm:$0xff]  ;;  %v8642_v43 = vcombine.low %v162_v61, %v166_v29 }
 0x257   :  { %4573 = vmatpush2.bf16.msra.mxu0 %v8786_v32  ;;  %v8650_v32 = vcombine.low %v170_v11, %v174_v17  ;;  %v146_v53 = vld [vmem:[#allocation2 + $0x218] sm:$0xff]  ;;  %v4674_v11 = vld [vmem:[#allocation2 + $0x12e0] sm:$0xff] }
 0x258   :  { %4574 = vmatprep.subr.bf16.mxu0 %v8779_v33  ;;  %v9902_v33 = vsel %vm4968_vm1, %v4972_v23, %v4973_v24  ;;  %v150_v3 = vld [vmem:[#allocation2 + $0x238] sm:$0xff]  ;;  %v4662_v61 = vld [vmem:[#allocation2 + $0x1280] sm:$0xff] }
 0x259   :  { %4522 = vmatpush1.bf16.msra.mxu1 %v8562_v63  ;;  %v8907_v63 = vcombine.high %v4694_v27, %v4698_v28  ;;  %v8627_v14 = vcombine.high %v146_v53, %v150_v3  ;;  %v8626_v24 = vcombine.low %v146_v53, %v150_v3  ;;  %v4666_v29 = vld [vmem:[#allocation2 + $0x12a0] sm:$0xff] }
 0x25a   :  { %4523 = vmatprep.subr.bf16.mxu1 %v8683_v31  ;;  %v4240_v26 = vpop.f32.mrf.mxu0  ;;  %v4766_v53 = vld [vmem:[#allocation2 + $0x15c0] sm:$0xff] }
 0x25b   :  { %4575 = vmatpush2.bf16.msra.mxu0 %v8778_v7  ;;  %v158_v7 = vld [vmem:[#allocation2 + $0x278] sm:$0xff]  ;;  %v4770_v3 = vld [vmem:[#allocation2 + $0x15e0] sm:$0xff] }
 0x25c   :  { %4576 = vmatprep.subr.bf16.mxu0 %v8771_v59  ;;  %v4242_v31 = vpop.f32.mrf.mxu0 }
 0x25d   :  { %4524 = vmatpush2.bf16.msra.mxu1 %v8682_v39  ;;  %v9567_v39 = vld [vmem:[%s10204_s0 + $0x8] ss:$20 sps:$4 sm:$0x7f]  }
 0x25e   :  { %4525 = vmatprep.subr.bf16.mxu1 %v8675_v40  ;;  %v8906_v40 = vcombine.low %v4694_v27, %v4698_v28  ;;  %v354_v27 = vld [vmem:[#allocation2 + $0x898] sm:$0xff] }
 0x25f   :  { %4577 = vmatpush2.bf16.msra.mxu0 %v8770_v48  ;;  %v4244_v48 = vpop.f32.mrf.mxu0  ;;  %v358_v28 = vld [vmem:[#allocation2 + $0x8b8] sm:$0xff] }
 0x260   :  { %4578 = vmatprep.subr.bf16.mxu0 %v8763_v51  ;;  %v4678_v51 = vld [vmem:[#allocation2 + $0x1300] sm:$0xff] }
 0x261   :  { %4526 = vmatpush2.bf16.msra.mxu1 %v8674_v42  ;;  %v8635_v42 = vcombine.high %v154_v38, %v158_v7  ;;  %v4246_v56 = vpop.f32.mrf.mxu0 }
 0x262   :  { %4527 = vmatprep.subr.bf16.mxu1 %v8667_v60  ;;  %v4682_v60 = vld [vmem:[#allocation2 + $0x1320] sm:$0xff] }
 0x263   :  { %4579 = vmatpush2.bf16.msra.mxu0 %v8762_v0  ;;  %v8891_v10 = vcombine.high %v4678_v51, %v4682_v60  ;;  %v8890_v23 = vcombine.low %v4678_v51, %v4682_v60 }
 0x264   :  { %4580 = vmatprep.subr.bf16.mxu0 %v8755_v2 }
 0x265   :  { %4528 = vmatpush2.bf16.msra.mxu1 %v8666_v45  ;;  %v8634_v45 = vcombine.low %v154_v38, %v158_v7  ;;  %v9568_v38 = vld [vmem:[%s10204_s0] ss:$20 sps:$4 sm:$0x7f]   ;;  %v8874_v7 = vcombine.low %v4662_v61, %v4666_v29 }
 0x266   :  { %4529 = vmatprep.subr.bf16.mxu1 %v8659_v52 }
 0x267   :  { %4581 = vmatpush2.bf16.msra.mxu0 %v8754_v18 }
 0x268   :  { %6431 = vmatprep.subr.bf16.mxu0 %v8915_v22  ;;  %v366_v22 = vld [vmem:[#allocation2 + $0x8f8] sm:$0xff] }
 0x269   :  { %4530 = vmatpush2.bf16.msra.mxu1 %v8658_v21  ;;  %v362_v21 = vld [vmem:[#allocation2 + $0x8d8] sm:$0xff] }
 0x26a   :  { %4531 = vmatprep.subr.bf16.mxu1 %v8651_v25  ;;  %4583 = vmatmul.mubr.bf16.vlgmr.msra.gmra.mxu0 %v9567_v39  ;;  %v8834_v39 = vcombine.low %v354_v27, %v358_v28 }
 0x26b   :  { %6432 = vmatpush1.bf16.msra.mxu0 %v8914_v30  ;;  %6463 = vmatprep.mubr.bf16.mxu0 %v9902_v33  ;;  %v8842_v30 = vcombine.low %v362_v21, %v366_v22 }
 0x26c   :  { %v4197_v59 = vpop.f32.mrf.mxu1  ;;  %6433 = vmatprep.subr.bf16.mxu0 %v8907_v63  ;;  %v8875_v63 = vcombine.high %v4662_v61, %v4666_v29  ;;  %v4754_v61 = vld [vmem:[#allocation2 + $0x1560] sm:$0xff] }
 0x26d   :  { %v4198_v41 = vadd.f32 %v4197_v59, %v9880_v4  ;;  %4532 = vmatpush2.bf16.msra.mxu1 %v8650_v32  ;;  %v8898_v4 = vcombine.low %v4686_v35, %v4690_v16  ;;  %v8835_v32 = vcombine.high %v354_v27, %v358_v28  ;;  %v346_v35 = vld [vmem:[#allocation2 + $0x858] sm:$0xff]  ;;  %v4750_v28 = vld [vmem:[#allocation2 + $0x1540] sm:$0xff] }
 0x26e   :  { %v4199_v47 = vpop.f32.mrf.mxu1  ;;  %4533 = vmatprep.subr.bf16.mxu1 %v8643_v34  ;;  %v4658_v34 = vld [vmem:[#allocation2 + $0x1260] sm:$0xff]  ;;  %v350_v16 = vld [vmem:[#allocation2 + $0x878] sm:$0xff] }
 0x26f   :  { %v4200_v54 = vadd.f32 %v4199_v47, %v9883_v13  ;;  %v9910_v55 = vadd.f32 %v4240_v26, %v4198_v41  ;;  %6434 = vmatpush1.bf16.msra.mxu0 %v8906_v40  ;;  %v4670_v13 = vld [vmem:[#allocation2 + $0x12c0] sm:$0xff]  ;;  %v8843_v26 = vcombine.high %v362_v21, %v366_v22  ;;  %v8827_v40 = vcombine.high %v346_v35, %v350_v16  ;;  %v342_v47 = vld [vmem:[#allocation2 + $0x838] sm:$0xff] }
 0x270   :  { %v4201_v0 = vpop.f32.mrf.mxu1  ;;  %6435 = vmatprep.subr.bf16.mxu0 %v8899_v46  ;;  %v8883_v25 = vcombine.high %v4670_v13, %v4674_v11  ;;  %v4646_v41 = vld [vmem:[#allocation2 + $0x1200] sm:$0xff]  ;;  %v338_v46 = vld [vmem:[#allocation2 + $0x818] sm:$0xff]  ;;  %v8826_v51 = vcombine.low %v346_v35, %v350_v16 }
 0x271   :  { %v4202_v2 = vadd.f32 %v4201_v0, %v9886_v50  ;;  %v9913_v6 = vadd.f32 %v4242_v31, %v4200_v54  ;;  %4534 = vmatpush2.bf16.msra.mxu1 %v8642_v43  ;;  %v4654_v31 = vld [vmem:[#allocation2 + $0x1240] sm:$0xff]  ;;  %v8819_v54 = vcombine.high %v338_v46, %v342_v47 }
 0x272   :  { %v4203_v52 = vpop.f32.mrf.mxu1  ;;  %4535 = vmatprep.subr.bf16.mxu1 %v8635_v42  ;;  %v8867_v59 = vcombine.high %v4654_v31, %v4658_v34  ;;  %v4650_v43 = vld [vmem:[#allocation2 + $0x1220] sm:$0xff]  ;;  %v9927_v42 = vld [vmem:[%s10204_s0 + $0x30] sm:$0x11] }
 0x273   :  { %v4204_v17 = vadd.f32 %v4203_v52, %v9889_v58  ;;  %v9916_v18 = vadd.f32 %v4244_v48, %v4202_v2  ;;  %6436 = vmatpush1.bf16.msra.mxu0 %v8898_v4  ;;  %v8882_v58 = vcombine.low %v4670_v13, %v4674_v11  ;;  %v8866_v48 = vcombine.low %v4654_v31, %v4658_v34  ;;  %v4830_v0 = vld [vmem:[#allocation2 + $0x17c0] sm:$0xff] }
 0x274   :  { %6437 = vmatprep.subr.bf16.mxu0 %v8891_v10  ;;  %v8859_v60 = vcombine.high %v4646_v41, %v4650_v43  ;;  %v9446_v4 = vld [vmem:[%s10204_s0 + $0xc] ss:$20 sps:$4 sm:$0xfc]   ;;  %v8856_v2 = vcombine.high %v9927_v42, %v9927_v42  ;;  %v8858_v10 = vcombine.low %v4646_v41, %v4650_v43  ;;  %v8818_v52 = vcombine.low %v338_v46, %v342_v47 }
 0x275   :  { %v9918_v50 = vadd.f32 %v4246_v56, %v4204_v17  ;;  %4536 = vmatpush2.bf16.msra.mxu1 %v8634_v45  ;;  %v4834_v45 = vld [vmem:[#allocation2 + $0x17e0] sm:$0xff]  ;;  %v8979_v56 = vcombine.high %v4766_v53, %v4770_v3  ;;  %v4978_v22 = vrot.slane %v9446_v4, 2  ;;  %v8963_v34 = vcombine.high %v4750_v28, %v4754_v61 }
 0x276   :  { %4537 = vmatprep.subr.bf16.mxu1 %v8627_v14  ;;  %v9043_v14 = vcombine.high %v4830_v0, %v4834_v45  ;;  %v4758_v13 = vld [vmem:[#allocation2 + $0x1580] sm:$0xff] }
 0x277   :  { %6438 = vmatpush1.bf16.msra.mxu0 %v8890_v23  ;;  %v4762_v11 = vld [vmem:[#allocation2 + $0x15a0] sm:$0xff]  ;;  %v4979_v23 = vrot.slane %v8856_v2, 2 }
 0x278   :  { %6439 = vmatprep.subr.bf16.mxu0 %v8883_v25  ;;  %v4822_v17 = vld [vmem:[#allocation2 + $0x1780] sm:$0xff]  ;;  %v9042_v25 = vcombine.low %v4830_v0, %v4834_v45 }
 0x279   :  { %4538 = vmatpush2.bf16.msra.mxu1 %v8626_v24  ;;  %v4826_v21 = vld [vmem:[#allocation2 + $0x17a0] sm:$0xff]  ;;  %v8978_v24 = vcombine.low %v4766_v53, %v4770_v3 }
 0x27a   :  { %4601 = vmatprep.subr.bf16.mxu1 %v8843_v26  ;;  %v8971_v26 = vcombine.high %v4758_v13, %v4762_v11  ;;  %v9035_v27 = vcombine.high %v4822_v17, %v4826_v21  ;;  %v4814_v29 = vld [vmem:[#allocation2 + $0x1740] sm:$0xff]  ;;  %v9034_v31 = vcombine.low %v4822_v17, %v4826_v21 }
 0x27b   :  { %6440 = vmatpush1.bf16.msra.mxu0 %v8882_v58  ;;  %v4818_v58 = vld [vmem:[#allocation2 + $0x1760] sm:$0xff] }
 0x27c   :  { %4540 = vmatmul.mubr.bf16.vlgmr.msra.gmra.mxu1 %v9568_v38  ;;  %6441 = vmatprep.subr.bf16.mxu0 %v8875_v63  ;;  %v8970_v63 = vcombine.low %v4758_v13, %v4762_v11  ;;  %v9027_v35 = vcombine.high %v4814_v29, %v4818_v58  ;;  %v4742_v16 = vld [vmem:[#allocation2 + $0x1500] sm:$0xff] }
 0x27d   :  { %4602 = vmatpush1.bf16.msra.mxu1 %v8842_v30  ;;  %4625 = vmatprep.mubr.bf16.mxu1 %v9686_v36  ;;  %v9935_v30 = vsel %vm4968_vm1, %v4978_v22, %v4979_v23  ;;  %v4746_v38 = vld [vmem:[#allocation2 + $0x1520] sm:$0xff] }
 0x27e   :  { %4603 = vmatprep.subr.bf16.mxu1 %v8835_v32  ;;  %v9569_v32 = vld [vmem:[%s10204_s0 + $0x10] ss:$20 sps:$4 sm:$0x7f]   ;;  %v8955_v41 = vcombine.high %v4742_v16, %v4746_v38 }
 0x27f   :  { %6442 = vmatpush1.bf16.msra.mxu0 %v8874_v7  ;;  %v4806_v7 = vld [vmem:[#allocation2 + $0x1700] sm:$0xff] }
 0x280   :  { %6443 = vmatprep.subr.bf16.mxu0 %v8867_v59  ;;  %v8962_v59 = vcombine.low %v4750_v28, %v4754_v61  ;;  %v4734_v46 = vld [vmem:[#allocation2 + $0x14c0] sm:$0xff] }
 0x281   :  { %4604 = vmatpush1.bf16.msra.mxu1 %v8834_v39  ;;  %v4810_v39 = vld [vmem:[#allocation2 + $0x1720] sm:$0xff] }
 0x282   :  { %4605 = vmatprep.subr.bf16.mxu1 %v8827_v40  ;;  %v9026_v40 = vcombine.low %v4814_v29, %v4818_v58  ;;  %v9019_v43 = vcombine.high %v4806_v7, %v4810_v39  ;;  %v4738_v47 = vld [vmem:[#allocation2 + $0x14e0] sm:$0xff] }
 0x283   :  { %6444 = vmatpush1.bf16.msra.mxu0 %v8866_v48  ;;  %v4798_v48 = vld [vmem:[#allocation2 + $0x16c0] sm:$0xff]  ;;  %v8947_v53 = vcombine.high %v4734_v46, %v4738_v47 }
 0x284   :  { %6445 = vmatprep.subr.bf16.mxu0 %v8859_v60  ;;  %v8954_v60 = vcombine.low %v4742_v16, %v4746_v38  ;;  %v4726_v0 = vld [vmem:[#allocation2 + $0x1480] sm:$0xff] }
 0x285   :  { %4606 = vmatpush1.bf16.msra.mxu1 %v8826_v51  ;;  %v4802_v51 = vld [vmem:[#allocation2 + $0x16e0] sm:$0xff] }
 0x286   :  { %4607 = vmatprep.subr.bf16.mxu1 %v8819_v54  ;;  %v9018_v54 = vcombine.low %v4806_v7, %v4810_v39  ;;  %v9011_v3 = vcombine.high %v4798_v48, %v4802_v51  ;;  %v4730_v45 = vld [vmem:[#allocation2 + $0x14a0] sm:$0xff] }
 0x287   :  { %6446 = vmatpush1.bf16.msra.mxu0 %v8858_v10  ;;  %v4790_v4 = vld [vmem:[#allocation2 + $0x1680] sm:$0xff]  ;;  %v8946_v10 = vcombine.low %v4734_v46, %v4738_v47  ;;  %v8938_v22 = vcombine.low %v4726_v0, %v4730_v45 }
 0x288   :  { %6447 = vmatprep.subr.bf16.mxu0 %v8979_v56  ;;  %v4794_v2 = vld [vmem:[#allocation2 + $0x16a0] sm:$0xff]  ;;  %v8939_v56 = vcombine.high %v4726_v0, %v4730_v45 }
 0x289   :  { %4608 = vmatpush1.bf16.msra.mxu1 %v8818_v52  ;;  %v9010_v52 = vcombine.low %v4798_v48, %v4802_v51  ;;  %v4718_v13 = vld [vmem:[#allocation2 + $0x1440] sm:$0xff]  ;;  %v9002_v23 = vcombine.low %v4790_v4, %v4794_v2 }
 0x28a   :  { %6474 = vmatprep.subr.bf16.mxu1 %v9043_v14  ;;  %v9003_v14 = vcombine.high %v4790_v4, %v4794_v2  ;;  %v4722_v11 = vld [vmem:[#allocation2 + $0x1460] sm:$0xff] }
 0x28b   :  { %6448 = vmatpush2.bf16.msra.mxu0 %v8978_v24  ;;  %v4782_v17 = vld [vmem:[#allocation2 + $0x1640] sm:$0xff]  ;;  %v8931_v24 = vcombine.high %v4718_v13, %v4722_v11  ;;  %v8930_v29 = vcombine.low %v4718_v13, %v4722_v11 }
 0x28c   :  { %8847 = vmatmul.mubr.msk.bf16.vlgmr.msra.gmra.mxu1 %vm2132_vm0, %v9569_v32  ;;  %6449 = vmatprep.subr.bf16.mxu0 %v8971_v26  ;;  %v4786_v21 = vld [vmem:[#allocation2 + $0x1660] sm:$0xff]  ;;  %v8853_v32 = vcombine.low %v9894_v57, %v9894_v57 }
 0x28d   :  { %6475 = vmatpush1.bf16.msra.mxu1 %v9042_v25  ;;  %6506 = vmatprep.mubr.bf16.mxu1 %v9935_v30  ;;  %v8995_v25 = vcombine.high %v4782_v17, %v4786_v21  ;;  %v4710_v26 = vld [vmem:[#allocation2 + $0x1400] sm:$0xff] }
 0x28e   :  { %6476 = vmatprep.subr.bf16.mxu1 %v9035_v27  ;;  %v4714_v27 = vld [vmem:[#allocation2 + $0x1420] sm:$0xff] }
 0x28f   :  { %6450 = vmatpush2.bf16.msra.mxu0 %v8970_v63  ;;  %v4774_v28 = vld [vmem:[#allocation2 + $0x1600] sm:$0xff]  ;;  %v8994_v63 = vcombine.low %v4782_v17, %v4786_v21  ;;  %v8922_v39 = vcombine.low %v4710_v26, %v4714_v27 }
 0x290   :  { %6451 = vmatprep.subr.bf16.mxu0 %v8963_v34  ;;  %v4778_v61 = vld [vmem:[#allocation2 + $0x1620] sm:$0xff] }
 0x291   :  { %6477 = vmatpush1.bf16.msra.mxu1 %v9034_v31  ;;  %v9444_v58 = vld [vmem:[%s10204_s0] ss:$20 sps:$4 sm:$0xfc]   ;;  %v8923_v31 = vcombine.high %v4710_v26, %v4714_v27  ;;  %v8987_v34 = vcombine.high %v4774_v28, %v4778_v61 }
 0x292   :  { %6478 = vmatprep.subr.bf16.mxu1 %v9027_v35  ;;  %v4926_v35 = vld [vmem:[#allocation2 + $0x1ac0] sm:$0xff] }
 0x293   :  { %6452 = vmatpush2.bf16.msra.mxu0 %v8962_v59  ;;  %v4930_v16 = vld [vmem:[#allocation2 + $0x1ae0] sm:$0xff]  ;;  %v4969_v59 = vrot.slane %v9444_v58, 2 }
 0x294   :  { %6453 = vmatprep.subr.bf16.mxu0 %v8955_v41  ;;  %v4894_v38 = vld [vmem:[#allocation2 + $0x19c0] sm:$0xff]  ;;  %v8986_v41 = vcombine.low %v4774_v28, %v4778_v61 }
 0x295   :  { %6479 = vmatpush1.bf16.msra.mxu1 %v9026_v40  ;;  %v4898_v7 = vld [vmem:[#allocation2 + $0x19e0] sm:$0xff]  ;;  %v4970_v40 = vrot.slane %v8853_v32, 2 }
 0x296   :  { %6480 = vmatprep.subr.bf16.mxu1 %v9019_v43  ;;  %v9139_v43 = vcombine.high %v4926_v35, %v4930_v16  ;;  %v9107_v57 = vcombine.high %v4894_v38, %v4898_v7  ;;  %v4918_v47 = vld [vmem:[#allocation2 + $0x1a80] sm:$0xff] }
 0x297   :  { %6454 = vmatpush2.bf16.msra.mxu0 %v8954_v60  ;;  %v4922_v48 = vld [vmem:[#allocation2 + $0x1aa0] sm:$0xff] }
 0x298   :  { %6455 = vmatprep.subr.bf16.mxu0 %v8947_v53  ;;  %v4886_v51 = vld [vmem:[#allocation2 + $0x1980] sm:$0xff]  ;;  %v9948_v53 = vsel %vm4968_vm1, %v4969_v59, %v4970_v40  ;;  %v9131_v0 = vcombine.high %v4918_v47, %v4922_v48  ;;  %v9130_v13 = vcombine.low %v4918_v47, %v4922_v48  ;;  %v4835_v59 = vld [vmem:[#allocation2 + $0x17e8] sm:$0xff] }
 0x299   :  { %6481 = vmatpush1.bf16.msra.mxu1 %v9018_v54  ;;  %v4890_v60 = vld [vmem:[#allocation2 + $0x19a0] sm:$0xff]  ;;  %v9138_v54 = vcombine.low %v4926_v35, %v4930_v16 }
 0x29a   :  { %6482 = vmatprep.subr.bf16.mxu1 %v9011_v3  ;;  %v4326_v46 = vpop.f32.mrf.mxu0  ;;  %v9106_v3 = vcombine.low %v4894_v38, %v4898_v7  ;;  %v9099_v4 = vcombine.high %v4886_v51, %v4890_v60  ;;  %v4910_v2 = vld [vmem:[#allocation2 + $0x1a40] sm:$0xff]  ;;  %v9098_v17 = vcombine.low %v4886_v51, %v4890_v60 }
 0x29b   :  { %6456 = vmatpush2.bf16.msra.mxu0 %v8946_v10  ;;  %v4914_v10 = vld [vmem:[#allocation2 + $0x1a60] sm:$0xff] }
 0x29c   :  { %6457 = vmatprep.subr.bf16.mxu0 %v8939_v56  ;;  %v4328_v45 = vpop.f32.mrf.mxu0  ;;  %v4882_v56 = vld [vmem:[#allocation2 + $0x1960] sm:$0xff]  ;;  %v9123_v21 = vcombine.high %v4910_v2, %v4914_v10 }
 0x29d   :  { %6483 = vmatpush1.bf16.msra.mxu1 %v9010_v52  ;;  %v4878_v52 = vld [vmem:[#allocation2 + $0x1940] sm:$0xff] }
 0x29e   :  { %6484 = vmatprep.subr.bf16.mxu1 %v9003_v14  ;;  %v4906_v26 = vld [vmem:[#allocation2 + $0x1a20] sm:$0xff]  ;;  %v9090_v32 = vcombine.low %v4878_v52, %v4882_v56 }
 0x29f   :  { %6458 = vmatpush2.bf16.msra.mxu0 %v8938_v22  ;;  %v4870_v61 = vld [vmem:[#allocation2 + $0x1900] sm:$0xff] }
 0x2a0   :  { %6459 = vmatprep.subr.bf16.mxu0 %v8931_v24  ;;  %v9091_v24 = vcombine.high %v4878_v52, %v4882_v56 }
 0x2a1   :  { %6485 = vmatpush1.bf16.msra.mxu1 %v9002_v23  ;;  %v4330_v23 = vpop.f32.mrf.mxu0 }
 0x2a2   :  { %6486 = vmatprep.subr.bf16.mxu1 %v8995_v25  ;;  %v4902_v25 = vld [vmem:[#allocation2 + $0x1a00] sm:$0xff] }
 0x2a3   :  { %6460 = vmatpush2.bf16.msra.mxu0 %v8930_v29  ;;  %v4874_v29 = vld [vmem:[#allocation2 + $0x1920] sm:$0xff]  ;;  %v4332_v38 = vpop.f32.mrf.mxu0 }
 0x2a4   :  { %6461 = vmatprep.subr.bf16.mxu0 %v8923_v31  ;;  %v9452_v31 = vld [vmem:[%s10204_s0 + $0x38] ss:$0 sps:$4 sm:$0x11]   ;;  %v9083_v7 = vcombine.high %v4870_v61, %v4874_v29  ;;  %v9082_v51 = vcombine.low %v4870_v61, %v4874_v29  ;;  %v4807_v61 = vld [vmem:[#allocation2 + $0x1708] sm:$0xff] }
 0x2a5   :  { %6487 = vmatpush1.bf16.msra.mxu1 %v8994_v63  ;;  %v9122_v63 = vcombine.low %v4910_v2, %v4914_v10  ;;  %v4982_v48 = vrot.slane %v9452_v31, 2  ;;  %v4811_v29 = vld [vmem:[#allocation2 + $0x1728] sm:$0xff] }
 0x2a6   :  { %6488 = vmatprep.subr.bf16.mxu1 %v8987_v34 }
 0x2a7   :  { %6462 = vmatpush2.bf16.msra.mxu0 %v8922_v39  ;;  %v4831_v39 = vld [vmem:[#allocation2 + $0x17c8] sm:$0xff] }
 0x2a8   :  { %6525 = vmatprep.subr.bf16.mxu0 %v9139_v43  ;;  %v4862_v43 = vld [vmem:[#allocation2 + $0x18c0] sm:$0xff]  ;;  %v9045_v60 = vcombine.high %v4831_v39, %v4835_v59 }
 0x2a9   :  { %6489 = vmatpush1.bf16.msra.mxu1 %v8986_v41 }
 0x2aa   :  { %6490 = vmatprep.subr.bf16.mxu1 %v9107_v57  ;;  %6464 = vmatmul.mubr.bf16.vlgmr.msra.gmra.mxu0 %v9948_v53  ;;  %v4866_v57 = vld [vmem:[#allocation2 + $0x18e0] sm:$0xff] }
 0x2ab   :  { %6526 = vmatpush1.bf16.msra.mxu0 %v9138_v54  ;;  %6549 = vmatprep.mubr.bf16.mxu0 %v9686_v36  ;;  %v9075_v54 = vcombine.high %v4862_v43, %v4866_v57  ;;  %v9074_v10 = vcombine.low %v4862_v43, %v4866_v57  ;;  %v4703_v43 = vld [vmem:[#allocation2 + $0x13c8] sm:$0xff]  ;;  %v9020_v57 = vcombine.low %v4807_v61, %v4811_v29 }
 0x2ac   :  { %v4283_v14 = vpop.f32.mrf.mxu1  ;;  %6527 = vmatprep.subr.bf16.mxu0 %v9131_v0  ;;  %v4827_v0 = vld [vmem:[#allocation2 + $0x17a8] sm:$0xff] }
 0x2ad   :  { %v4284_v11 = vadd.f32 %v4283_v14, %v9818_v62  ;;  %6491 = vmatpush2.bf16.msra.mxu1 %v9106_v3  ;;  %v9451_v62 = vld [vmem:[%s10204_s0 + $0x10] ss:$20 sps:$4 sm:$0xfc]   ;;  %v4823_v3 = vld [vmem:[#allocation2 + $0x1788] sm:$0xff] }
 0x2ae   :  { %v4285_v22 = vpop.f32.mrf.mxu1  ;;  %6492 = vmatprep.subr.bf16.mxu1 %v9099_v4  ;;  %v4981_v47 = vrot.slane %v9451_v62, 2  ;;  %v4858_v4 = vld [vmem:[#allocation2 + $0x18a0] sm:$0xff]  ;;  %v9037_v52 = vcombine.high %v4823_v3, %v4827_v0  ;;  %v4815_v14 = vld [vmem:[#allocation2 + $0x1748] sm:$0xff] }
 0x2af   :  { %v4286_v27 = vadd.f32 %v4285_v22, %v9820_v8  ;;  %v4327_v28 = vadd.f32 %v4326_v46, %v4284_v11  ;;  %6528 = vmatpush1.bf16.msra.mxu0 %v9130_v13  ;;  %v9115_v8 = vcombine.high %v4902_v25, %v4906_v26  ;;  %v9114_v46 = vcombine.low %v4902_v25, %v4906_v26  ;;  %v4819_v13 = vld [vmem:[#allocation2 + $0x1768] sm:$0xff]  ;;  %v4846_v11 = vld [vmem:[#allocation2 + $0x1840] sm:$0xff] }
 0x2b0   :  { %v4287_v58 = vpop.f32.mrf.mxu1  ;;  %6529 = vmatprep.subr.bf16.mxu0 %v9123_v21  ;;  %v9963_v2 = vsel %vm4968_vm1, %v4981_v47, %v4982_v48  ;;  %v9036_v22 = vcombine.low %v4823_v3, %v4827_v0  ;;  %v9029_v25 = vcombine.high %v4815_v14, %v4819_v13  ;;  %v4695_v3 = vld [vmem:[#allocation2 + $0x1388] sm:$0xff] }
 0x2b1   :  { %v4288_v34 = vadd.f32 %v4287_v58, %v9822_v12  ;;  %v4329_v35 = vadd.f32 %v4328_v45, %v4286_v27  ;;  %6493 = vmatpush2.bf16.msra.mxu1 %v9098_v17  ;;  %v4854_v45 = vld [vmem:[#allocation2 + $0x1880] sm:$0xff]  ;;  %v4699_v0 = vld [vmem:[#allocation2 + $0x13a8] sm:$0xff] }
 0x2b2   :  { %v4289_v16 = vpop.f32.mrf.mxu1  ;;  %6494 = vmatprep.subr.bf16.mxu1 %v9091_v24  ;;  %v9067_v56 = vcombine.high %v4854_v45, %v4858_v4  ;;  %v4850_v17 = vld [vmem:[#allocation2 + $0x1860] sm:$0xff]  ;;  %v9066_v24 = vcombine.low %v4854_v45, %v4858_v4 }
 0x2b3   :  { %v4290_v40 = vadd.f32 %v4289_v16, %v9824_v20  ;;  %v4331_v41 = vadd.f32 %v4330_v23, %v4288_v34  ;;  %6530 = vmatpush1.bf16.msra.mxu0 %v9122_v63  ;;  %v9044_v20 = vcombine.low %v4831_v39, %v4835_v59  ;;  %v9059_v27 = vcombine.high %v4846_v11, %v4850_v17  ;;  %v4842_v63 = vld [vmem:[#allocation2 + $0x1820] sm:$0xff]  ;;  %v4799_v39 = vld [vmem:[#allocation2 + $0x16c8] sm:$0xff] }
 0x2b4   :  { %6531 = vmatprep.subr.bf16.mxu0 %v9115_v8  ;;  %v9058_v31 = vcombine.low %v4846_v11, %v4850_v17  ;;  %v9028_v34 = vcombine.low %v4815_v14, %v4819_v13  ;;  %v8855_v16 = vcombine.low %v9927_v42, %v9927_v42  ;;  %v4803_v59 = vld [vmem:[#allocation2 + $0x16e8] sm:$0xff]  ;;  %v8908_v17 = vcombine.low %v4695_v3, %v4699_v0 }
 0x2b5   :  { %v4333_v12 = vadd.f32 %v4332_v38, %v4290_v40  ;;  %6495 = vmatpush2.bf16.msra.mxu1 %v9090_v32  ;;  %v4838_v32 = vld [vmem:[#allocation2 + $0x1800] sm:$0xff]  ;;  %v9021_v38 = vcombine.high %v4807_v61, %v4811_v29  ;;  %v9012_v45 = vcombine.low %v4799_v39, %v4803_v59  ;;  %v4687_v14 = vld [vmem:[#allocation2 + $0x1348] sm:$0xff] }
 0x2b6   :  { %6496 = vmatprep.subr.bf16.mxu1 %v9083_v7  ;;  %v9051_v7 = vcombine.high %v4838_v32, %v4842_v63  ;;  %v4976_v48 = vrot.slane %v8855_v16, 2  ;;  %v4691_v13 = vld [vmem:[#allocation2 + $0x1368] sm:$0xff] }
 0x2b7   :  { %6532 = vmatpush1.bf16.msra.mxu0 %v9114_v46  ;;  %v9050_v46 = vcombine.low %v4838_v32, %v4842_v63  ;;  %v8900_v29 = vcombine.low %v4687_v14, %v4691_v13 }
 0x2b8   :  { %6603 = vmatprep.subr.bf16.mxu0 %v9045_v60  ;;  %v4791_v60 = vld [vmem:[#allocation2 + $0x1688] sm:$0xff] }
 0x2b9   :  { %6497 = vmatpush2.bf16.msra.mxu1 %v9082_v51  ;;  %v9013_v51 = vcombine.high %v4799_v39, %v4803_v59  ;;  %v4887_v39 = vld [vmem:[#allocation2 + $0x1988] sm:$0xff] }
 0x2ba   :  { %6498 = vmatprep.subr.bf16.mxu1 %v9075_v54  ;;  %9146 = vmatmul.mubr.msk.bf16.vlgmr.msra.gmra.mxu0 %vm2132_vm0, %v9963_v2  ;;  %v4795_v54 = vld [vmem:[#allocation2 + $0x16a8] sm:$0xff] }
 0x2bb   :  { %6604 = vmatpush1.bf16.msra.mxu0 %v9044_v20  ;;  %6635 = vmatprep.mubr.bf16.mxu0 %v9935_v30  ;;  %v9005_v20 = vcombine.high %v4791_v60, %v4795_v54  ;;  %v9004_v11 = vcombine.low %v4791_v60, %v4795_v54  ;;  %v4891_v59 = vld [vmem:[#allocation2 + $0x19a8] sm:$0xff] }
 0x2bc   :  { %v4369_v21 = vpop.f32.mrf.mxu1  ;;  %6605 = vmatprep.subr.bf16.mxu0 %v9037_v52  ;;  %v4783_v52 = vld [vmem:[#allocation2 + $0x1648] sm:$0xff] }
 0x2bd   :  { %v9968_v23 = vadd.f32 %v4369_v21, %v4327_v28  ;;  %6499 = vmatpush2.bf16.msra.mxu1 %v9074_v10  ;;  %v9449_v28 = vld [vmem:[%s10204_s0 + $0x8] ss:$20 sps:$4 sm:$0xfc]   ;;  %v8909_v10 = vcombine.high %v4695_v3, %v4699_v0  ;;  %s9687_s0 = smov [#allocation10]  }
 0x2be   :  { %v4371_v26 = vpop.f32.mrf.mxu1  ;;  %6500 = vmatprep.subr.bf16.mxu1 %v9067_v56  ;;  %v4975_v47 = vrot.slane %v9449_v28, 2  ;;  %v4787_v56 = vld [vmem:[#allocation2 + $0x1668] sm:$0xff]  ;;  %s8243_s6 = sshll.u32 %s9687_s0, 4  ;;  %s8244_s6 = int_to_ptr.vmem [resolvable:$true] %s8243_s6 }
 0x2bf   :  { %10210 = vst [vmem:[#allocation15_spill] sm:$0xff] %v9968_v23  ;;  %v9970_v58 = vadd.f32 %v4371_v26, %v4329_v35  ;;  %6606 = vmatpush1.bf16.msra.mxu0 %v9036_v22  ;;  %v8997_v21 = vcombine.high %v4783_v52, %v4787_v56  ;;  %v8901_v22 = vcombine.high %v4687_v14, %v4691_v13  ;;  %v4679_v26 = vld [vmem:[#allocation2 + $0x1308] sm:$0xff]  ;;  %s9650_s7 = scalar_lea.vmem %s8244_s6, 32  ;;  %p9655_p7 = scmp.lt.s32.totalorder %s8244_s6, %s8244_s6 }
 0x2c0   :  { %v4373_v62 = vpop.f32.mrf.mxu1  ;;  %6607 = vmatprep.subr.bf16.mxu0 %v9029_v25  ;;  %v4779_v25 = vld [vmem:[#allocation2 + $0x1628] sm:$0xff]  ;;  %v8996_v61 = vcombine.low %v4783_v52, %v4787_v56  ;;  %p9651_p6 = scmp.ne.s32.totalorder %s8244_s6, %s9650_s7  ;;  %p9656_p8 = scmp.lt.s32.totalorder %s9650_s7, %s9650_s7 }
 0x2c1   :  { %10211 = vst [vmem:[#allocation16_spill] sm:$0xff] %v9970_v58  ;;  %v9972_v8 = vadd.f32 %v4373_v62, %v4331_v41  ;;  %6501 = vmatpush2.bf16.msra.mxu1 %v9066_v24  ;;  %v4707_v41 = vld [vmem:[#allocation2 + $0x13e8] sm:$0xff] }
 0x2c2   :  { %v4375_v35 = vpop.f32.mrf.mxu1  ;;  %6502 = vmatprep.subr.bf16.mxu1 %v9059_v27  ;;  %v8917_v42 = vcombine.high %v4703_v43, %v4707_v41  ;;  %v8916_v4 = vcombine.low %v4703_v43, %v4707_v41  ;;  %v4775_v24 = vld [vmem:[#allocation2 + $0x1608] sm:$0xff]  ;;  %p9657_p9 = por %p9656_p8, %p9655_p7 }
 0x2c3   :  { %10212 = vst [vmem:[#allocation17_spill] sm:$0xff] %v9972_v8  ;;  %v9979_v40 = vadd.f32 %v4375_v35, %v4333_v12  ;;  %6608 = vmatpush1.bf16.msra.mxu0 %v9028_v34  ;;  %v9982_v12 = vsel %vm4968_vm1, %v4975_v47, %v4976_v48  ;;  %v4683_v27 = vld [vmem:[#allocation2 + $0x1328] sm:$0xff]  ;;  %v8989_v32 = vcombine.high %v4775_v24, %v4779_v25 }
 0x2c4   :  { %6609 = vmatprep.subr.bf16.mxu0 %v9021_v38  ;;  %v8893_v63 = vcombine.high %v4679_v26, %v4683_v27  ;;  %v4895_v62 = vld [vmem:[#allocation2 + $0x19c8] sm:$0xff]  ;;  %v8988_v16 = vcombine.low %v4775_v24, %v4779_v25  ;;  %v8892_v38 = vcombine.low %v4679_v26, %v4683_v27  ;;  %v9101_v47 = vcombine.high %v4887_v39, %v4891_v59  ;;  %p9658_p10 = pnand %p9657_p9, %p9651_p6 }
 0x2c5   :  { %10213 = vst [vmem:[#allocation18_spill] sm:$0xff] %v9979_v40  ;;  %6503 = vmatpush2.bf16.msra.mxu1 %v9058_v31  ;;  %v4899_v31 = vld [vmem:[#allocation2 + $0x19e8] sm:$0xff] }
 0x2c6   :  { %6504 = vmatprep.subr.bf16.mxu1 %v9051_v7  ;;  %v4671_v34 = vld [vmem:[#allocation2 + $0x12c8] sm:$0xff]  ;;  %v9109_v35 = vcombine.high %v4895_v62, %v4899_v31 }
 0x2c7   :  { %6610 = vmatpush1.bf16.msra.mxu0 %v9020_v57  ;;  %v4675_v28 = vld [vmem:[#allocation2 + $0x12e8] sm:$0xff]  ;;  %v9108_v57 = vcombine.low %v4895_v62, %v4899_v31 }
 0x2c8   :  { %6611 = vmatprep.subr.bf16.mxu0 %v9013_v51  ;;  %v8885_v7 = vcombine.high %v4671_v34, %v4675_v28  ;;  %v4663_v43 = vld [vmem:[#allocation2 + $0x1288] sm:$0xff] }
 0x2c9   :  { %6505 = vmatpush2.bf16.msra.mxu1 %v9050_v46  ;;  %v4667_v41 = vld [vmem:[#allocation2 + $0x12a8] sm:$0xff]  ;;  %v8884_v46 = vcombine.low %v4671_v34, %v4675_v28 }
 0x2ca   :  { %6560 = vmatprep.subr.bf16.mxu1 %v8917_v42  ;;  %v8877_v48 = vcombine.high %v4663_v43, %v4667_v41  ;;  %v4879_v51 = vld [vmem:[#allocation2 + $0x1948] sm:$0xff] }
 0x2cb   :  { %6612 = vmatpush1.bf16.msra.mxu0 %v9012_v45  ;;  %v4883_v42 = vld [vmem:[#allocation2 + $0x1968] sm:$0xff]  ;;  %v9100_v45 = vcombine.low %v4887_v39, %v4891_v59 }
 0x2cc   :  { %6507 = vmatmul.mubr.bf16.vlgmr.msra.gmra.mxu1 %v9982_v12  ;;  %6613 = vmatprep.subr.bf16.mxu0 %v9005_v20  ;;  %v4655_v54 = vld [vmem:[#allocation2 + $0x1248] sm:$0xff]  ;;  %v8876_v20 = vcombine.low %v4663_v43, %v4667_v41 }
 0x2cd   :  { %6561 = vmatpush1.bf16.msra.mxu1 %v8916_v4  ;;  %6592 = vmatprep.mubr.bf16.mxu1 %v9902_v33  ;;  %v4659_v3 = vld [vmem:[#allocation2 + $0x1268] sm:$0xff] }
 0x2ce   :  { %6562 = vmatprep.subr.bf16.mxu1 %v8909_v10  ;;  %v9093_v10 = vcombine.high %v4879_v51, %v4883_v42  ;;  %v8869_v56 = vcombine.high %v4655_v54, %v4659_v3  ;;  %v4871_v14 = vld [vmem:[#allocation2 + $0x1908] sm:$0xff]  ;;  %v8868_v24 = vcombine.low %v4655_v54, %v4659_v3 }
 0x2cf   :  { %6614 = vmatpush1.bf16.msra.mxu0 %v9004_v11  ;;  %v4875_v13 = vld [vmem:[#allocation2 + $0x1928] sm:$0xff] }
 0x2d0   :  { %6615 = vmatprep.subr.bf16.mxu0 %v8997_v21  ;;  %v4651_v21 = vld [vmem:[#allocation2 + $0x1228] sm:$0xff]  ;;  %v9085_v25 = vcombine.high %v4871_v14, %v4875_v13 }
 0x2d1   :  { %6563 = vmatpush1.bf16.msra.mxu1 %v8908_v17  ;;  %v4647_v17 = vld [vmem:[#allocation2 + $0x1208] sm:$0xff] }
 0x2d2   :  { %6564 = vmatprep.subr.bf16.mxu1 %v8901_v22  ;;  %v9092_v22 = vcombine.low %v4879_v51, %v4883_v42  ;;  %v8861_v26 = vcombine.high %v4647_v17, %v4651_v21  ;;  %v4867_v27 = vld [vmem:[#allocation2 + $0x18e8] sm:$0xff] }
 0x2d3   :  { %6616 = vmatpush1.bf16.msra.mxu0 %v8996_v61  ;;  %v4767_v61 = vld [vmem:[#allocation2 + $0x15c8] sm:$0xff] }
 0x2d4   :  { %6617 = vmatprep.subr.bf16.mxu0 %v8989_v32  ;;  %v9084_v32 = vcombine.low %v4871_v14, %v4875_v13  ;;  %v4855_v31 = vld [vmem:[#allocation2 + $0x1888] sm:$0xff]  ;;  %v4708_v14 = vld [vmem:[#allocation2 + $0x13f0] sm:$0xff] }
 0x2d5   :  { %6565 = vmatpush1.bf16.msra.mxu1 %v8900_v29  ;;  %v4771_v29 = vld [vmem:[#allocation2 + $0x15e8] sm:$0xff] }
 0x2d6   :  { %6566 = vmatprep.subr.bf16.mxu1 %v8893_v63  ;;  %v8860_v63 = vcombine.low %v4647_v17, %v4651_v21  ;;  %v4859_v34 = vld [vmem:[#allocation2 + $0x18a8] sm:$0xff] }
 0x2d7   :  { %6618 = vmatpush1.bf16.msra.mxu0 %v8988_v16  ;;  %v4759_v28 = vld [vmem:[#allocation2 + $0x1588] sm:$0xff] }
 0x2d8   :  { %6619 = vmatprep.subr.bf16.mxu0 %v9109_v35  ;;  %v4763_v16 = vld [vmem:[#allocation2 + $0x15a8] sm:$0xff]  ;;  %v8980_v35 = vcombine.low %v4767_v61, %v4771_v29 }
 0x2d9   :  { %6567 = vmatpush1.bf16.msra.mxu1 %v8892_v38  ;;  %v8973_v39 = vcombine.high %v4759_v28, %v4763_v16  ;;  %v4847_v59 = vld [vmem:[#allocation2 + $0x1848] sm:$0xff] }
 0x2da   :  { %6568 = vmatprep.subr.bf16.mxu1 %v8885_v7  ;;  %v4412_v60 = vpop.f32.mrf.mxu0  ;;  %v9069_v7 = vcombine.high %v4855_v31, %v4859_v34  ;;  %v4851_v43 = vld [vmem:[#allocation2 + $0x1868] sm:$0xff] }
 0x2db   :  { %v9987_v0 = vadd.f32 %v4412_v60, %v9845_v19  ;;  %6620 = vmatpush2.bf16.msra.mxu0 %v9108_v57  ;;  %v4751_v41 = vld [vmem:[#allocation2 + $0x1548] sm:$0xff] }
 0x2dc   :  { %v4414_v4 = vpop.f32.mrf.mxu0  ;;  %6621 = vmatprep.subr.bf16.mxu0 %v9101_v47  ;;  %v4755_v57 = vld [vmem:[#allocation2 + $0x1568] sm:$0xff]  ;;  %v8972_v47 = vcombine.low %v4759_v28, %v4763_v16 }
 0x2dd   :  { %6569 = vmatpush1.bf16.msra.mxu1 %v8884_v46  ;;  %v9990_v52 = vadd.f32 %v4414_v4, %v9848_v5  ;;  %v4863_v5 = vld [vmem:[#allocation2 + $0x18c8] sm:$0xff]  ;;  %v9068_v46 = vcombine.low %v4855_v31, %v4859_v34  ;;  %v8965_v51 = vcombine.high %v4751_v41, %v4755_v57  ;;  %v8964_v4 = vcombine.low %v4751_v41, %v4755_v57  ;;  %v4692_v31 = vld [vmem:[#allocation2 + $0x1370] sm:$0xff] }
 0x2de   :  { %6570 = vmatprep.subr.bf16.mxu1 %v8877_v48  ;;  %v4416_v11 = vpop.f32.mrf.mxu0  ;;  %v9077_v62 = vcombine.high %v4863_v5, %v4867_v27  ;;  %v9076_v38 = vcombine.low %v4863_v5, %v4867_v27  ;;  %v9061_v48 = vcombine.high %v4847_v59, %v4851_v43  ;;  %v4839_v42 = vld [vmem:[#allocation2 + $0x1808] sm:$0xff]  ;;  %v4680_v57 = vld [vmem:[#allocation2 + $0x1310] sm:$0xff] }
 0x2df   :  { %v9993_v19 = vadd.f32 %v4416_v11, %v9851_v15  ;;  %6622 = vmatpush2.bf16.msra.mxu0 %v9100_v45  ;;  %v8981_v15 = vcombine.high %v4767_v61, %v4771_v29  ;;  %v4843_v60 = vld [vmem:[#allocation2 + $0x1828] sm:$0xff]  ;;  %v9060_v45 = vcombine.low %v4847_v59, %v4851_v43 }
 0x2e0   :  { %6623 = vmatprep.subr.bf16.mxu0 %v9093_v10  ;;  %v4743_v54 = vld [vmem:[#allocation2 + $0x1508] sm:$0xff]  ;;  %v9052_v17 = vcombine.low %v4839_v42, %v4843_v60 }
 0x2e1   :  { %6571 = vmatpush1.bf16.msra.mxu1 %v8876_v20  ;;  %v4747_v3 = vld [vmem:[#allocation2 + $0x1528] sm:$0xff]  ;;  %v9053_v20 = vcombine.high %v4839_v42, %v4843_v60 }
 0x2e2   :  { %6572 = vmatprep.subr.bf16.mxu1 %v8869_v56  ;;  %v8957_v10 = vcombine.high %v4743_v54, %v4747_v3  ;;  %v4704_v56 = vld [vmem:[#allocation2 + $0x13d0] sm:$0xff]  ;;  %v4735_v13 = vld [vmem:[#allocation2 + $0x14c8] sm:$0xff]  ;;  %v8956_v21 = vcombine.low %v4743_v54, %v4747_v3 }
 0x2e3   :  { %6624 = vmatpush2.bf16.msra.mxu0 %v9092_v22  ;;  %v4739_v11 = vld [vmem:[#allocation2 + $0x14e8] sm:$0xff]  ;;  %v8919_v22 = vcombine.high %v4704_v56, %v4708_v14  ;;  %v8918_v61 = vcombine.low %v4704_v56, %v4708_v14 }
 0x2e4   :  { %6625 = vmatprep.subr.bf16.mxu0 %v9085_v25  ;;  %v4696_v25 = vld [vmem:[#allocation2 + $0x1390] sm:$0xff]  ;;  %v4727_v5 = vld [vmem:[#allocation2 + $0x1488] sm:$0xff]  ;;  %v8948_v29 = vcombine.low %v4735_v13, %v4739_v11 }
 0x2e5   :  { %6573 = vmatpush1.bf16.msra.mxu1 %v8868_v24  ;;  %v8949_v24 = vcombine.high %v4735_v13, %v4739_v11  ;;  %v4731_v27 = vld [vmem:[#allocation2 + $0x14a8] sm:$0xff] }
 0x2e6   :  { %6574 = vmatprep.subr.bf16.mxu1 %v8861_v26  ;;  %v4700_v26 = vld [vmem:[#allocation2 + $0x13b0] sm:$0xff]  ;;  %v4719_v34 = vld [vmem:[#allocation2 + $0x1448] sm:$0xff] }
 0x2e7   :  { %6626 = vmatpush2.bf16.msra.mxu0 %v9084_v32  ;;  %v8911_v32 = vcombine.high %v4696_v25, %v4700_v26  ;;  %v4723_v28 = vld [vmem:[#allocation2 + $0x1468] sm:$0xff] }
 0x2e8   :  { %6627 = vmatprep.subr.bf16.mxu0 %v9077_v62  ;;  %v8941_v62 = vcombine.high %v4727_v5, %v4731_v27  ;;  %v8933_v41 = vcombine.high %v4719_v34, %v4723_v28  ;;  %v4715_v42 = vld [vmem:[#allocation2 + $0x1428] sm:$0xff]  ;;  %v8932_v3 = vcombine.low %v4719_v34, %v4723_v28 }
 0x2e9   :  { %6575 = vmatpush1.bf16.msra.mxu1 %v8860_v63  ;;  %v9995_v63 = vpop.f32.mrf.mxu0  ;;  %v4931_v56 = vld [vmem:[#allocation2 + $0x1ae8] sm:$0xff] }
 0x2ea   :  { %6576 = vmatprep.subr.bf16.mxu1 %v8981_v15  ;;  %v4688_v15 = vld [vmem:[#allocation2 + $0x1350] sm:$0xff] }
 0x2eb   :  { %6628 = vmatpush2.bf16.msra.mxu0 %v9076_v38  ;;  %v4498_v38 = vpop.f32.mrf.mxu0  ;;  %v8903_v59 = vcombine.high %v4688_v15, %v4692_v31  ;;  %v8902_v54 = vcombine.low %v4688_v15, %v4692_v31 }
 0x2ec   :  { %6629 = vmatprep.subr.bf16.mxu0 %v9069_v7 }
 0x2ed   :  { %6577 = vmatpush2.bf16.msra.mxu1 %v8980_v35  ;;  %v8910_v35 = vcombine.low %v4696_v25, %v4700_v26 }
 0x2ee   :  { %6578 = vmatprep.subr.bf16.mxu1 %v8973_v39  ;;  %v8940_v39 = vcombine.low %v4727_v5, %v4731_v27 }
 0x2ef   :  { %6630 = vmatpush2.bf16.msra.mxu0 %v9068_v46  ;;  %v4684_v46 = vld [vmem:[#allocation2 + $0x1330] sm:$0xff] }
 0x2f0   :  { %6631 = vmatprep.subr.bf16.mxu0 %v9061_v48  ;;  %v8894_v14 = vcombine.low %v4680_v57, %v4684_v46 }
 0x2f1   :  { %6579 = vmatpush2.bf16.msra.mxu1 %v8972_v47 }
 0x2f2   :  { %6580 = vmatprep.subr.bf16.mxu1 %v8965_v51  ;;  %v4711_v51 = vld [vmem:[#allocation2 + $0x1408] sm:$0xff] }
 0x2f3   :  { %6632 = vmatpush2.bf16.msra.mxu0 %v9060_v45  ;;  %v8895_v45 = vcombine.high %v4680_v57, %v4684_v46  ;;  %v8924_v13 = vcombine.low %v4711_v51, %v4715_v42  ;;  %v4768_v57 = vld [vmem:[#allocation2 + $0x15d0] sm:$0xff] }
 0x2f4   :  { %6633 = vmatprep.subr.bf16.mxu0 %v9053_v20  ;;  %v4672_v20 = vld [vmem:[#allocation2 + $0x12d0] sm:$0xff] }
 0x2f5   :  { %6581 = vmatpush2.bf16.msra.mxu1 %v8964_v4  ;;  %v8925_v4 = vcombine.high %v4711_v51, %v4715_v42  ;;  %v4772_v46 = vld [vmem:[#allocation2 + $0x15f0] sm:$0xff] }
 0x2f6   :  { %6582 = vmatprep.subr.bf16.mxu1 %v8957_v10  ;;  %v4676_v10 = vld [vmem:[#allocation2 + $0x12f0] sm:$0xff] }
 0x2f7   :  { %6634 = vmatpush2.bf16.msra.mxu0 %v9052_v17  ;;  %v8887_v11 = vcombine.high %v4672_v20, %v4676_v10  ;;  %v8886_v25 = vcombine.low %v4672_v20, %v4676_v10  ;;  %v4832_v51 = vld [vmem:[#allocation2 + $0x17d0] sm:$0xff] }
 0x2f8   :  { %6689 = vmatprep.subr.bf16.mxu0 %v8919_v22  ;;  %v4664_v22 = vld [vmem:[#allocation2 + $0x1290] sm:$0xff] }
 0x2f9   :  { %6583 = vmatpush2.bf16.msra.mxu1 %v8956_v21  ;;  %v4923_v21 = vld [vmem:[#allocation2 + $0x1aa8] sm:$0xff]  ;;  %v4836_v42 = vld [vmem:[#allocation2 + $0x17f0] sm:$0xff] }
 0x2fa   :  { %6584 = vmatprep.subr.bf16.mxu1 %v8949_v24  ;;  %6636 = vmatmul.mubr.bf16.vlgmr.msra.gmra.mxu0 %v9982_v12  ;;  %v4668_v24 = vld [vmem:[#allocation2 + $0x12b0] sm:$0xff] }
 0x2fb   :  { %6690 = vmatpush1.bf16.msra.mxu0 %v8918_v61  ;;  %6721 = vmatprep.mubr.bf16.mxu0 %v9902_v33  ;;  %v8879_v27 = vcombine.high %v4664_v22, %v4668_v24  ;;  %v4656_v61 = vld [vmem:[#allocation2 + $0x1250] sm:$0xff]  ;;  %v8878_v15 = vcombine.low %v4664_v22, %v4668_v24 }
 0x2fc   :  { %v4455_v16 = vpop.f32.mrf.mxu1  ;;  %6691 = vmatprep.subr.bf16.mxu0 %v8911_v32  ;;  %v4911_v32 = vld [vmem:[#allocation2 + $0x1a48] sm:$0xff]  ;;  %v4764_v20 = vld [vmem:[#allocation2 + $0x15b0] sm:$0xff] }
 0x2fd   :  { %v4456_v7 = vadd.f32 %v4455_v16, %v9987_v0  ;;  %6585 = vmatpush2.bf16.msra.mxu1 %v8948_v29  ;;  %v4660_v29 = vld [vmem:[#allocation2 + $0x1270] sm:$0xff] }
 0x2fe   :  { %v4457_v43 = vpop.f32.mrf.mxu1  ;;  %6586 = vmatprep.subr.bf16.mxu1 %v8941_v62  ;;  %v4915_v62 = vld [vmem:[#allocation2 + $0x1a68] sm:$0xff]  ;;  %v8871_v34 = vcombine.high %v4656_v61, %v4660_v29  ;;  %v4648_v16 = vld [vmem:[#allocation2 + $0x1210] sm:$0xff] }
 0x2ff   :  { %v10001_v47 = vadd.f32 %v4457_v43, %v9990_v52  ;;  %v10003_v48 = vadd.f32 %v4498_v38, %v4456_v7  ;;  %6692 = vmatpush1.bf16.msra.mxu0 %v8910_v35  ;;  %v4927_v52 = vld [vmem:[#allocation2 + $0x1ac8] sm:$0xff]  ;;  %v9125_v28 = vcombine.high %v4911_v32, %v4915_v62  ;;  %v4652_v38 = vld [vmem:[#allocation2 + $0x1230] sm:$0xff] }
 0x300   :  { %v4459_v60 = vpop.f32.mrf.mxu1  ;;  %6693 = vmatprep.subr.bf16.mxu0 %v8903_v59  ;;  %v9141_v17 = vcombine.high %v4927_v52, %v4931_v56  ;;  %v9140_v26 = vcombine.low %v4927_v52, %v4931_v56  ;;  %v4903_v35 = vld [vmem:[#allocation2 + $0x1a08] sm:$0xff]  ;;  %v9124_v59 = vcombine.low %v4911_v32, %v4915_v62  ;;  %v8863_v43 = vcombine.high %v4648_v16, %v4652_v38  ;;  %v4824_v10 = vld [vmem:[#allocation2 + $0x1790] sm:$0xff] }
 0x301   :  { %v10006_v0 = vadd.f32 %v4459_v60, %v9993_v19  ;;  %6587 = vmatpush2.bf16.msra.mxu1 %v8940_v39  ;;  %v4919_v19 = vld [vmem:[#allocation2 + $0x1a88] sm:$0xff]  ;;  %v8870_v39 = vcombine.low %v4656_v61, %v4660_v29  ;;  %v8862_v60 = vcombine.low %v4648_v16, %v4652_v38  ;;  %v4828_v52 = vld [vmem:[#allocation2 + $0x17b0] sm:$0xff]  ;;  %v8982_v56 = vcombine.low %v4768_v57, %v4772_v46 }
 0x302   :  { %6588 = vmatprep.subr.bf16.mxu1 %v8933_v41  ;;  %v9133_v5 = vcombine.high %v4919_v19, %v4923_v21  ;;  %v9132_v31 = vcombine.low %v4919_v19, %v4923_v21  ;;  %v4907_v7 = vld [vmem:[#allocation2 + $0x1a28] sm:$0xff]  ;;  %v4756_v19 = vld [vmem:[#allocation2 + $0x1570] sm:$0xff] }
 0x303   :  { %6694 = vmatpush1.bf16.msra.mxu0 %v8902_v54  ;;  %v9117_v41 = vcombine.high %v4903_v35, %v4907_v7  ;;  %v9116_v54 = vcombine.low %v4903_v35, %v4907_v7  ;;  %v4816_v21 = vld [vmem:[#allocation2 + $0x1750] sm:$0xff] }
 0x304   :  { %6695 = vmatprep.subr.bf16.mxu0 %v8895_v45  ;;  %v9047_v45 = vcombine.high %v4832_v51, %v4836_v42  ;;  %v4820_v22 = vld [vmem:[#allocation2 + $0x1770] sm:$0xff] }
 0x305   :  { %6589 = vmatpush2.bf16.msra.mxu1 %v8932_v3  ;;  %v8983_v3 = vcombine.high %v4768_v57, %v4772_v46  ;;  %v4748_v61 = vld [vmem:[#allocation2 + $0x1530] sm:$0xff] }
 0x306   :  { %6590 = vmatprep.subr.bf16.mxu1 %v8925_v4  ;;  %v4760_v4 = vld [vmem:[#allocation2 + $0x1590] sm:$0xff] }
 0x307   :  { %6696 = vmatpush1.bf16.msra.mxu0 %v8894_v14  ;;  %v9046_v14 = vcombine.low %v4832_v51, %v4836_v42  ;;  %v8974_v24 = vcombine.low %v4760_v4, %v4764_v20  ;;  %v4808_v29 = vld [vmem:[#allocation2 + $0x1710] sm:$0xff] }
 0x308   :  { %6697 = vmatprep.subr.bf16.mxu0 %v8887_v11  ;;  %v9039_v11 = vcombine.high %v4824_v10, %v4828_v52  ;;  %v4812_v32 = vld [vmem:[#allocation2 + $0x1730] sm:$0xff] }
 0x309   :  { %6591 = vmatpush2.bf16.msra.mxu1 %v8924_v13  ;;  %v8975_v13 = vcombine.high %v4760_v4, %v4764_v20  ;;  %v4740_v16 = vld [vmem:[#allocation2 + $0x14f0] sm:$0xff] }
 0x30a   :  { %6654 = vmatprep.subr.bf16.mxu1 %v9141_v17  ;;  %v4752_v17 = vld [vmem:[#allocation2 + $0x1550] sm:$0xff] }
 0x30b   :  { %6698 = vmatpush1.bf16.msra.mxu0 %v8886_v25  ;;  %v9038_v25 = vcombine.low %v4824_v10, %v4828_v52  ;;  %v8966_v62 = vcombine.low %v4752_v17, %v4756_v19  ;;  %v4800_v38 = vld [vmem:[#allocation2 + $0x16d0] sm:$0xff] }
 0x30c   :  { %6593 = vmatmul.mubr.bf16.vlgmr.msra.gmra.mxu1 %v9948_v53  ;;  %6699 = vmatprep.subr.bf16.mxu0 %v8879_v27  ;;  %v4744_v27 = vld [vmem:[#allocation2 + $0x1510] sm:$0xff] }
 0x30d   :  { %6655 = vmatpush1.bf16.msra.mxu1 %v9140_v26  ;;  %6678 = vmatprep.mubr.bf16.mxu1 %v9686_v36  ;;  %v8967_v26 = vcombine.high %v4752_v17, %v4756_v19  ;;  %v4804_v35 = vld [vmem:[#allocation2 + $0x16f0] sm:$0xff]  ;;  %v8958_v7 = vcombine.low %v4744_v27, %v4748_v61 }
 0x30e   :  { %6656 = vmatprep.subr.bf16.mxu1 %v9133_v5  ;;  %v9031_v5 = vcombine.high %v4816_v21, %v4820_v22  ;;  %v4732_v57 = vld [vmem:[#allocation2 + $0x14b0] sm:$0xff] }
 0x30f   :  { %6700 = vmatpush1.bf16.msra.mxu0 %v8878_v15  ;;  %v9030_v15 = vcombine.low %v4816_v21, %v4820_v22  ;;  %v4792_v46 = vld [vmem:[#allocation2 + $0x1690] sm:$0xff] }
 0x310   :  { %6701 = vmatprep.subr.bf16.mxu0 %v8871_v34  ;;  %v9023_v34 = vcombine.high %v4808_v29, %v4812_v32  ;;  %v4796_v51 = vld [vmem:[#allocation2 + $0x16b0] sm:$0xff] }
 0x311   :  { %6657 = vmatpush1.bf16.msra.mxu1 %v9132_v31  ;;  %v8959_v31 = vcombine.high %v4744_v27, %v4748_v61  ;;  %v4724_v4 = vld [vmem:[#allocation2 + $0x1470] sm:$0xff] }
 0x312   :  { %6658 = vmatprep.subr.bf16.mxu1 %v9125_v28  ;;  %v4736_v28 = vld [vmem:[#allocation2 + $0x14d0] sm:$0xff] }
 0x313   :  { %6702 = vmatpush1.bf16.msra.mxu0 %v8870_v39  ;;  %v9022_v39 = vcombine.low %v4808_v29, %v4812_v32  ;;  %v8950_v42 = vcombine.low %v4736_v28, %v4740_v16  ;;  %v4784_v20 = vld [vmem:[#allocation2 + $0x1650] sm:$0xff] }
 0x314   :  { %6703 = vmatprep.subr.bf16.mxu0 %v8863_v43  ;;  %v9015_v43 = vcombine.high %v4800_v38, %v4804_v35  ;;  %v4788_v10 = vld [vmem:[#allocation2 + $0x1670] sm:$0xff] }
 0x315   :  { %6659 = vmatpush1.bf16.msra.mxu1 %v9124_v59  ;;  %v8951_v59 = vcombine.high %v4736_v28, %v4740_v16  ;;  %v4716_v17 = vld [vmem:[#allocation2 + $0x1430] sm:$0xff] }
 0x316   :  { %6660 = vmatprep.subr.bf16.mxu1 %v9117_v41  ;;  %v4728_v41 = vld [vmem:[#allocation2 + $0x1490] sm:$0xff] }
 0x317   :  { %6704 = vmatpush1.bf16.msra.mxu0 %v8862_v60  ;;  %v9014_v60 = vcombine.low %v4800_v38, %v4804_v35  ;;  %v8942_v52 = vcombine.low %v4728_v41, %v4732_v57  ;;  %v4776_v19 = vld [vmem:[#allocation2 + $0x1610] sm:$0xff] }
 0x318   :  { %6705 = vmatprep.subr.bf16.mxu0 %v8983_v3  ;;  %v9007_v3 = vcombine.high %v4792_v46, %v4796_v51  ;;  %v4780_v21 = vld [vmem:[#allocation2 + $0x1630] sm:$0xff] }
 0x319   :  { %6661 = vmatpush1.bf16.msra.mxu1 %v9116_v54  ;;  %v8943_v54 = vcombine.high %v4728_v41, %v4732_v57  ;;  %v4932_v27 = vld [vmem:[#allocation2 + $0x1af0] sm:$0xff] }
 0x31a   :  { %6732 = vmatprep.subr.bf16.mxu1 %v9047_v45  ;;  %v4720_v45 = vld [vmem:[#allocation2 + $0x1450] sm:$0xff] }
 0x31b   :  { %6706 = vmatpush2.bf16.msra.mxu0 %v8982_v56  ;;  %v9006_v56 = vcombine.low %v4792_v46, %v4796_v51  ;;  %v8934_v22 = vcombine.low %v4720_v45, %v4724_v4  ;;  %v4896_v61 = vld [vmem:[#allocation2 + $0x19d0] sm:$0xff] }
 0x31c   :  { %9147 = vmatmul.mubr.msk.bf16.vlgmr.msra.gmra.mxu1 %vm2132_vm0, %v9963_v2  ;;  %6707 = vmatprep.subr.bf16.mxu0 %v8975_v13  ;;  %v8999_v13 = vcombine.high %v4784_v20, %v4788_v10  ;;  %v4900_v29 = vld [vmem:[#allocation2 + $0x19f0] sm:$0xff] }
 0x31d   :  { %6733 = vmatpush1.bf16.msra.mxu1 %v9046_v14  ;;  %6764 = vmatprep.mubr.bf16.mxu1 %v9935_v30  ;;  %v8935_v14 = vcombine.high %v4720_v45, %v4724_v4  ;;  %v4924_v28 = vld [vmem:[#allocation2 + $0x1ab0] sm:$0xff] }
 0x31e   :  { %6734 = vmatprep.subr.bf16.mxu1 %v9039_v11  ;;  %v4712_v11 = vld [vmem:[#allocation2 + $0x1410] sm:$0xff] }
 0x31f   :  { %6708 = vmatpush2.bf16.msra.mxu0 %v8974_v24  ;;  %v8998_v24 = vcombine.low %v4784_v20, %v4788_v10  ;;  %v8926_v32 = vcombine.low %v4712_v11, %v4716_v17  ;;  %v4888_v16 = vld [vmem:[#allocation2 + $0x1990] sm:$0xff] }
 0x320   :  { %6709 = vmatprep.subr.bf16.mxu0 %v8967_v26  ;;  %v8991_v26 = vcombine.high %v4776_v19, %v4780_v21  ;;  %v4892_v38 = vld [vmem:[#allocation2 + $0x19b0] sm:$0xff] }
 0x321   :  { %6735 = vmatpush1.bf16.msra.mxu1 %v9038_v25  ;;  %v8927_v25 = vcombine.high %v4712_v11, %v4716_v17  ;;  %v4916_v41 = vld [vmem:[#allocation2 + $0x1a70] sm:$0xff]  ;;  %v4837_v11 = vld [vmem:[#allocation2 + $0x17f8] sm:$0xff] }
 0x322   :  { %6736 = vmatprep.subr.bf16.mxu1 %v9031_v5  ;;  %v4928_v5 = vld [vmem:[#allocation2 + $0x1ad0] sm:$0xff] }
 0x323   :  { %6710 = vmatpush2.bf16.msra.mxu0 %v8966_v62  ;;  %v8990_v62 = vcombine.low %v4776_v19, %v4780_v21  ;;  %v9142_v35 = vcombine.low %v4928_v5, %v4932_v27  ;;  %v4880_v57 = vld [vmem:[#allocation2 + $0x1950] sm:$0xff] }
 0x324   :  { %6711 = vmatprep.subr.bf16.mxu0 %v8959_v31  ;;  %v9111_v31 = vcombine.high %v4896_v61, %v4900_v29  ;;  %v4884_v46 = vld [vmem:[#allocation2 + $0x1970] sm:$0xff] }
 0x325   :  { %6737 = vmatpush1.bf16.msra.mxu1 %v9030_v15  ;;  %v9143_v15 = vcombine.high %v4928_v5, %v4932_v27  ;;  %v4908_v45 = vld [vmem:[#allocation2 + $0x1a30] sm:$0xff]  ;;  %v4829_v5 = vld [vmem:[#allocation2 + $0x17b8] sm:$0xff] }
 0x326   :  { %6738 = vmatprep.subr.bf16.mxu1 %v9023_v34  ;;  %v4920_v34 = vld [vmem:[#allocation2 + $0x1a90] sm:$0xff] }
 0x327   :  { %6712 = vmatpush2.bf16.msra.mxu0 %v8958_v7  ;;  %v9110_v7 = vcombine.low %v4896_v61, %v4900_v29  ;;  %v9134_v51 = vcombine.low %v4920_v34, %v4924_v28  ;;  %v4872_v4 = vld [vmem:[#allocation2 + $0x1910] sm:$0xff] }
 0x328   :  { %6713 = vmatprep.subr.bf16.mxu0 %v8951_v59  ;;  %v9103_v59 = vcombine.high %v4888_v16, %v4892_v38  ;;  %v4876_v20 = vld [vmem:[#allocation2 + $0x1930] sm:$0xff] }
 0x329   :  { %6739 = vmatpush1.bf16.msra.mxu1 %v9022_v39  ;;  %v9135_v39 = vcombine.high %v4920_v34, %v4924_v28  ;;  %v4864_v17 = vld [vmem:[#allocation2 + $0x18d0] sm:$0xff]  ;;  %v4821_v34 = vld [vmem:[#allocation2 + $0x1778] sm:$0xff] }
 0x32a   :  { %6740 = vmatprep.subr.bf16.mxu1 %v9015_v43  ;;  %v4912_v43 = vld [vmem:[#allocation2 + $0x1a50] sm:$0xff] }
 0x32b   :  { %6714 = vmatpush2.bf16.msra.mxu0 %v8950_v42  ;;  %v9102_v42 = vcombine.low %v4888_v16, %v4892_v38  ;;  %v9126_v10 = vcombine.low %v4912_v43, %v4916_v41  ;;  %v4868_v19 = vld [vmem:[#allocation2 + $0x18f0] sm:$0xff] }
 0x32c   :  { %6715 = vmatprep.subr.bf16.mxu0 %v8943_v54  ;;  %v9095_v54 = vcombine.high %v4880_v57, %v4884_v46  ;;  %v4856_v27 = vld [vmem:[#allocation2 + $0x1890] sm:$0xff] }
 0x32d   :  { %6741 = vmatpush1.bf16.msra.mxu1 %v9014_v60  ;;  %v9127_v60 = vcombine.high %v4912_v43, %v4916_v41  ;;  %v4860_v61 = vld [vmem:[#allocation2 + $0x18b0] sm:$0xff]  ;;  %v4813_v43 = vld [vmem:[#allocation2 + $0x1738] sm:$0xff] }
 0x32e   :  { %6742 = vmatprep.subr.bf16.mxu1 %v9007_v3  ;;  %v4904_v3 = vld [vmem:[#allocation2 + $0x1a10] sm:$0xff] }
 0x32f   :  { %6716 = vmatpush2.bf16.msra.mxu0 %v8942_v52  ;;  %v9094_v52 = vcombine.low %v4880_v57, %v4884_v46  ;;  %v9118_v21 = vcombine.low %v4904_v3, %v4908_v45  ;;  %v4848_v28 = vld [vmem:[#allocation2 + $0x1850] sm:$0xff] }
 0x330   :  { %6717 = vmatprep.subr.bf16.mxu0 %v8935_v14  ;;  %v9087_v14 = vcombine.high %v4872_v4, %v4876_v20  ;;  %v4852_v16 = vld [vmem:[#allocation2 + $0x1870] sm:$0xff] }
 0x331   :  { %6743 = vmatpush1.bf16.msra.mxu1 %v9006_v56  ;;  %v9119_v56 = vcombine.high %v4904_v3, %v4908_v45  ;;  %v4840_v41 = vld [vmem:[#allocation2 + $0x1810] sm:$0xff]  ;;  %v4705_v3 = vld [vmem:[#allocation2 + $0x13d8] sm:$0xff] }
 0x332   :  { %6744 = vmatprep.subr.bf16.mxu1 %v8999_v13  ;;  %v4833_v13 = vld [vmem:[#allocation2 + $0x17d8] sm:$0xff]  ;;  %v4844_v57 = vld [vmem:[#allocation2 + $0x1830] sm:$0xff] }
 0x333   :  { %6718 = vmatpush2.bf16.msra.mxu0 %v8934_v22  ;;  %v9086_v22 = vcombine.low %v4872_v4, %v4876_v20  ;;  %v9048_v29 = vcombine.low %v4833_v13, %v4837_v11  ;;  %v4709_v45 = vld [vmem:[#allocation2 + $0x13f8] sm:$0xff]  ;;  %v9054_v20 = vcombine.low %v4840_v41, %v4844_v57 }
 0x334   :  { %6719 = vmatprep.subr.bf16.mxu0 %v8927_v25  ;;  %v9079_v25 = vcombine.high %v4864_v17, %v4868_v19 }
 0x335   :  { %6745 = vmatpush1.bf16.msra.mxu1 %v8998_v24  ;;  %v9049_v24 = vcombine.high %v4833_v13, %v4837_v11  ;;  %v4697_v13 = vld [vmem:[#allocation2 + $0x1398] sm:$0xff] }
 0x336   :  { %6746 = vmatprep.subr.bf16.mxu1 %v8991_v26  ;;  %v4825_v26 = vld [vmem:[#allocation2 + $0x1798] sm:$0xff] }
 0x337   :  { %6720 = vmatpush2.bf16.msra.mxu0 %v8926_v32  ;;  %v9078_v32 = vcombine.low %v4864_v17, %v4868_v19  ;;  %v9040_v38 = vcombine.low %v4825_v26, %v4829_v5  ;;  %v4701_v11 = vld [vmem:[#allocation2 + $0x13b8] sm:$0xff]  ;;  %v8920_v19 = vcombine.low %v4705_v3, %v4709_v45 }
 0x338   :  { %6783 = vmatprep.subr.bf16.mxu0 %v9143_v15  ;;  %v9071_v15 = vcombine.high %v4856_v27, %v4860_v61 }
 0x339   :  { %6747 = vmatpush1.bf16.msra.mxu1 %v8990_v62  ;;  %v9041_v62 = vcombine.high %v4825_v26, %v4829_v5  ;;  %v4689_v26 = vld [vmem:[#allocation2 + $0x1358] sm:$0xff] }
 0x33a   :  { %6748 = vmatprep.subr.bf16.mxu1 %v9111_v31  ;;  %6722 = vmatmul.mubr.bf16.vlgmr.msra.gmra.mxu0 %v9948_v53  ;;  %v4817_v31 = vld [vmem:[#allocation2 + $0x1758] sm:$0xff] }
 0x33b   :  { %6784 = vmatpush1.bf16.msra.mxu0 %v9142_v35  ;;  %6807 = vmatprep.mubr.bf16.mxu0 %v9686_v36  ;;  %v9070_v35 = vcombine.low %v4856_v27, %v4860_v61  ;;  %v9032_v46 = vcombine.low %v4817_v31, %v4821_v34  ;;  %v4693_v5 = vld [vmem:[#allocation2 + $0x1378] sm:$0xff]  ;;  %v8912_v61 = vcombine.low %v4697_v13, %v4701_v11 }
 0x33c   :  { %6785 = vmatprep.subr.bf16.mxu0 %v9135_v39  ;;  %v9063_v39 = vcombine.high %v4848_v28, %v4852_v16 }
 0x33d   :  { %6749 = vmatpush2.bf16.msra.mxu1 %v9110_v7  ;;  %v9033_v7 = vcombine.high %v4817_v31, %v4821_v34  ;;  %v4681_v31 = vld [vmem:[#allocation2 + $0x1318] sm:$0xff] }
 0x33e   :  { %6750 = vmatprep.subr.bf16.mxu1 %v9103_v59  ;;  %v4809_v59 = vld [vmem:[#allocation2 + $0x1718] sm:$0xff] }
 0x33f   :  { %6786 = vmatpush1.bf16.msra.mxu0 %v9134_v51  ;;  %v9062_v51 = vcombine.low %v4848_v28, %v4852_v16  ;;  %v9024_v4 = vcombine.low %v4809_v59, %v4813_v43  ;;  %v4685_v34 = vld [vmem:[#allocation2 + $0x1338] sm:$0xff]  ;;  %v8904_v16 = vcombine.low %v4689_v26, %v4693_v5 }
 0x340   :  { %6787 = vmatprep.subr.bf16.mxu0 %v9127_v60  ;;  %v9055_v60 = vcombine.high %v4840_v41, %v4844_v57  ;;  %v8896_v57 = vcombine.low %v4681_v31, %v4685_v34 }
 0x341   :  { %6751 = vmatpush2.bf16.msra.mxu1 %v9102_v42  ;;  %v9025_v42 = vcombine.high %v4809_v59, %v4813_v43  ;;  %v4673_v59 = vld [vmem:[#allocation2 + $0x12d8] sm:$0xff] }
 0x342   :  { %6752 = vmatprep.subr.bf16.mxu1 %v9095_v54  ;;  %v4801_v54 = vld [vmem:[#allocation2 + $0x16d8] sm:$0xff] }
 0x343   :  { %6788 = vmatpush1.bf16.msra.mxu0 %v9126_v10  ;;  %v4677_v43 = vld [vmem:[#allocation2 + $0x12f8] sm:$0xff] }
 0x344   :  { %6789 = vmatprep.subr.bf16.mxu0 %v9119_v56  ;;  %v4793_v56 = vld [vmem:[#allocation2 + $0x1698] sm:$0xff] }
 0x345   :  { %6753 = vmatpush2.bf16.msra.mxu1 %v9094_v52  ;;  %v8921_v52 = vcombine.high %v4705_v3, %v4709_v45  ;;  %v8888_v3 = vcombine.low %v4673_v59, %v4677_v43 }
 0x346   :  { %6754 = vmatprep.subr.bf16.mxu1 %v9087_v14  ;;  %v4797_v14 = vld [vmem:[#allocation2 + $0x16b8] sm:$0xff] }
 0x347   :  { %6790 = vmatpush1.bf16.msra.mxu0 %v9118_v21  ;;  %v9009_v21 = vcombine.high %v4793_v56, %v4797_v14  ;;  %v9008_v27 = vcombine.low %v4793_v56, %v4797_v14  ;;  %v4661_v56 = vld [vmem:[#allocation2 + $0x1278] sm:$0xff] }
 0x348   :  { %6861 = vmatprep.subr.bf16.mxu0 %v9049_v24  ;;  %v4785_v24 = vld [vmem:[#allocation2 + $0x1658] sm:$0xff] }
 0x349   :  { %6755 = vmatpush2.bf16.msra.mxu1 %v9086_v22  ;;  %v8913_v22 = vcombine.high %v4697_v13, %v4701_v11 }
 0x34a   :  { %6756 = vmatprep.subr.bf16.mxu1 %v9079_v25  ;;  %9148 = vmatmul.mubr.msk.bf16.vlgmr.msra.gmra.mxu0 %vm2132_vm0, %v9963_v2  ;;  %v4789_v25 = vld [vmem:[#allocation2 + $0x1678] sm:$0xff] }
 0x34b   :  { %6862 = vmatpush1.bf16.msra.mxu0 %v9048_v29  ;;  %6893 = vmatprep.mubr.bf16.mxu0 %v9935_v30  ;;  %v4805_v30 = vld [vmem:[#allocation2 + $0x16f8] sm:$0xff]  ;;  %v9001_v29 = vcombine.high %v4785_v24, %v4789_v25  ;;  %v9000_v28 = vcombine.low %v4785_v24, %v4789_v25 }
 0x34c   :  { %6863 = vmatprep.subr.bf16.mxu0 %v9041_v62  ;;  %v9017_v10 = vcombine.high %v4801_v54, %v4805_v30  ;;  %v9016_v17 = vcombine.low %v4801_v54, %v4805_v30  ;;  %v4777_v62 = vld [vmem:[#allocation2 + $0x1618] sm:$0xff] }
 0x34d   :  { %6757 = vmatpush2.bf16.msra.mxu1 %v9078_v32  ;;  %v8905_v32 = vcombine.high %v4689_v26, %v4693_v5  ;;  %v4669_v54 = vld [vmem:[#allocation2 + $0x12b8] sm:$0xff] }
 0x34e   :  { %6758 = vmatprep.subr.bf16.mxu1 %v9071_v15  ;;  %v4781_v15 = vld [vmem:[#allocation2 + $0x1638] sm:$0xff] }
 0x34f   :  { %6864 = vmatpush1.bf16.msra.mxu0 %v9040_v38  ;;  %v8993_v38 = vcombine.high %v4777_v62, %v4781_v15  ;;  %v8992_v41 = vcombine.low %v4777_v62, %v4781_v15  ;;  %v4653_v24 = vld [vmem:[#allocation2 + $0x1238] sm:$0xff] }
 0x350   :  { %6865 = vmatprep.subr.bf16.mxu0 %v9033_v7  ;;  %v4897_v7 = vld [vmem:[#allocation2 + $0x19d8] sm:$0xff] }
 0x351   :  { %6759 = vmatpush2.bf16.msra.mxu1 %v9070_v35  ;;  %v8897_v35 = vcombine.high %v4681_v31, %v4685_v34  ;;  %v4773_v62 = vld [vmem:[#allocation2 + $0x15f8] sm:$0xff] }
 0x352   :  { %6760 = vmatprep.subr.bf16.mxu1 %v9063_v39  ;;  %v4901_v39 = vld [vmem:[#allocation2 + $0x19f8] sm:$0xff] }
 0x353   :  { %6866 = vmatpush1.bf16.msra.mxu0 %v9032_v46  ;;  %v8889_v46 = vcombine.high %v4673_v59, %v4677_v43  ;;  %v9112_v30 = vcombine.low %v4897_v7, %v4901_v39 }
 0x354   :  { %6867 = vmatprep.subr.bf16.mxu0 %v9025_v42  ;;  %v4893_v42 = vld [vmem:[#allocation2 + $0x19b8] sm:$0xff] }
 0x355   :  { %6761 = vmatpush2.bf16.msra.mxu1 %v9062_v51  ;;  %v4889_v51 = vld [vmem:[#allocation2 + $0x1998] sm:$0xff] }
 0x356   :  { %6762 = vmatprep.subr.bf16.mxu1 %v9055_v60  ;;  %v4665_v60 = vld [vmem:[#allocation2 + $0x1298] sm:$0xff]  ;;  %v9105_v45 = vcombine.high %v4889_v51, %v4893_v42  ;;  %v9104_v14 = vcombine.low %v4889_v51, %v4893_v42 }
 0x357   :  { %6868 = vmatpush1.bf16.msra.mxu0 %v9024_v4  ;;  %v8881_v4 = vcombine.high %v4665_v60, %v4669_v54  ;;  %v8880_v13 = vcombine.low %v4665_v60, %v4669_v54  ;;  %v4757_v51 = vld [vmem:[#allocation2 + $0x1578] sm:$0xff] }
 0x358   :  { %6869 = vmatprep.subr.bf16.mxu0 %v9017_v10  ;;  %v4885_v10 = vld [vmem:[#allocation2 + $0x1978] sm:$0xff] }
 0x359   :  { %6763 = vmatpush2.bf16.msra.mxu1 %v9054_v20  ;;  %v4881_v20 = vld [vmem:[#allocation2 + $0x1958] sm:$0xff] }
 0x35a   :  { %6818 = vmatprep.subr.bf16.mxu1 %v8921_v52  ;;  %v4657_v52 = vld [vmem:[#allocation2 + $0x1258] sm:$0xff]  ;;  %v9097_v11 = vcombine.high %v4881_v20, %v4885_v10  ;;  %v9096_v25 = vcombine.low %v4881_v20, %v4885_v10 }
 0x35b   :  { %6870 = vmatpush1.bf16.msra.mxu0 %v9016_v17  ;;  %v8873_v17 = vcombine.high %v4657_v52, %v4661_v56  ;;  %v8872_v26 = vcombine.low %v4657_v52, %v4661_v56  ;;  %v4749_v20 = vld [vmem:[#allocation2 + $0x1538] sm:$0xff] }
 0x35c   :  { %6765 = vmatmul.mubr.bf16.vlgmr.msra.gmra.mxu1 %v9982_v12  ;;  %6871 = vmatprep.subr.bf16.mxu0 %v9009_v21  ;;  %v4877_v21 = vld [vmem:[#allocation2 + $0x1938] sm:$0xff] }
 0x35d   :  { %6819 = vmatpush1.bf16.msra.mxu1 %v8920_v19  ;;  %6850 = vmatprep.mubr.bf16.mxu1 %v9902_v33  ;;  %v9113_v33 = vcombine.high %v4897_v7, %v4901_v39  ;;  %v4873_v19 = vld [vmem:[#allocation2 + $0x1918] sm:$0xff] }
 0x35e   :  { %6820 = vmatprep.subr.bf16.mxu1 %v8913_v22  ;;  %v4649_v22 = vld [vmem:[#allocation2 + $0x1218] sm:$0xff]  ;;  %v9089_v5 = vcombine.high %v4873_v19, %v4877_v21  ;;  %v9088_v15 = vcombine.low %v4873_v19, %v4877_v21 }
 0x35f   :  { %6872 = vmatpush1.bf16.msra.mxu0 %v9008_v27  ;;  %v8865_v27 = vcombine.high %v4649_v22, %v4653_v24  ;;  %v8864_v31 = vcombine.low %v4649_v22, %v4653_v24  ;;  %v4765_v7 = vld [vmem:[#allocation2 + $0x15b8] sm:$0xff] }
 0x360   :  { %6873 = vmatprep.subr.bf16.mxu0 %v9001_v29  ;;  %v4869_v29 = vld [vmem:[#allocation2 + $0x18f8] sm:$0xff] }
 0x361   :  { %6821 = vmatpush1.bf16.msra.mxu1 %v8912_v61  ;;  %v4865_v61 = vld [vmem:[#allocation2 + $0x18d8] sm:$0xff] }
 0x362   :  { %6822 = vmatprep.subr.bf16.mxu1 %v8905_v32  ;;  %v4769_v32 = vld [vmem:[#allocation2 + $0x15d8] sm:$0xff]  ;;  %v9081_v34 = vcombine.high %v4865_v61, %v4869_v29  ;;  %v9080_v39 = vcombine.low %v4865_v61, %v4869_v29 }
 0x363   :  { %6874 = vmatpush1.bf16.msra.mxu0 %v9000_v28  ;;  %v8985_v28 = vcombine.high %v4769_v32, %v4773_v62  ;;  %v8984_v59 = vcombine.low %v4769_v32, %v4773_v62  ;;  %v4729_v22 = vld [vmem:[#allocation2 + $0x1498] sm:$0xff] }
 0x364   :  { %6875 = vmatprep.subr.bf16.mxu0 %v8993_v38  ;;  %v4861_v38 = vld [vmem:[#allocation2 + $0x18b8] sm:$0xff] }
 0x365   :  { %6823 = vmatpush1.bf16.msra.mxu1 %v8904_v16  ;;  %v4857_v16 = vld [vmem:[#allocation2 + $0x1898] sm:$0xff] }
 0x366   :  { %6824 = vmatprep.subr.bf16.mxu1 %v8897_v35  ;;  %v4761_v35 = vld [vmem:[#allocation2 + $0x1598] sm:$0xff]  ;;  %v9073_v43 = vcombine.high %v4857_v16, %v4861_v38  ;;  %v9072_v42 = vcombine.low %v4857_v16, %v4861_v38 }
 0x367   :  { %6876 = vmatpush1.bf16.msra.mxu0 %v8992_v41  ;;  %v8977_v41 = vcombine.high %v4761_v35, %v4765_v7  ;;  %v8976_v60 = vcombine.low %v4761_v35, %v4765_v7  ;;  %v4733_v24 = vld [vmem:[#allocation2 + $0x14b8] sm:$0xff] }
 0x368   :  { %6877 = vmatprep.subr.bf16.mxu0 %v9113_v33  ;;  %v4853_v33 = vld [vmem:[#allocation2 + $0x1878] sm:$0xff]  ;;  %v8944_v61 = vcombine.low %v4729_v22, %v4733_v24 }
 0x369   :  { %6825 = vmatpush1.bf16.msra.mxu1 %v8896_v57  ;;  %v4849_v57 = vld [vmem:[#allocation2 + $0x1858] sm:$0xff] }
 0x36a   :  { %6826 = vmatprep.subr.bf16.mxu1 %v8889_v46  ;;  %v4753_v46 = vld [vmem:[#allocation2 + $0x1558] sm:$0xff]  ;;  %v9065_v54 = vcombine.high %v4849_v57, %v4853_v33  ;;  %v9064_v10 = vcombine.low %v4849_v57, %v4853_v33 }
 0x36b   :  { %6878 = vmatpush2.bf16.msra.mxu0 %v9112_v30  ;;  %v8969_v30 = vcombine.high %v4753_v46, %v4757_v51  ;;  %v8968_v52 = vcombine.low %v4753_v46, %v4757_v51  ;;  %v4713_v32 = vld [vmem:[#allocation2 + $0x1418] sm:$0xff] }
 0x36c   :  { %6879 = vmatprep.subr.bf16.mxu0 %v9105_v45  ;;  %v4845_v45 = vld [vmem:[#allocation2 + $0x1838] sm:$0xff] }
 0x36d   :  { %6827 = vmatpush1.bf16.msra.mxu1 %v8888_v3  ;;  %v4841_v3 = vld [vmem:[#allocation2 + $0x1818] sm:$0xff] }
 0x36e   :  { %6828 = vmatprep.subr.bf16.mxu1 %v8881_v4  ;;  %v4745_v4 = vld [vmem:[#allocation2 + $0x1518] sm:$0xff]  ;;  %v9057_v56 = vcombine.high %v4841_v3, %v4845_v45 }
 0x36f   :  { %6880 = vmatpush2.bf16.msra.mxu0 %v9104_v14  ;;  %v8961_v14 = vcombine.high %v4745_v4, %v4749_v20  ;;  %v8960_v19 = vcombine.low %v4745_v4, %v4749_v20  ;;  %v4717_v62 = vld [vmem:[#allocation2 + $0x1438] sm:$0xff] }
 0x370   :  { %6881 = vmatprep.subr.bf16.mxu0 %v9097_v11  ;;  %v4741_v11 = vld [vmem:[#allocation2 + $0x14f8] sm:$0xff]  ;;  %v8928_v16 = vcombine.low %v4713_v32, %v4717_v62 }
 0x371   :  { %6829 = vmatpush1.bf16.msra.mxu1 %v8880_v13  ;;  %v4737_v13 = vld [vmem:[#allocation2 + $0x14d8] sm:$0xff] }
 0x372   :  { %6830 = vmatprep.subr.bf16.mxu1 %v8873_v17  ;;  %v9056_v17 = vcombine.low %v4841_v3, %v4845_v45  ;;  %v8953_v21 = vcombine.high %v4737_v13, %v4741_v11  ;;  %v4921_v35 = vld [vmem:[#allocation2 + $0x1a98] sm:$0xff]  ;;  %v10035_v45 = vpop.f32.mrf.mxu1 }
 0x373   :  { %6882 = vmatpush2.bf16.msra.mxu0 %v9096_v25  ;;  %v8952_v25 = vcombine.low %v4737_v13, %v4741_v11  ;;  %v4925_v7 = vld [vmem:[#allocation2 + $0x1ab8] sm:$0xff] }
 0x374   :  { %6883 = vmatprep.subr.bf16.mxu0 %v9089_v5  ;;  %v4721_v5 = vld [vmem:[#allocation2 + $0x1458] sm:$0xff]  ;;  %v10039_v20 = vpop.f32.mrf.mxu1 }
 0x375   :  { %6831 = vmatpush1.bf16.msra.mxu1 %v8872_v26  ;;  %v8945_v26 = vcombine.high %v4729_v22, %v4733_v24  ;;  %v4905_v33 = vld [vmem:[#allocation2 + $0x1a18] sm:$0xff] }
 0x376   :  { %6832 = vmatprep.subr.bf16.mxu1 %v8865_v27  ;;  %v4725_v27 = vld [vmem:[#allocation2 + $0x1478] sm:$0xff] }
 0x377   :  { %6884 = vmatpush2.bf16.msra.mxu0 %v9088_v15  ;;  %v8937_v29 = vcombine.high %v4721_v5, %v4725_v27  ;;  %v8936_v15 = vcombine.low %v4721_v5, %v4725_v27  ;;  %v4909_v46 = vld [vmem:[#allocation2 + $0x1a38] sm:$0xff] }
 0x378   :  { %6885 = vmatprep.subr.bf16.mxu0 %v9081_v34  ;;  %v4929_v34 = vld [vmem:[#allocation2 + $0x1ad8] sm:$0xff] }
 0x379   :  { %6833 = vmatpush1.bf16.msra.mxu1 %v8864_v31  ;;  %v8929_v31 = vcombine.high %v4713_v32, %v4717_v62  ;;  %v9453_v13 = vld [vmem:[#allocation7 + $0x78] sm:$0xff]   ;;  %v9457_v24 = vld [vmem:[#allocation7 + $0x70] sm:$0xff]   ;;  %v9462_v62 = vld [vmem:[#allocation7 + $0x28] sm:$0xff]  }
 0x37a   :  { %6834 = vmatprep.subr.bf16.mxu1 %v8985_v28  ;;  %v4933_v28 = vld [vmem:[#allocation2 + $0x1af8] sm:$0xff] }
 0x37b   :  { %6886 = vmatpush2.bf16.msra.mxu0 %v9080_v39  ;;  %v9145_v38 = vcombine.high %v4929_v34, %v4933_v28  ;;  %v9137_v39 = vcombine.high %v4921_v35, %v4925_v7  ;;  %v9454_v11 = vld [vmem:[#allocation7 + $0x38] sm:$0xff]   ;;  %v9460_v27 = vld [vmem:[#allocation7 + $0xb0] sm:$0xff]  }
 0x37c   :  { %6887 = vmatprep.subr.bf16.mxu0 %v9073_v43  ;;  %v4917_v43 = vld [vmem:[#allocation2 + $0x1a78] sm:$0xff] }
 0x37d   :  { %6835 = vmatpush2.bf16.msra.mxu1 %v8984_v59  ;;  %v4913_v59 = vld [vmem:[#allocation2 + $0x1a58] sm:$0xff] }
 0x37e   :  { %6836 = vmatprep.subr.bf16.mxu1 %v8977_v41  ;;  %v9136_v41 = vcombine.low %v4921_v35, %v4925_v7  ;;  %v9129_v57 = vcombine.high %v4913_v59, %v4917_v43  ;;  %v9128_v51 = vcombine.low %v4913_v59, %v4917_v43  ;;  %v9456_v22 = vld [vmem:[#allocation7 + $0xb8] sm:$0xff]   ;;  %v9467_v35 = vld [vmem:[#allocation7 + $0xe0] sm:$0xff]  }
 0x37f   :  { %6888 = vmatpush2.bf16.msra.mxu0 %v9072_v42  ;;  %v9121_v42 = vcombine.high %v4905_v33, %v4909_v46  ;;  %v9470_v43 = vld [vmem:[#allocation7 + $0x18] sm:$0xff]  }
 0x380   :  { %6889 = vmatprep.subr.bf16.mxu0 %v9065_v54 }
 0x381   :  { %6837 = vmatpush2.bf16.msra.mxu1 %v8976_v60  ;;  %v9120_v60 = vcombine.low %v4905_v33, %v4909_v46  ;;  %v9472_v46 = vld [vmem:[#allocation7 + $0x98] sm:$0xff]  }
 0x382   :  { %6838 = vmatprep.subr.bf16.mxu1 %v8969_v30 }
 0x383   :  { %6890 = vmatpush2.bf16.msra.mxu0 %v9064_v10 }
 0x384   :  { %6891 = vmatprep.subr.bf16.mxu0 %v9057_v56 }
 0x385   :  { %6839 = vmatpush2.bf16.msra.mxu1 %v8968_v52  ;;  %v10043_v52 = vpop.f32.mrf.mxu1 }
 0x386   :  { %6840 = vmatprep.subr.bf16.mxu1 %v8961_v14 }
 0x387   :  { %6892 = vmatpush2.bf16.msra.mxu0 %v9056_v17  ;;  %v10047_v56 = vpop.f32.mrf.mxu1  ;;  %v9455_v17 = vld [vmem:[#allocation7 + $0xf8] sm:$0xff]  }
 0x388   :  { %9263 = vmatprep.subr.bf16.mxu0 %v9455_v17  ;;  %v9476_v17 = vld [vmem:[#allocation7 + $0x90] sm:$0xff]  }
 0x389   :  { %6841 = vmatpush2.bf16.msra.mxu1 %v8960_v19  ;;  %v10051_v19 = vpop.f32.mrf.mxu1 }
 0x38a   :  { %6842 = vmatprep.subr.bf16.mxu1 %v8953_v21  ;;  %6894 = vmatmul.mubr.bf16.vlgmr.msra.gmra.mxu0 %v9982_v12  ;;  %v9144_v12 = vcombine.low %v4929_v34, %v4933_v28  ;;  %v9464_v34 = vld [vmem:[#allocation7 + $0xa8] sm:$0xff]   ;;  %v9465_v28 = vld [vmem:[#allocation7 + $0x60] sm:$0xff]  }
 0x38b   :  { %v10055_v5 = vpop.f32.mrf.mxu1  ;;  %9264 = vmatpush3.bf16.msra.mxu0 %v9456_v22  ;;  %v9477_v22 = vld [vmem:[#allocation7 + $0x48] sm:$0xff]  }
 0x38d   :  { %6843 = vmatpush2.bf16.msra.mxu1 %v8952_v25  ;;  %v9458_v25 = vld [vmem:[#allocation7 + $0x30] sm:$0xff]  }
 0x38e   :  { %6844 = vmatprep.subr.bf16.mxu1 %v8945_v26  ;;  %v9459_v26 = vld [vmem:[#allocation7 + $0xf0] sm:$0xff]  }
 0x38f   :  { %9265 = vmatprep.subr.bf16.mxu0 %v9459_v26  ;;  %v9479_v26 = vld [vmem:[#allocation7 + $0xc8] sm:$0xff]  }
 0x390   :  { %9266 = vmatpush3.bf16.msra.mxu0 %v9460_v27 }
 0x391   :  { %6845 = vmatpush2.bf16.msra.mxu1 %v8944_v61  ;;  %v9461_v61 = vld [vmem:[#allocation7 + $0x68] sm:$0xff]  }
 0x392   :  { %6846 = vmatprep.subr.bf16.mxu1 %v8937_v29  ;;  %v9463_v29 = vld [vmem:[#allocation7 + $0xe8] sm:$0xff]  }
 0x393   :  { %9267 = vmatprep.subr.bf16.mxu0 %v9463_v29  ;;  %v9481_v29 = vld [vmem:[#allocation7 + $0x40] sm:$0xff]  }
 0x394   :  { %9268 = vmatpush3.bf16.msra.mxu0 %v9464_v34  ;;  %v9482_v34 = vld [vmem:[#allocation7] sm:$0xff]  }
 0x395   :  { %6847 = vmatpush2.bf16.msra.mxu1 %v8936_v15  ;;  %v10059_v15 = vpop.f32.mrf.mxu1  ;;  %9269 = vmatprep.subr.bf16.mxu0 %v9467_v35  ;;  %v9484_v35 = vld [vmem:[#allocation7 + $0x80] sm:$0xff]  }
 0x396   :  { %6848 = vmatprep.subr.bf16.mxu1 %v8929_v31 }
 0x399   :  { %6849 = vmatpush2.bf16.msra.mxu1 %v8928_v16  ;;  %v10063_v16 = vpop.f32.mrf.mxu1 }
 0x39a   :  { %6912 = vmatprep.subr.bf16.mxu1 %v9145_v38  ;;  %10214 = vst [vmem:[#allocation19_spill] sm:$0xff] %v10063_v16  ;;  %v9466_v38 = vld [vmem:[#allocation7 + $0x20] sm:$0xff]  }
 0x39b   :  { %v10067_v59 = vpop.f32.mrf.mxu1 }
 0x39c   :  { %6851 = vmatmul.mubr.bf16.vlgmr.msra.gmra.mxu1 %v9948_v53  ;;  %v10025_v53 = vpop.f32.mrf.mxu0  ;;  %10215 = vst [vmem:[#allocation20_spill] sm:$0xff] %v10067_v59 }
 0x39d   :  { %6913 = vmatpush1.bf16.msra.mxu1 %v9144_v12  ;;  %6936 = vmatprep.mubr.bf16.mxu1 %v9686_v36  ;;  %v9468_v12 = vld [vmem:[#allocation7 + $0xa0] sm:$0xff]  }
 0x39e   :  { %6914 = vmatprep.subr.bf16.mxu1 %v9137_v39  ;;  %v10027_v54 = vpop.f32.mrf.mxu0  ;;  %v9469_v39 = vld [vmem:[#allocation7 + $0x58] sm:$0xff]   ;;  %9270 = vmatpush3.bf16.msra.mxu0 %v9468_v12 }
 0x39f   :  { %v9485_v12 = vld [vmem:[#allocation7 + $0x1f8] sm:$0xff]  }
 0x3a0   :  { %v10029_v36 = vpop.f32.mrf.mxu0 }
 0x3a1   :  { %6915 = vmatpush1.bf16.msra.mxu1 %v9136_v41  ;;  %v9471_v41 = vld [vmem:[#allocation7 + $0xd8] sm:$0xff]  }
 0x3a2   :  { %6916 = vmatprep.subr.bf16.mxu1 %v9129_v57  ;;  %v10031_v30 = vpop.f32.mrf.mxu0  ;;  %v6508_v57 = vpop.f32.mrf.mxu1  ;;  %9271 = vmatprep.subr.bf16.mxu0 %v9471_v41  ;;  %v9487_v41 = vld [vmem:[#allocation7 + $0x178] sm:$0xff]  }
 0x3a3   :  { %9272 = vmatpush3.bf16.msra.mxu0 %v9472_v46 }
 0x3a4   :  { %v10033_v3 = vpop.f32.mrf.mxu0 }
 0x3a5   :  { %6917 = vmatpush1.bf16.msra.mxu1 %v9128_v51  ;;  %v9473_v51 = vld [vmem:[#allocation7 + $0x50] sm:$0xff]  }
 0x3a6   :  { %6918 = vmatprep.subr.bf16.mxu1 %v9121_v42  ;;  %v10037_v4 = vpop.f32.mrf.mxu0  ;;  %v9474_v42 = vld [vmem:[#allocation7 + $0x10] sm:$0xff]  }
 0x3a8   :  { %v10041_v10 = vpop.f32.mrf.mxu0 }
 0x3a9   :  { %6919 = vmatpush1.bf16.msra.mxu1 %v9120_v60  ;;  %v9475_v60 = vld [vmem:[#allocation7 + $0xd0] sm:$0xff]  }
 0x3aa   :  { %9285 = vmatprep.subr.bf16.mxu1 %v9453_v13  ;;  %v6510_v13 = vpop.f32.mrf.mxu1  ;;  %9273 = vmatprep.subr.bf16.mxu0 %v9475_v60 }
 0x3ab   :  { %9274 = vmatpush3.bf16.msra.mxu0 %v9476_v17 }
 0x3ac   :  { %9149 = vmatmul.mubr.msk.bf16.vlgmr.msra.gmra.mxu1 %vm2132_vm0, %v9963_v2  ;;  %v10045_v2 = vpop.f32.mrf.mxu0  ;;  %v6512_v27 = vpop.f32.mrf.mxu1  ;;  %9275 = vmatprep.subr.bf16.mxu0 %v9479_v26 }
 0x3ad   :  { %9286 = vmatpush3.bf16.msra.mxu1 %v9454_v11 }
 0x3ae   :  { %v10049_v14 = vpop.f32.mrf.mxu0  ;;  %9287 = vmatprep.subr.bf16.mxu1 %v9457_v24 }
 0x3b0   :  { %v10053_v21 = vpop.f32.mrf.mxu0 }
 0x3b1   :  { %9288 = vmatpush3.bf16.msra.mxu1 %v9458_v25  ;;  %v9478_v25 = vld [vmem:[#allocation7 + $0x8] sm:$0xff]   ;;  %v6513_v58 = vadd.f32 %v6512_v27, %v10053_v21 }
 0x3b2   :  { %v10057_v32 = vpop.f32.mrf.mxu0  ;;  %9289 = vmatprep.subr.bf16.mxu1 %v9461_v61  ;;  %v9480_v61 = vld [vmem:[#allocation7 + $0x88] sm:$0xff]  }
 0x3b3   :  { %9276 = vmatpush3.bf16.msra.mxu0 %v9480_v61 }
 0x3b4   :  { %v10061_v31 = vpop.f32.mrf.mxu0 }
 0x3b5   :  { %9290 = vmatpush3.bf16.msra.mxu1 %v9462_v62 }
 0x3b6   :  { %9291 = vmatprep.subr.bf16.mxu1 %v9465_v28  ;;  %v10065_v7 = vpop.f32.mrf.mxu0  ;;  %v9483_v28 = vld [vmem:[#allocation7 + $0xc0] sm:$0xff]  }
 0x3b7   :  { %9277 = vmatprep.subr.bf16.mxu0 %v9483_v28 }
 0x3b8   :  { %v10069_v33 = vpop.f32.mrf.mxu0  ;;  %9278 = vmatpush3.bf16.msra.mxu0 %v9484_v35  ;;  %v6509_v35 = vadd.f32 %v6508_v57, %v10045_v2 }
 0x3b9   :  { %9292 = vmatpush3.bf16.msra.mxu1 %v9466_v38  ;;  %v6514_v38 = vpop.f32.mrf.mxu1  ;;  %9307 = vmatprep.subr.bf16.mxu0 %v9487_v41 }
 0x3ba   :  { %9293 = vmatprep.subr.bf16.mxu1 %v9469_v39  ;;  %v10071_v11 = vpop.f32.mrf.mxu0  ;;  %v6552_v8 = vadd.f32 %v10061_v31, %v6509_v35 }
 0x3bc   :  { %v10073_v24 = vpop.f32.mrf.mxu0  ;;  %v10109_v35 = vadd.f32 %v6552_v8, %v9910_v55 }
 0x3bd   :  { %9294 = vmatpush3.bf16.msra.mxu1 %v9470_v43 }
 0x3be   :  { %9295 = vmatprep.subr.bf16.mxu1 %v9473_v51  ;;  %v10075_v62 = vpop.f32.mrf.mxu0 }
 0x3c0   :  { %v10079_v43 = vpop.f32.mrf.mxu0 }
 0x3c1   :  { %9296 = vmatpush3.bf16.msra.mxu1 %v9474_v42 }
 0x3c2   :  { %9297 = vmatprep.subr.bf16.mxu1 %v9477_v22  ;;  %v10083_v51 = vpop.f32.mrf.mxu0 }
 0x3c3   :  { %10216 = vst [vmem:[#allocation21_spill] sm:$0xff] %v10083_v51  ;;  %v4419_v51 = vadd.f32 %v9995_v63, %v9853_v9 }
 0x3c5   :  { %9298 = vmatpush3.bf16.msra.mxu1 %v9478_v25  ;;  %v4462_v31 = vadd.f32 %v10035_v45, %v4419_v51 }
 0x3c6   :  { %9299 = vmatprep.subr.bf16.mxu1 %v9481_v29 }
 0x3c9   :  { %9300 = vmatpush3.bf16.msra.mxu1 %v9482_v34 }
 0x3ca   :  { %9329 = vmatprep.subr.bf16.mxu1 %v9485_v12  ;;  %v6511_v12 = vadd.f32 %v6510_v13, %v10049_v14  ;;  %v4501_v13 = vadd.f32 %v10025_v53, %v10001_v47 }
 0x3cc   :  { %v10077_v39 = vpop.f32.mrf.mxu1 }
 0x3ce   :  { %v10081_v46 = vpop.f32.mrf.mxu1 }
 0x3d0   :  { %v10085_v60 = vpop.f32.mrf.mxu1 }
 0x3d2   :  { %v10087_v22 = vpop.f32.mrf.mxu1 }
 0x3d3   :  { %10217 = vst [vmem:[#allocation22_spill] sm:$0xff] %v10087_v22  ;;  %v6554_v22 = vadd.f32 %v10065_v7, %v6511_v12  ;;  %v4505_v7 = vadd.f32 %v10029_v36, %v4462_v31  ;;  %v6638_v12 = vadd.f32 %v10073_v24, %v10077_v39 }
 0x3dc   :  { %v10089_v25 = vpop.f32.mrf.mxu1 }
 0x3de   :  { %v10091_v61 = vpop.f32.mrf.mxu1 }
 0x3e0   :  { %v10093_v34 = vpop.f32.mrf.mxu1 }
 0x3e1   :  { %10218 = vst [vmem:[#allocation23_spill] sm:$0xff] %v10093_v34  ;;  %v6515_v34 = vadd.f32 %v6514_v38, %v10057_v32 }
 0x3e2   :  { %v10097_v41 = vpop.f32.mrf.mxu1 }
 0x3e3   :  { %v6558_v47 = vadd.f32 %v10071_v11, %v6515_v34 }
 0x3fa   :  { %v6723_v42 = vpop.f32.mrf.mxu0 }
 0x3fc   :  { %v6725_v17 = vpop.f32.mrf.mxu0 }
 0x3fe   :  { %v6727_v26 = vpop.f32.mrf.mxu0 }
 0x400   :  { %v6729_v29 = vpop.f32.mrf.mxu0 }
 0x40a   :  { %v6809_v28 = vpop.f32.mrf.mxu0 }
 0x40c   :  { %v6811_v40 = vpop.f32.mrf.mxu0 }
 0x40e   :  { %v6813_v2 = vpop.f32.mrf.mxu0 }
 0x410   :  { %v6815_v45 = vpop.f32.mrf.mxu0 }
 0x41c   :  { %v6766_v59 = vpop.f32.mrf.mxu1 }
 0x41d   :  { %v6767_v23 = vadd.f32 %v6766_v59, %v6723_v42  ;;  %v6556_v59 = vadd.f32 %v10069_v33, %v6513_v58  ;;  %v10134_v33 = vadd.f32 %v6558_v47, %v9918_v50  ;;  %v4544_v50 = vadd.f32 %v10043_v52, %v9869_v44 }
 0x41e   :  { %v6768_v16 = vpop.f32.mrf.mxu1  ;;  %v6640_v44 = vadd.f32 %v10075_v62, %v10081_v46  ;;  %v10219_v46 = vld [vmem:[#allocation19_spill] sm:$0xff] }
 0x41f   :  { %v6769_v57 = vadd.f32 %v6768_v16, %v6725_v17  ;;  %v6810_v14 = vadd.f32 %v6809_v28, %v6767_v23  ;;  %v4503_v16 = vadd.f32 %v10027_v54, %v10006_v0  ;;  %v10118_v23 = vadd.f32 %v6554_v22, %v9913_v6 }
 0x420   :  { %v6770_v21 = vpop.f32.mrf.mxu1  ;;  %v4542_v22 = vadd.f32 %v10039_v20, %v9867_v37  ;;  %v4548_v28 = vadd.f32 %v10051_v19, %v9873_v1  ;;  %v6971_v37 = vld [vmem:[#allocation5] sm:$0xf] }
 0x421   :  { %v10113_v9 = vadd.f32 %v6810_v14, %v10003_v48  ;;  %v6771_v63 = vadd.f32 %v6770_v21, %v6727_v26  ;;  %v6812_v32 = vadd.f32 %v6811_v40, %v6769_v57  ;;  %v10127_v40 = vadd.f32 %v6556_v59, %v9916_v18 }
 0x422   :  { %v6772_v53 = vpop.f32.mrf.mxu1  ;;  %v6973_v18 = vlaneseq  ;;  %v4546_v26 = vadd.f32 %v10047_v56, %v9871_v49  ;;  %v4585_v57 = vadd.f32 %v10031_v30, %v4542_v22  ;;  %v4587_v14 = vadd.f32 %v10033_v3, %v4544_v50 }
 0x423   :  { %v6963_v55 = vmax.f32 %v10109_v35, %v10113_v9  ;;  %v10123_v8 = vadd.f32 %v6812_v32, %v4501_v13  ;;  %v6773_v58 = vadd.f32 %v6772_v53, %v6729_v29  ;;  %v6814_v48 = vadd.f32 %v6813_v2, %v6771_v63  ;;  %v10220_v9 = vld [vmem:[#allocation22_spill] sm:$0xff] }
 0x424   :  { %v6974_v17 = vshrl.u32 %v6973_v18, 7  ;;  %v4589_v20 = vadd.f32 %v10037_v4, %v4546_v26  ;;  %v6681_v49 = vadd.f32 %v10089_v25, %v6638_v12  ;;  %v4591_v1 = vadd.f32 %v10041_v10, %v4548_v28  ;;  %v10221_v10 = vld [vmem:[#allocation21_spill] sm:$0xff]  ;;  %v10225_v26 = vld [vmem:[#allocation20_spill] sm:$0xff] }
 0x425   :  { %v6964_v6 = vmax.f32 %v10118_v23, %v10123_v8  ;;  %v10131_v0 = vadd.f32 %v6814_v48, %v4503_v16  ;;  %v6816_v54 = vadd.f32 %v6815_v45, %v6773_v58  ;;  %v4628_v19 = vadd.f32 %v10055_v5, %v4585_v57  ;;  %v10222_v5 = vld [vmem:[#allocation15_spill] sm:$0xff]  ;;  %v10226_v28 = vld [vmem:[#allocation17_spill] sm:$0xff] }
 0x426   :  { %v6975_v2 = vsub.s32 0, %v6974_v17  ;;  %v6979_v52 = vsub.s32 1, %v6974_v17  ;;  %v6983_v39 = vsub.s32 2, %v6974_v17  ;;  %v6642_v30 = vadd.f32 %v10079_v43, %v10085_v60  ;;  %v10223_v16 = vld [vmem:[#allocation23_spill] sm:$0xff] }
 0x427   :  { %v6967_v11 = vmax.f32 %v10127_v40, %v10131_v0  ;;  %v10138_v27 = vadd.f32 %v6816_v54, %v4505_v7  ;;  %v6683_v3 = vadd.f32 %v10091_v61, %v6640_v44  ;;  %v6987_v35 = vsub.s32 3, %v6974_v17  ;;  %v10224_v7 = vld [vmem:[#allocation16_spill] sm:$0xff] }
 0x428   :  { %v6976_v4 = vrot.slane %v6971_v37, %v6975_v2  ;;  %v4630_v62 = vadd.f32 %v10059_v15, %v4587_v14  ;;  %v4632_v25 = vadd.f32 %v10219_v46, %v4589_v20  ;;  %v6644_v63 = vadd.f32 %v10221_v10, %v10220_v9  ;;  %v9491_v9 = vld [vmem:[#allocation7 + $0x170] sm:$0xff]  }
 0x429   :  { %v6968_v36 = vmax.f32 %v10134_v33, %v10138_v27  ;;  %v6949_v32 = vadd.f32 %v6681_v49, %v10222_v5  ;;  %v6685_v47 = vadd.f32 %v10223_v16, %v6642_v30  ;;  %v6980_v53 = vrot.slane %v6971_v37, %v6979_v52  ;;  %v9493_v5 = vld [vmem:[#allocation7 + $0x1e8] sm:$0xff]  }
 0x42a   :  { %v6984_v58 = vrot.slane %v6971_v37, %v6983_v39  ;;  %v6950_v15 = vadd.f32 %v6683_v3, %v10224_v7  ;;  %v6687_v54 = vadd.f32 %v10097_v41, %v6644_v63  ;;  %v6988_v18 = vrot.slane %v6971_v37, %v6987_v35  ;;  %v9490_v63 = vld [vmem:[#allocation7 + $0x1b0] sm:$0xff]   ;;  %v9495_v16 = vld [vmem:[#allocation7 + $0x168] sm:$0xff]   ;;  %v9502_v7 = vld [vmem:[#allocation7 + $0x198] sm:$0xff]  }
 0x42b   :  { %v6957_v12 = vadd.f32 %v6685_v47, %v10226_v28  ;;  %v6997_v49 = vadd.f32 %v6976_v4, %v6967_v11  ;;  %v6998_v23 = vadd.f32 %v6980_v53, %v6968_v36  ;;  %v9488_v36 = vld [vmem:[#allocation7 + $0x138] sm:$0xff]   ;;  %v9494_v47 = vld [vmem:[#allocation7 + $0x1a8] sm:$0xff]   ;;  %v9514_v28 = vld [vmem:[#allocation7 + $0x180] sm:$0xff]  }
 0x42d   :  { %v7005_v30 = vmax.f32 %v6997_v49, 0.0 }
 0x44a   :  { %v6895_v51 = vpop.f32.mrf.mxu0 }
 0x44c   :  { %v6897_v29 = vpop.f32.mrf.mxu0 }
 0x44e   :  { %v6899_v56 = vpop.f32.mrf.mxu0 }
 0x450   :  { %v6901_v43 = vpop.f32.mrf.mxu0 }
 0x45c   :  { %v6852_v38 = vpop.f32.mrf.mxu1 }
 0x45d   :  { %v6896_v24 = vadd.f32 %v6895_v51, %v6852_v38  ;;  %v6993_v38 = vadd.f32 %v6976_v4, %v6963_v55  ;;  %v10227_v55 = vld [vmem:[#allocation18_spill] sm:$0xff] }
 0x45e   :  { %v6854_v42 = vpop.f32.mrf.mxu1  ;;  %v6958_v37 = vadd.f32 %v6687_v54, %v10227_v55  ;;  %v9504_v54 = vld [vmem:[#allocation7 + $0x118] sm:$0xff]  }
 0x45f   :  { %v6898_v21 = vadd.f32 %v6897_v29, %v6854_v42  ;;  %v4634_v29 = vadd.f32 %v10225_v26, %v4591_v1  ;;  %v7001_v44 = vmax.f32 %v6993_v38, 0.0  ;;  %v9507_v38 = vld [vmem:[#allocation7 + $0x150] sm:$0xff]   ;;  %v9512_v26 = vld [vmem:[#allocation7 + $0x108] sm:$0xff]   ;;  %v9520_v55 = vld [vmem:[#allocation7 + $0x238] sm:$0xff]  }
 0x460   :  { %v6856_v34 = vpop.f32.mrf.mxu1 }
 0x461   :  { %v6900_v61 = vadd.f32 %v6899_v56, %v6856_v34  ;;  %v6994_v34 = vadd.f32 %v6980_v53, %v6964_v6  ;;  %v9497_v53 = vld [vmem:[#allocation7 + $0x1e0] sm:$0xff]  }
 0x462   :  { %v6858_v13 = vpop.f32.mrf.mxu1 }
 0x463   :  { %v6902_v42 = vadd.f32 %v6901_v43, %v6858_v13  ;;  %v9496_v43 = vld [vmem:[#allocation7 + $0x128] sm:$0xff]  }
 0x46c   :  { %v6938_v31 = vpop.f32.mrf.mxu1 }
 0x46d   :  { %v6939_v59 = vadd.f32 %v6938_v31, %v6896_v24 }
 0x46e   :  { %v6940_v60 = vpop.f32.mrf.mxu1 }
 0x46f   :  { %v6953_v45 = vadd.f32 %v6939_v59, %v4628_v19  ;;  %v6941_v48 = vadd.f32 %v6940_v60, %v6898_v21  ;;  %v7002_v19 = vmax.f32 %v6994_v34, 0.0  ;;  %v9489_v59 = vld [vmem:[#allocation7 + $0x1f0] sm:$0xff]   ;;  %v9499_v60 = vld [vmem:[#allocation7 + $0x160] sm:$0xff]  }
 0x470   :  { %v6942_v51 = vpop.f32.mrf.mxu1  ;;  %v9516_v34 = vld [vmem:[#allocation7 + $0x100] sm:$0xff]  }
 0x471   :  { %v6965_v17 = vmax.f32 %v6949_v32, %v6953_v45  ;;  %v6954_v22 = vadd.f32 %v6941_v48, %v4630_v62  ;;  %v6943_v50 = vadd.f32 %v6942_v51, %v6900_v61  ;;  %v7006_v62 = vmax.f32 %v6998_v23, 0.0  ;;  %v9492_v32 = vld [vmem:[#allocation7 + $0x130] sm:$0xff]   ;;  %v9498_v61 = vld [vmem:[#allocation7 + $0x1a0] sm:$0xff]   ;;  %v9501_v45 = vld [vmem:[#allocation7 + $0x1d8] sm:$0xff]  }
 0x472   :  { %v6944_v2 = vpop.f32.mrf.mxu1  ;;  %v9503_v48 = vld [vmem:[#allocation7 + $0x158] sm:$0xff]   ;;  %v9509_v51 = vld [vmem:[#allocation7 + $0x1c8] sm:$0xff]   ;;  %v9529_v23 = vld [vmem:[#allocation7 + $0x2e0] sm:$0xff]  }
 0x473   :  { %v6995_v57 = vadd.f32 %v6984_v58, %v6965_v17  ;;  %v6966_v14 = vmax.f32 %v6950_v15, %v6954_v22  ;;  %v6961_v20 = vadd.f32 %v6943_v50, %v4632_v25  ;;  %v6945_v41 = vadd.f32 %v6944_v2, %v6902_v42  ;;  %v9486_v25 = vld [vmem:[#allocation7 + $0x1b8] sm:$0xff]   ;;  %v9505_v15 = vld [vmem:[#allocation7 + $0x1d0] sm:$0xff]   ;;  %v9511_v17 = vld [vmem:[#allocation7 + $0x148] sm:$0xff]  }
 0x474   :  { %v9508_v42 = vld [vmem:[#allocation7 + $0x110] sm:$0xff]   ;;  %v9510_v22 = vld [vmem:[#allocation7 + $0x188] sm:$0xff]   ;;  %v9513_v50 = vld [vmem:[#allocation7 + $0x1c0] sm:$0xff]  }
 0x475   :  { %v7003_v52 = vmax.f32 %v6995_v57, 0.0  ;;  %v6996_v56 = vadd.f32 %v6988_v18, %v6966_v14  ;;  %v6969_v13 = vmax.f32 %v6957_v12, %v6961_v20  ;;  %v6962_v1 = vadd.f32 %v6945_v41, %v4634_v29  ;;  %v9515_v29 = vld [vmem:[#allocation7 + $0x140] sm:$0xff]   ;;  %v9517_v12 = vld [vmem:[#allocation7 + $0x2f8] sm:$0xff]   ;;  %v9521_v20 = vld [vmem:[#allocation7 + $0x2f0] sm:$0xff]  }
 0x476   :  { %v9519_v2 = vld [vmem:[#allocation7 + $0x278] sm:$0xff]  }
 0x477   :  { %v7009_v8 = vmax.f32 %v7001_v44, %v7003_v52  ;;  %v7004_v6 = vmax.f32 %v6996_v56, 0.0  ;;  %v6999_v24 = vadd.f32 %v6984_v58, %v6969_v13  ;;  %v6970_v39 = vmax.f32 %v6958_v37, %v6962_v1  ;;  %v9500_v58 = vld [vmem:[#allocation7 + $0x120] sm:$0xff]   ;;  %v9518_v57 = vld [vmem:[#allocation7 + $0x2b8] sm:$0xff]   ;;  %v9523_v44 = vld [vmem:[#allocation7 + $0x270] sm:$0xff]  }
 0x478   :  { %v9522_v52 = vld [vmem:[#allocation7 + $0x2b0] sm:$0xff]   ;;  %v9525_v56 = vld [vmem:[#allocation7 + $0x2e8] sm:$0xff]  }
 0x479   :  { %v7010_v3 = vmax.f32 %v7002_v19, %v7004_v6  ;;  %v7007_v31 = vmax.f32 %v6999_v24, 0.0  ;;  %v7000_v35 = vadd.f32 %v6988_v18, %v6970_v39  ;;  %v9506_v18 = vld [vmem:[#allocation7 + $0x190] sm:$0xff]   ;;  %v9527_v1 = vld [vmem:[#allocation7 + $0x268] sm:$0xff]   ;;  %v9531_v6 = vld [vmem:[#allocation7 + $0x260] sm:$0xff]  }
 0x47a   :  { %v9524_v13 = vld [vmem:[#allocation7 + $0x230] sm:$0xff]   ;;  %v9526_v19 = vld [vmem:[#allocation7 + $0x2a8] sm:$0xff]   ;;  %v9530_v24 = vld [vmem:[#allocation7 + $0x2a0] sm:$0xff]  }
 0x47b   :  { %v7011_v40 = vmax.f32 %v7005_v30, %v7007_v31  ;;  %v7008_v0 = vmax.f32 %v7000_v35, 0.0  ;;  %v9533_v39 = vld [vmem:[#allocation7 + $0x2d8] sm:$0xff]   ;;  %v9532_v30 = vld [vmem:[#allocation7 + $0x220] sm:$0xff]   ;;  %v9537_v35 = vld [vmem:[#allocation7 + $0x2d0] sm:$0xff]  }
 0x47c   :  { %v9534_v31 = vld [vmem:[#allocation7 + $0x298] sm:$0xff]  }
 0x47d   :  { %v10183_v11 = vpack.c.bf16 %v7011_v40, %v7009_v8  ;;  %v7012_v4 = vmax.f32 %v7006_v62, %v7008_v0  ;;  %v9528_v8 = vld [vmem:[#allocation7 + $0x228] sm:$0xff]   ;;  %v9536_v62 = vld [vmem:[#allocation7 + $0x218] sm:$0xff]   ;;  %v9539_v40 = vld [vmem:[#allocation7 + $0x250] sm:$0xff]  }
 0x47e   :  { %v9538_v0 = vld [vmem:[#allocation7 + $0x290] sm:$0xff]  }
 0x47f   :  { %v10185_v46 = vpack.c.bf16 %v7012_v4, %v7010_v3  ;;  %v7082_v21 = vrot.slane %v10183_v11, 1  ;;  %v7565_v14 = vrot.slane %v10183_v11, 3  ;;  %v7391_v37 = vrot.slane %v10183_v11, 2  ;;  %v9535_v3 = vld [vmem:[#allocation7 + $0x258] sm:$0xff]   ;;  %v9541_v4 = vld [vmem:[#allocation7 + $0x2c8] sm:$0xff]  }
 0x481   :  { %7350 = vmatprep.mubr.bf16.mxu1 %v10185_v46  ;;  %v7083_v33 = vrot.slane %v10185_v46, 1  ;;  %v7566_v27 = vrot.slane %v10185_v46, 3  ;;  %v7392_v10 = vrot.slane %v10185_v46, 2  ;;  %v7914_v41 = vrot.slane %v10185_v46, 5 }
 0x482   :  { %7351 = vmatmul.mubr.bf16.vlgmr.msra.gmra.mxu1 %v10183_v11  ;;  %v7740_v49 = vrot.slane %v10185_v46, 4 }
 0x483   :  { %9330 = vmatpush3.bf16.msra.mxu1 %v9486_v25  ;;  %7214 = vmatprep.mubr.bf16.mxu0 %v7083_v33  ;;  %v9540_v25 = vld [vmem:[#allocation7 + $0x210] sm:$0xff]   ;;  %v9543_v33 = vld [vmem:[#allocation7 + $0x248] sm:$0xff]  }
 0x484   :  { %7697 = vmatprep.mubr.bf16.mxu1 %v7566_v27  ;;  %7215 = vmatmul.mubr.bf16.vlgmr.msra.gmra.mxu0 %v7082_v21  ;;  %v9542_v27 = vld [vmem:[#allocation7 + $0x288] sm:$0xff]  }
 0x485   :  { %9308 = vmatpush3.bf16.msra.mxu0 %v9488_v36  ;;  %7523 = vmatprep.mubr.bf16.mxu0 %v7392_v10  ;;  %v9545_v36 = vld [vmem:[#allocation7 + $0x2c0] sm:$0xff]   ;;  %v9544_v21 = vld [vmem:[#allocation7 + $0x208] sm:$0xff]  }
 0x486   :  { %9331 = vmatprep.subr.bf16.mxu1 %v9489_v59  ;;  %9309 = vmatprep.subr.bf16.mxu0 %v9491_v9  ;;  %v9547_v59 = vld [vmem:[#allocation7 + $0x240] sm:$0xff]  }
 0x487   :  { %9332 = vmatpush3.bf16.msra.mxu1 %v9490_v63  ;;  %v9546_v9 = vld [vmem:[#allocation7 + $0x280] sm:$0xff]   ;;  %v9549_v63 = vld [vmem:[#allocation7 + $0x378] sm:$0xff]  }
 0x488   :  { %9333 = vmatprep.subr.bf16.mxu1 %v9493_v5  ;;  %v9548_v10 = vld [vmem:[#allocation7 + $0x200] sm:$0xff]   ;;  %v7913_v5 = vrot.slane %v10183_v11, 5 }
 0x489   :  { %9310 = vmatpush3.bf16.msra.mxu0 %v9492_v32  ;;  %v9550_v32 = vld [vmem:[#allocation7 + $0x338] sm:$0xff]  }
 0x48a   :  { %9311 = vmatprep.subr.bf16.mxu0 %v9495_v16  ;;  %v7739_v16 = vrot.slane %v10183_v11, 4 }
 0x48b   :  { %9334 = vmatpush3.bf16.msra.mxu1 %v9494_v47  ;;  %v9551_v47 = vld [vmem:[#allocation7 + $0x370] sm:$0xff]  }
 0x48c   :  { %9335 = vmatprep.subr.bf16.mxu1 %v9497_v53  ;;  %v8088_v53 = vrot.slane %v10185_v46, 6  ;;  %v9560_v46 = vld [vmem:[#allocation7 + $0x310] sm:$0xff]  }
 0x48d   :  { %9312 = vmatpush3.bf16.msra.mxu0 %v9496_v43  ;;  %v9552_v43 = vld [vmem:[#allocation7 + $0x330] sm:$0xff]  }
 0x48e   :  { %9313 = vmatprep.subr.bf16.mxu0 %v9499_v60  ;;  %v9553_v60 = vld [vmem:[#allocation7 + $0x368] sm:$0xff]  }
 0x48f   :  { %9336 = vmatpush3.bf16.msra.mxu1 %v9498_v61  ;;  %v9554_v61 = vld [vmem:[#allocation7 + $0x328] sm:$0xff]  }
 0x490   :  { %9337 = vmatprep.subr.bf16.mxu1 %v9501_v45  ;;  %v9555_v45 = vld [vmem:[#allocation7 + $0x360] sm:$0xff]  }
 0x491   :  { %9314 = vmatpush3.bf16.msra.mxu0 %v9500_v58  ;;  %v9556_v58 = vld [vmem:[#allocation7 + $0x320] sm:$0xff]  }
 0x492   :  { %9315 = vmatprep.subr.bf16.mxu0 %v9503_v48  ;;  %v9557_v48 = vld [vmem:[#allocation7 + $0x358] sm:$0xff]  }
 0x493   :  { %9338 = vmatpush3.bf16.msra.mxu1 %v9502_v7  ;;  %v9558_v7 = vld [vmem:[#allocation7 + $0x318] sm:$0xff]  }
 0x494   :  { %9339 = vmatprep.subr.bf16.mxu1 %v9505_v15  ;;  %v9559_v15 = vld [vmem:[#allocation7 + $0x350] sm:$0xff]  }
 0x495   :  { %9316 = vmatpush3.bf16.msra.mxu0 %v9504_v54  ;;  %v9561_v54 = vld [vmem:[#allocation7 + $0x348] sm:$0xff]  }
 0x496   :  { %9317 = vmatprep.subr.bf16.mxu0 %v9507_v38  ;;  %v9562_v38 = vld [vmem:[#allocation7 + $0x308] sm:$0xff]  }
 0x497   :  { %9340 = vmatpush3.bf16.msra.mxu1 %v9506_v18  ;;  %v9563_v18 = vld [vmem:[#allocation7 + $0x340] sm:$0xff]  }
 0x498   :  { %9341 = vmatprep.subr.bf16.mxu1 %v9509_v51  ;;  %v9564_v51 = vld [vmem:[#allocation7 + $0x300] sm:$0xff]  }
 0x499   :  { %9318 = vmatpush3.bf16.msra.mxu0 %v9508_v42  ;;  %v8087_v42 = vrot.slane %v10183_v11, 6 }
 0x49a   :  { %9319 = vmatprep.subr.bf16.mxu0 %v9511_v17 }
 0x49b   :  { %9342 = vmatpush3.bf16.msra.mxu1 %v9510_v22 }
 0x49c   :  { %9343 = vmatprep.subr.bf16.mxu1 %v9513_v50 }
 0x49d   :  { %9320 = vmatpush3.bf16.msra.mxu0 %v9512_v26 }
 0x49e   :  { %9321 = vmatprep.subr.bf16.mxu0 %v9515_v29 }
 0x49f   :  { %9344 = vmatpush3.bf16.msra.mxu1 %v9514_v28 }
 0x4a0   :  { %9373 = vmatprep.subr.bf16.mxu1 %v9517_v12 }
 0x4a1   :  { %9322 = vmatpush3.bf16.msra.mxu0 %v9516_v34 }
 0x4a2   :  { %7698 = vmatmul.mubr.bf16.vlgmr.msra.gmra.mxu1 %v7565_v14  ;;  %9351 = vmatprep.subr.bf16.mxu0 %v9519_v2 }
 0x4a3   :  { %9374 = vmatpush3.bf16.msra.mxu1 %v9518_v57  ;;  %8045 = vmatprep.mubr.bf16.mxu1 %v7914_v41 }
 0x4a4   :  { %7524 = vmatmul.mubr.bf16.vlgmr.msra.gmra.mxu0 %v7391_v37  ;;  %9375 = vmatprep.subr.bf16.mxu1 %v9521_v20 }
 0x4a5   :  { %9352 = vmatpush3.bf16.msra.mxu0 %v9520_v55  ;;  %7871 = vmatprep.mubr.bf16.mxu0 %v7740_v49 }
 0x4a6   :  { %9353 = vmatprep.subr.bf16.mxu0 %v9523_v44 }
 0x4a7   :  { %9376 = vmatpush3.bf16.msra.mxu1 %v9522_v52 }
 0x4a8   :  { %9377 = vmatprep.subr.bf16.mxu1 %v9525_v56 }
 0x4a9   :  { %9354 = vmatpush3.bf16.msra.mxu0 %v9524_v13 }
 0x4aa   :  { %9355 = vmatprep.subr.bf16.mxu0 %v9527_v1 }
 0x4ab   :  { %9378 = vmatpush3.bf16.msra.mxu1 %v9526_v19 }
 0x4ac   :  { %9379 = vmatprep.subr.bf16.mxu1 %v9529_v23 }
 0x4ad   :  { %9356 = vmatpush3.bf16.msra.mxu0 %v9528_v8 }
 0x4ae   :  { %9357 = vmatprep.subr.bf16.mxu0 %v9531_v6 }
 0x4af   :  { %9380 = vmatpush3.bf16.msra.mxu1 %v9530_v24 }
 0x4b0   :  { %9381 = vmatprep.subr.bf16.mxu1 %v9533_v39 }
 0x4b1   :  { %9358 = vmatpush3.bf16.msra.mxu0 %v9532_v30 }
 0x4b2   :  { %9359 = vmatprep.subr.bf16.mxu0 %v9535_v3 }
 0x4b3   :  { %9382 = vmatpush3.bf16.msra.mxu1 %v9534_v31 }
 0x4b4   :  { %9383 = vmatprep.subr.bf16.mxu1 %v9537_v35 }
 0x4b5   :  { %9360 = vmatpush3.bf16.msra.mxu0 %v9536_v62 }
 0x4b6   :  { %9361 = vmatprep.subr.bf16.mxu0 %v9539_v40 }
 0x4b7   :  { %9384 = vmatpush3.bf16.msra.mxu1 %v9538_v0 }
 0x4b8   :  { %9385 = vmatprep.subr.bf16.mxu1 %v9541_v4 }
 0x4b9   :  { %9362 = vmatpush3.bf16.msra.mxu0 %v9540_v25 }
 0x4ba   :  { %9363 = vmatprep.subr.bf16.mxu0 %v9543_v33 }
 0x4bb   :  { %9386 = vmatpush3.bf16.msra.mxu1 %v9542_v27 }
 0x4bc   :  { %9387 = vmatprep.subr.bf16.mxu1 %v9545_v36  ;;  %v9262_v36 = vld [vmem:[#allocation8] ss:$0 sm:$0xff] }
 0x4bd   :  { %9364 = vmatpush3.bf16.msra.mxu0 %v9544_v21 }
 0x4be   :  { %9365 = vmatprep.subr.bf16.mxu0 %v9547_v59 }
 0x4bf   :  { %9388 = vmatpush3.bf16.msra.mxu1 %v9546_v9 }
 0x4c1   :  { %9366 = vmatpush3.bf16.msra.mxu0 %v9548_v10 }
 0x4c2   :  { %8046 = vmatmul.mubr.bf16.vlgmr.msra.gmra.mxu1 %v7913_v5  ;;  %9395 = vmatprep.subr.bf16.mxu0 %v9549_v63 }
 0x4c4   :  { %7872 = vmatmul.mubr.bf16.vlgmr.msra.gmra.mxu0 %v7739_v16 }
 0x4c5   :  { %9396 = vmatpush3.bf16.msra.mxu0 %v9550_v32  ;;  %8219 = vmatprep.mubr.bf16.mxu0 %v8088_v53 }
 0x4c6   :  { %9397 = vmatprep.subr.bf16.mxu0 %v9551_v47 }
 0x4c9   :  { %9398 = vmatpush3.bf16.msra.mxu0 %v9552_v43 }
 0x4ca   :  { %9399 = vmatprep.subr.bf16.mxu0 %v9553_v60 }
 0x4cd   :  { %9400 = vmatpush3.bf16.msra.mxu0 %v9554_v61 }
 0x4ce   :  { %9401 = vmatprep.subr.bf16.mxu0 %v9555_v45 }
 0x4d1   :  { %9402 = vmatpush3.bf16.msra.mxu0 %v9556_v58 }
 0x4d2   :  { %9403 = vmatprep.subr.bf16.mxu0 %v9557_v48 }
 0x4d5   :  { %9404 = vmatpush3.bf16.msra.mxu0 %v9558_v7 }
 0x4d6   :  { %9405 = vmatprep.subr.bf16.mxu0 %v9559_v15 }
 0x4d9   :  { %9406 = vmatpush3.bf16.msra.mxu0 %v9560_v46 }
 0x4da   :  { %9407 = vmatprep.subr.bf16.mxu0 %v9561_v54 }
 0x4dd   :  { %9408 = vmatpush3.bf16.msra.mxu0 %v9562_v38 }
 0x4de   :  { %9409 = vmatprep.subr.bf16.mxu0 %v9563_v18 }
 0x4e1   :  { %9410 = vmatpush3.bf16.msra.mxu0 %v9564_v51 }
 0x4e4   :  { %8220 = vmatmul.mubr.bf16.vlgmr.msra.gmra.mxu0 %v8087_v42 }
 0x542   :  { %v9301_v17 = vpop.f32.mrf.mxu1 }
 0x544   :  { %v9279_v22 = vpop.f32.mrf.mxu0  ;;  %v9302_v50 = vpop.f32.mrf.mxu1 }
 0x545   :  { %v9303_v26 = vadd.f32 %v9302_v50, %v9301_v17 }
 0x546   :  { %v9280_v29 = vpop.f32.mrf.mxu0  ;;  %v9304_v28 = vpop.f32.mrf.mxu1 }
 0x547   :  { %v9281_v12 = vadd.f32 %v9280_v29, %v9279_v22 }
 0x548   :  { %v9282_v34 = vpop.f32.mrf.mxu0  ;;  %v9305_v2 = vpop.f32.mrf.mxu1 }
 0x549   :  { %v7353_v57 = vadd.f32 %v9303_v26, %v9281_v12 }
 0x54a   :  { %v9283_v14 = vpop.f32.mrf.mxu0 }
 0x562   :  { %v9345_v20 = vpop.f32.mrf.mxu1 }
 0x564   :  { %v9323_v41 = vpop.f32.mrf.mxu0  ;;  %v9346_v55 = vpop.f32.mrf.mxu1 }
 0x565   :  { %v9347_v3 = vadd.f32 %v9346_v55, %v9345_v20 }
 0x566   :  { %v9324_v37 = vpop.f32.mrf.mxu0  ;;  %v9348_v44 = vpop.f32.mrf.mxu1 }
 0x567   :  { %v9325_v39 = vadd.f32 %v9324_v37, %v9323_v41 }
 0x568   :  { %v9326_v49 = vpop.f32.mrf.mxu0  ;;  %v9349_v52 = vpop.f32.mrf.mxu1 }
 0x569   :  { %v7531_v30 = vadd.f32 %v9325_v39, %v7353_v57 }
 0x56a   :  { %v9327_v11 = vpop.f32.mrf.mxu0 }
 0x56b   :  { %v7705_v35 = vadd.f32 %v9347_v3, %v7531_v30 }
 0x582   :  { %v9389_v56 = vpop.f32.mrf.mxu1 }
 0x584   :  { %v9367_v13 = vpop.f32.mrf.mxu0  ;;  %v9390_v1 = vpop.f32.mrf.mxu1 }
 0x585   :  { %v9391_v0 = vadd.f32 %v9390_v1, %v9389_v56 }
 0x586   :  { %v9368_v19 = vpop.f32.mrf.mxu0  ;;  %v9392_v23 = vpop.f32.mrf.mxu1 }
 0x587   :  { %v9369_v31 = vadd.f32 %v9368_v19, %v9367_v13 }
 0x588   :  { %v9370_v8 = vpop.f32.mrf.mxu0  ;;  %v9393_v6 = vpop.f32.mrf.mxu1 }
 0x589   :  { %v7879_v62 = vadd.f32 %v9369_v31, %v7705_v35 }
 0x58a   :  { %v9371_v24 = vpop.f32.mrf.mxu0 }
 0x58b   :  { %v8053_v25 = vadd.f32 %v9391_v0, %v7879_v62 }
 0x5a4   :  { %v9411_v40 = vpop.f32.mrf.mxu0 }
 0x5a6   :  { %v9412_v4 = vpop.f32.mrf.mxu0 }
 0x5a7   :  { %v9413_v33 = vadd.f32 %v9412_v4, %v9411_v40 }
 0x5a8   :  { %v9414_v27 = vpop.f32.mrf.mxu0 }
 0x5a9   :  { %v8227_v21 = vadd.f32 %v9413_v33, %v8053_v25 }
 0x5aa   :  { %v9415_v59 = vpop.f32.mrf.mxu0 }
 0x5ab   :  { %v8235_v9 = vadd.f32 %v9262_v36, %v8227_v21 }
 0x5ad   :  { %8236 = vst [vmem:[#allocation10] sm:$0x3] %v8235_v9 }
 0x5ae   :  { %9661 = shalt.err (!%p9658_p10)
}
 0x5af   :  { %8246 = dma.vmem_to_hbm [thread:$0]  %s8244_s6, 32, %s10209_s5, [#allocation4]  }
 0x5b0   :  { %9676 = dma.done.wait [#allocation4], 32  }
 0x5b1   :  { %9677 = vsyncadd [#allocation4], 4294967264 }
 0x5b2   :  { %8250 = vsyncpa [#allocation3], 1 }
 0x5b3   :  { %8251 = vsyncpa [#allocation6], 1 }
 0x5b4   :  { %8252 = vsyncpa [#allocation9], 1 }
 0x5b5   :  { %8253 = vsyncpa [#allocation4], 1 }

</bundles_post_ra>
